<compile_context>
chip_gen: v6e
topology: v6e:2x2x1
jax: 0.10.0
libtpu: 0.0.40
codegen_flags: <defaults>
</compile_context>

<pallas_src>
import functools

import jax
import jax.numpy as jnp
import numpy as np
from jax.experimental import pallas as pl
from jax.experimental.pallas import tpu as pltpu


def _round_up(x, m):
    return ((x + m - 1) // m) * m


def _pick_batch_block(B, T, d_in, d_out, kc_pad, *, target_rows=1024,
                      vmem_budget=24 * 1024 * 1024, bytes_per=4):
    """Largest divisor of B s.t. rows=Bblk*T stays VMEM-friendly and >=2 steps remain."""
    best = 1
    for cand in range(1, B + 1):
        if B % cand:
            continue
        rows = cand * T
        if cand > 1 and rows % 8:                       # keep blocks sublane-aligned
            continue
        if rows > max(target_rows, T):                  # cap matmul M per step
            continue
        # rough per-step VMEM: double-buffered x block + out block + im2col scratch
        if rows * (2 * d_in + kc_pad + 2 * d_out) * bytes_per > vmem_budget:
            continue
        if B > 1 and B // cand < 2:                     # >=2 steps: both v7x TCs get work
            continue
        best = cand
    return best


def _im2col_into_scratch(x_ref, xcat_ref, *, context_size, dilation, pad,
                         seq_len, d_in, b_blk):
    """Build the (b_blk*T, Kc_pad) im2col matrix for this block in VMEM.

    Tap k of batch element b lands at rows [b*T, (b+1)*T), columns
    [k*d_in, (k+1)*d_in).  Conv zero-padding rows and the contraction-padding
    columns [K*d_in, Kc_pad) are written as explicit zeros, so no halo-padded
    copy of x exists anywhere.  All slices are static -> plain VMEM stores.
    """
    T = seq_len
    K = context_size
    kd = K * d_in
    kc_pad = xcat_ref.shape[-1]
    rows = b_blk * T
    if kc_pad > kd:   # zero contraction-padding columns (match w's zero rows)
        xcat_ref[:, kd:kc_pad] = jnp.zeros((rows, kc_pad - kd), xcat_ref.dtype)
    for b in range(b_blk):
        r0 = b * T
        for k in range(K):
            shift = k * dilation - pad      # output row t reads x row t + shift
            c0 = k * d_in
            if shift < 0:
                nz = -shift
                xcat_ref[r0:r0 + nz, c0:c0 + d_in] = \
                    jnp.zeros((nz, d_in), xcat_ref.dtype)
                xcat_ref[r0 + nz:r0 + T, c0:c0 + d_in] = \
                    x_ref[r0:r0 + T - nz, :].astype(xcat_ref.dtype)
            elif shift > 0:
                nz = shift
                xcat_ref[r0:r0 + T - nz, c0:c0 + d_in] = \
                    x_ref[r0 + nz:r0 + T, :].astype(xcat_ref.dtype)
                xcat_ref[r0 + T - nz:r0 + T, c0:c0 + d_in] = \
                    jnp.zeros((nz, d_in), xcat_ref.dtype)
            else:
                xcat_ref[r0:r0 + T, c0:c0 + d_in] = \
                    x_ref[r0:r0 + T, :].astype(xcat_ref.dtype)


def _conv_relu(x_ref, w_ref, b_ref, xcat_ref, im2col_kw):
    """im2col + one folded MXU matmul + bias + ReLU -> (rows, D_out) f32."""
    _im2col_into_scratch(x_ref, xcat_ref, **im2col_kw)
    # TODO(synk): on v7x the lane-axis im2col could be replaced by K accumulating
    # depth-D_in matmuls (MRB accumulates in place); the folded matmul is best
    # on v5e/v6e where each shallow matmul pays an MRF drain.
    acc = jnp.dot(xcat_ref[...], w_ref[...], preferred_element_type=jnp.float32)
    # TODO(synk): dropout_p=0.0 in the reference config -> identity; p>0
    # training-mode dropout would use pltpu.prng_seed/prng_random_bits here.
    return jnp.maximum(acc + b_ref[...], 0.0)


def _stats_kernel(x_ref, w_ref, b_ref, sum_ref, sq_ref, xcat_ref, *, im2col_kw):
    # Pass 1: conv + bias + ReLU, emit per-step partial channel statistics only
    # (no activation written to HBM).  No cross-step carry -> grid stays parallel.
    act = _conv_relu(x_ref, w_ref, b_ref, xcat_ref, im2col_kw)
    sum_ref[0] = jnp.sum(act, axis=0, keepdims=True)
    sq_ref[0] = jnp.sum(act * act, axis=0, keepdims=True)


def _apply_kernel(x_ref, w_ref, b_ref, scale_ref, shift_ref, o_ref, xcat_ref,
                  *, im2col_kw):
    # Pass 2: recompute conv + bias + ReLU (cheap: x is D_in/D_out smaller than
    # the activations) and fuse the BN affine -> single lane-dense output write.
    act = _conv_relu(x_ref, w_ref, b_ref, xcat_ref, im2col_kw)
    o_ref[...] = (act * scale_ref[...] + shift_ref[...]).astype(o_ref.dtype)


def tdnn_forward(x, weight, bias, gamma, beta, *, context_size=5, stride=1,
                 dilation=1, eps=1e-5, compute_dtype=jnp.float32,
                 batch_block=None):
    """x: (B, T, D_in); weight: (D_out, D_in, K); returns (B, T, D_out)."""
    assert stride == 1, "reference config uses stride=1"
    assert context_size % 2 == 1
    B, T, D_in = x.shape
    D_out = weight.shape[0]
    K = context_size
    pad = (K - 1) // 2 * dilation
    kd = K * D_in
    kc_pad = max(_round_up(kd, 128), 128)   # pad contraction to full lane groups

    # Flat 2D row view of x (free reshape) in the matmul input dtype.
    x2d = x.reshape(B * T, D_in).astype(compute_dtype)
    # (D_out, D_in, K) -> (K, D_in, D_out) -> (K*D_in, D_out), zero rows appended:
    # row k*D_in + c multiplies tap k, input channel c (matches the im2col bands).
    w_flat = jnp.transpose(weight.astype(jnp.float32), (2, 1, 0)).reshape(kd, D_out)
    w_pad = jnp.zeros((kc_pad, D_out), jnp.float32).at[:kd, :].set(w_flat)
    w_pad = w_pad.astype(compute_dtype)
    b2 = bias.astype(jnp.float32).reshape(1, D_out)

    if batch_block is None:
        batch_block = _pick_batch_block(B, T, D_in, D_out, kc_pad)
    assert B % batch_block == 0
    steps = B // batch_block
    rows = batch_block * T
    # TODO(synk): for very long sequences, additionally tile T with a
    # (context_size-1)*dilation-row halo per tile (v7x has only 64 MiB VMEM);
    # full-T blocks are fine at these sizes.

    im2col_kw = dict(context_size=K, dilation=dilation, pad=pad,
                     seq_len=T, d_in=D_in, b_blk=batch_block)
    stats_kernel = functools.partial(_stats_kernel, im2col_kw=im2col_kw)
    apply_kernel = functools.partial(_apply_kernel, im2col_kw=im2col_kw)

    x_spec = pl.BlockSpec((rows, D_in), lambda i: (i, 0))
    w_spec = pl.BlockSpec((kc_pad, D_out), lambda i: (0, 0))
    vec_spec = pl.BlockSpec((1, D_out), lambda i: (0, 0))
    scratch = [pltpu.VMEM((rows, kc_pad), compute_dtype)]
    cparams = pltpu.CompilerParams(dimension_semantics=("parallel",))

    # ---- Pass 1: conv + ReLU -> per-step partial BN statistics (tiny outputs).
    sums, sqs = pl.pallas_call(
        stats_kernel,
        out_shape=(jax.ShapeDtypeStruct((steps, 1, D_out), jnp.float32),
                   jax.ShapeDtypeStruct((steps, 1, D_out), jnp.float32)),
        grid=(steps,),
        in_specs=[x_spec, w_spec, vec_spec],
        out_specs=(pl.BlockSpec((1, 1, D_out), lambda i: (i, 0, 0)),
                   pl.BlockSpec((1, 1, D_out), lambda i: (i, 0, 0))),
        scratch_shapes=scratch,
        compiler_params=cparams,
    )(x2d, w_pad, b2)

    # Tiny per-channel scalar math (D_out values) — plain JAX glue.
    # (E[x^2] - mean^2 in f32; post-ReLU activations keep this well-conditioned.)
    n = jnp.float32(B * T)
    mean = jnp.sum(sums, axis=(0, 1)) / n
    var = jnp.maximum(jnp.sum(sqs, axis=(0, 1)) / n - mean * mean, 0.0)
    scale = gamma.astype(jnp.float32) * jax.lax.rsqrt(var + eps)
    shift = beta.astype(jnp.float32) - mean * scale
    scale2 = scale.reshape(1, D_out)
    shift2 = shift.reshape(1, D_out)

    # ---- Pass 2: re-read x, recompute conv + ReLU, fuse BN affine, write out.
    out2d = pl.pallas_call(
        apply_kernel,
        out_shape=jax.ShapeDtypeStruct((B * T, D_out), jnp.float32),
        grid=(steps,),
        in_specs=[x_spec, w_spec, vec_spec, vec_spec, vec_spec],
        out_specs=pl.BlockSpec((rows, D_out), lambda i: (i, 0)),
        scratch_shapes=scratch,
        compiler_params=cparams,
    )(x2d, w_pad, b2, scale2, shift2)

    return out2d.reshape(B, T, D_out)


def tdnn_reference(x, weight, bias, gamma, beta, *, context_size, dilation,
                   eps=1e-5):
    """Pure-JAX reference mirroring the PyTorch forward (training-mode BN)."""
    pad = (context_size - 1) // 2 * dilation
    xt = jnp.transpose(x, (0, 2, 1))                               # (B, D_in, T)
    y = jax.lax.conv_general_dilated(
        xt, weight, window_strides=(1,), padding=[(pad, pad)],
        rhs_dilation=(dilation,), dimension_numbers=("NCH", "OIH", "NCH"))
    y = y + bias[None, :, None]
    y = jnp.maximum(y, 0.0)
    mean = jnp.mean(y, axis=(0, 2), keepdims=True)
    var = jnp.mean((y - mean) ** 2, axis=(0, 2), keepdims=True)
    y = (y - mean) / jnp.sqrt(var + eps) * gamma[None, :, None] \
        + beta[None, :, None]
    return jnp.transpose(y, (0, 2, 1))


if __name__ == "__main__":
    # Small, TPU-friendly shapes consistent with the module's interface:
    # D_OUT a multiple of 128 -> lane-dense stores; T a multiple of 8.
    B, T, D_IN, D_OUT = 4, 128, 24, 128
    CONTEXT, DILATION = 5, 1

    key = jax.random.PRNGKey(0)
    kx, kw, kb, kg, kbeta = jax.random.split(key, 5)
    x = jax.random.normal(kx, (B, T, D_IN), jnp.float32)
    weight = jax.random.normal(kw, (D_OUT, D_IN, CONTEXT), jnp.float32) * 0.1
    bias = jax.random.normal(kb, (D_OUT,), jnp.float32) * 0.1
    gamma = 1.0 + 0.1 * jax.random.normal(kg, (D_OUT,), jnp.float32)
    beta = 0.1 * jax.random.normal(kbeta, (D_OUT,), jnp.float32)

    fwd = jax.jit(functools.partial(tdnn_forward, context_size=CONTEXT,
                                    dilation=DILATION))
    out = jax.block_until_ready(fwd(x, weight, bias, gamma, beta))

    ref = tdnn_reference(x, weight, bias, gamma, beta,
                         context_size=CONTEXT, dilation=DILATION)
    np.testing.assert_allclose(np.asarray(out), np.asarray(ref),
                               rtol=1e-3, atol=1e-3)
    assert out.shape == (B, T, D_OUT)
    print("KERNEL_OK")
</pallas_src>

<mosaic_0001>
module attributes {stable_mosaic.version = 11 : i64} {
  func.func @_stats_kernel(%arg0: i32, %arg1: memref<256x24xf32, #tpu.memory_space<vmem>>, %arg2: memref<128x128xf32, #tpu.memory_space<vmem>>, %arg3: memref<1x128xf32, #tpu.memory_space<vmem>>, %arg4: memref<1x1x128xf32, #tpu.memory_space<vmem>>, %arg5: memref<1x1x128xf32, #tpu.memory_space<vmem>>, %arg6: memref<256x128xf32, #tpu.memory_space<vmem>>) attributes {dimension_semantics = [#tpu.dimension_semantics<parallel>], iteration_bounds = array<i64: 2>, scalar_prefetch = 0 : i64, scratch_operands = 1 : i64, tpu.core_type = #tpu.core_type<tc>, window_params = [{transform_indices = @transform_0, window_bounds = array<i64: 256, 24>}, {pipeline_mode = #tpu.pipeline_mode<synchronous>, transform_indices = @transform_1, window_bounds = array<i64: 128, 128>}, {pipeline_mode = #tpu.pipeline_mode<synchronous>, transform_indices = @transform_2, window_bounds = array<i64: 1, 128>}, {transform_indices = @transform_3, window_bounds = array<i64: 1, 1, 128>}, {transform_indices = @transform_4, window_bounds = array<i64: 1, 1, 128>}]} {
    %cst = arith.constant 0.000000e+00 : f32
    %0 = vector.broadcast %cst : f32 to vector<256x8xf32>
    %c0 = arith.constant 0 : index
    %c120 = arith.constant 120 : index
    %1 = vector.load %arg6[%c0, %c120] : memref<256x128xf32, #tpu.memory_space<vmem>>, vector<256x8xf32>
    tpu.vector_store %arg6[%c0, %c120], %0 {strides = array<i32>} : memref<256x128xf32, #tpu.memory_space<vmem>>, vector<256x8xf32>,
    %cst_0 = arith.constant 0.000000e+00 : f32
    %2 = vector.broadcast %cst_0 : f32 to vector<2x24xf32>
    %c0_1 = arith.constant 0 : index
    %c0_2 = arith.constant 0 : index
    %3 = vector.load %arg6[%c0_1, %c0_2] : memref<256x128xf32, #tpu.memory_space<vmem>>, vector<2x24xf32>
    tpu.vector_store %arg6[%c0_1, %c0_2], %2 {strides = array<i32>} : memref<256x128xf32, #tpu.memory_space<vmem>>, vector<2x24xf32>,
    %c0_3 = arith.constant 0 : index
    %c0_4 = arith.constant 0 : index
    %4 = vector.load %arg1[%c0_3, %c0_4] : memref<256x24xf32, #tpu.memory_space<vmem>>, vector<126x24xf32>
    %c2 = arith.constant 2 : index
    %c0_5 = arith.constant 0 : index
    %5 = vector.load %arg6[%c2, %c0_5] : memref<256x128xf32, #tpu.memory_space<vmem>>, vector<126x24xf32>
    tpu.vector_store %arg6[%c2, %c0_5], %4 {strides = array<i32>} : memref<256x128xf32, #tpu.memory_space<vmem>>, vector<126x24xf32>,
    %cst_6 = arith.constant 0.000000e+00 : f32
    %6 = vector.broadcast %cst_6 : f32 to vector<1x24xf32>
    %c0_7 = arith.constant 0 : index
    %c24 = arith.constant 24 : index
    %7 = vector.load %arg6[%c0_7, %c24] : memref<256x128xf32, #tpu.memory_space<vmem>>, vector<1x24xf32>
    tpu.vector_store %arg6[%c0_7, %c24], %6 {strides = array<i32>} : memref<256x128xf32, #tpu.memory_space<vmem>>, vector<1x24xf32>,
    %c0_8 = arith.constant 0 : index
    %c0_9 = arith.constant 0 : index
    %8 = vector.load %arg1[%c0_8, %c0_9] : memref<256x24xf32, #tpu.memory_space<vmem>>, vector<127x24xf32>
    %c1 = arith.constant 1 : index
    %c24_10 = arith.constant 24 : index
    %9 = vector.load %arg6[%c1, %c24_10] : memref<256x128xf32, #tpu.memory_space<vmem>>, vector<127x24xf32>
    tpu.vector_store %arg6[%c1, %c24_10], %8 {strides = array<i32>} : memref<256x128xf32, #tpu.memory_space<vmem>>, vector<127x24xf32>,
    %c0_11 = arith.constant 0 : index
    %c0_12 = arith.constant 0 : index
    %10 = vector.load %arg1[%c0_11, %c0_12] : memref<256x24xf32, #tpu.memory_space<vmem>>, vector<128x24xf32>
    %c0_13 = arith.constant 0 : index
    %c48 = arith.constant 48 : index
    %11 = vector.load %arg6[%c0_13, %c48] : memref<256x128xf32, #tpu.memory_space<vmem>>, vector<128x24xf32>
    tpu.vector_store %arg6[%c0_13, %c48], %10 {strides = array<i32>} : memref<256x128xf32, #tpu.memory_space<vmem>>, vector<128x24xf32>,
    %c1_14 = arith.constant 1 : index
    %c0_15 = arith.constant 0 : index
    %12 = vector.load %arg1[%c1_14, %c0_15] : memref<256x24xf32, #tpu.memory_space<vmem>>, vector<127x24xf32>
    %c0_16 = arith.constant 0 : index
    %c72 = arith.constant 72 : index
    %13 = vector.load %arg6[%c0_16, %c72] : memref<256x128xf32, #tpu.memory_space<vmem>>, vector<127x24xf32>
    tpu.vector_store %arg6[%c0_16, %c72], %12 {strides = array<i32>} : memref<256x128xf32, #tpu.memory_space<vmem>>, vector<127x24xf32>,
    %cst_17 = arith.constant 0.000000e+00 : f32
    %14 = vector.broadcast %cst_17 : f32 to vector<1x24xf32>
    %c127 = arith.constant 127 : index
    %c72_18 = arith.constant 72 : index
    %15 = vector.load %arg6[%c127, %c72_18] : memref<256x128xf32, #tpu.memory_space<vmem>>, vector<1x24xf32>
    tpu.vector_store %arg6[%c127, %c72_18], %14 {strides = array<i32>} : memref<256x128xf32, #tpu.memory_space<vmem>>, vector<1x24xf32>,
    %c2_19 = arith.constant 2 : index
    %c0_20 = arith.constant 0 : index
    %16 = vector.load %arg1[%c2_19, %c0_20] : memref<256x24xf32, #tpu.memory_space<vmem>>, vector<126x24xf32>
    %c0_21 = arith.constant 0 : index
    %c96 = arith.constant 96 : index
    %17 = vector.load %arg6[%c0_21, %c96] : memref<256x128xf32, #tpu.memory_space<vmem>>, vector<126x24xf32>
    tpu.vector_store %arg6[%c0_21, %c96], %16 {strides = array<i32>} : memref<256x128xf32, #tpu.memory_space<vmem>>, vector<126x24xf32>,
    %cst_22 = arith.constant 0.000000e+00 : f32
    %18 = vector.broadcast %cst_22 : f32 to vector<2x24xf32>
    %c126 = arith.constant 126 : index
    %c96_23 = arith.constant 96 : index
    %19 = vector.load %arg6[%c126, %c96_23] : memref<256x128xf32, #tpu.memory_space<vmem>>, vector<2x24xf32>
    tpu.vector_store %arg6[%c126, %c96_23], %18 {strides = array<i32>} : memref<256x128xf32, #tpu.memory_space<vmem>>, vector<2x24xf32>,
    %cst_24 = arith.constant 0.000000e+00 : f32
    %20 = vector.broadcast %cst_24 : f32 to vector<2x24xf32>
    %c128 = arith.constant 128 : index
    %c0_25 = arith.constant 0 : index
    %21 = vector.load %arg6[%c128, %c0_25] : memref<256x128xf32, #tpu.memory_space<vmem>>, vector<2x24xf32>
    tpu.vector_store %arg6[%c128, %c0_25], %20 {strides = array<i32>} : memref<256x128xf32, #tpu.memory_space<vmem>>, vector<2x24xf32>,
    %c128_26 = arith.constant 128 : index
    %c0_27 = arith.constant 0 : index
    %22 = vector.load %arg1[%c128_26, %c0_27] : memref<256x24xf32, #tpu.memory_space<vmem>>, vector<126x24xf32>
    %c130 = arith.constant 130 : index
    %c0_28 = arith.constant 0 : index
    %23 = vector.load %arg6[%c130, %c0_28] : memref<256x128xf32, #tpu.memory_space<vmem>>, vector<126x24xf32>
    tpu.vector_store %arg6[%c130, %c0_28], %22 {strides = array<i32>} : memref<256x128xf32, #tpu.memory_space<vmem>>, vector<126x24xf32>,
    %cst_29 = arith.constant 0.000000e+00 : f32
    %24 = vector.broadcast %cst_29 : f32 to vector<1x24xf32>
    %c128_30 = arith.constant 128 : index
    %c24_31 = arith.constant 24 : index
    %25 = vector.load %arg6[%c128_30, %c24_31] : memref<256x128xf32, #tpu.memory_space<vmem>>, vector<1x24xf32>
    tpu.vector_store %arg6[%c128_30, %c24_31], %24 {strides = array<i32>} : memref<256x128xf32, #tpu.memory_space<vmem>>, vector<1x24xf32>,
    %c128_32 = arith.constant 128 : index
    %c0_33 = arith.constant 0 : index
    %26 = vector.load %arg1[%c128_32, %c0_33] : memref<256x24xf32, #tpu.memory_space<vmem>>, vector<127x24xf32>
    %c129 = arith.constant 129 : index
    %c24_34 = arith.constant 24 : index
    %27 = vector.load %arg6[%c129, %c24_34] : memref<256x128xf32, #tpu.memory_space<vmem>>, vector<127x24xf32>
    tpu.vector_store %arg6[%c129, %c24_34], %26 {strides = array<i32>} : memref<256x128xf32, #tpu.memory_space<vmem>>, vector<127x24xf32>,
    %c128_35 = arith.constant 128 : index
    %c0_36 = arith.constant 0 : index
    %28 = vector.load %arg1[%c128_35, %c0_36] : memref<256x24xf32, #tpu.memory_space<vmem>>, vector<128x24xf32>
    %c128_37 = arith.constant 128 : index
    %c48_38 = arith.constant 48 : index
    %29 = vector.load %arg6[%c128_37, %c48_38] : memref<256x128xf32, #tpu.memory_space<vmem>>, vector<128x24xf32>
    tpu.vector_store %arg6[%c128_37, %c48_38], %28 {strides = array<i32>} : memref<256x128xf32, #tpu.memory_space<vmem>>, vector<128x24xf32>,
    %c129_39 = arith.constant 129 : index
    %c0_40 = arith.constant 0 : index
    %30 = vector.load %arg1[%c129_39, %c0_40] : memref<256x24xf32, #tpu.memory_space<vmem>>, vector<127x24xf32>
    %c128_41 = arith.constant 128 : index
    %c72_42 = arith.constant 72 : index
    %31 = vector.load %arg6[%c128_41, %c72_42] : memref<256x128xf32, #tpu.memory_space<vmem>>, vector<127x24xf32>
    tpu.vector_store %arg6[%c128_41, %c72_42], %30 {strides = array<i32>} : memref<256x128xf32, #tpu.memory_space<vmem>>, vector<127x24xf32>,
    %cst_43 = arith.constant 0.000000e+00 : f32
    %32 = vector.broadcast %cst_43 : f32 to vector<1x24xf32>
    %c255 = arith.constant 255 : index
    %c72_44 = arith.constant 72 : index
    %33 = vector.load %arg6[%c255, %c72_44] : memref<256x128xf32, #tpu.memory_space<vmem>>, vector<1x24xf32>
    tpu.vector_store %arg6[%c255, %c72_44], %32 {strides = array<i32>} : memref<256x128xf32, #tpu.memory_space<vmem>>, vector<1x24xf32>,
    %c130_45 = arith.constant 130 : index
    %c0_46 = arith.constant 0 : index
    %34 = vector.load %arg1[%c130_45, %c0_46] : memref<256x24xf32, #tpu.memory_space<vmem>>, vector<126x24xf32>
    %c128_47 = arith.constant 128 : index
    %c96_48 = arith.constant 96 : index
    %35 = vector.load %arg6[%c128_47, %c96_48] : memref<256x128xf32, #tpu.memory_space<vmem>>, vector<126x24xf32>
    tpu.vector_store %arg6[%c128_47, %c96_48], %34 {strides = array<i32>} : memref<256x128xf32, #tpu.memory_space<vmem>>, vector<126x24xf32>,
    %cst_49 = arith.constant 0.000000e+00 : f32
    %36 = vector.broadcast %cst_49 : f32 to vector<2x24xf32>
    %c254 = arith.constant 254 : index
    %c96_50 = arith.constant 96 : index
    %37 = vector.load %arg6[%c254, %c96_50] : memref<256x128xf32, #tpu.memory_space<vmem>>, vector<2x24xf32>
    tpu.vector_store %arg6[%c254, %c96_50], %36 {strides = array<i32>} : memref<256x128xf32, #tpu.memory_space<vmem>>, vector<2x24xf32>,
    %c0_51 = arith.constant 0 : index
    %c0_52 = arith.constant 0 : index
    %38 = vector.load %arg6[%c0_51, %c0_52] : memref<256x128xf32, #tpu.memory_space<vmem>>, vector<256x128xf32>
    %c0_53 = arith.constant 0 : index
    %c0_54 = arith.constant 0 : index
    %39 = vector.load %arg2[%c0_53, %c0_54] : memref<128x128xf32, #tpu.memory_space<vmem>>, vector<128x128xf32>
    %cst_55 = arith.constant dense<0.000000e+00> : vector<256x128xf32>
    %40 = tpu.matmul %38, %39, %cst_55 {dimension_numbers = #tpu.dot_dimension_numbers<[1], [0], [0], [1], [0, 0, 1, 1], [], []>} : vector<256x128xf32>, vector<128x128xf32>, vector<256x128xf32> -> vector<256x128xf32>
    %c0_56 = arith.constant 0 : index
    %c0_57 = arith.constant 0 : index
    %41 = vector.load %arg3[%c0_56, %c0_57] : memref<1x128xf32, #tpu.memory_space<vmem>>, vector<1x128xf32>
    %42 = vector.broadcast %41 : vector<1x128xf32> to vector<256x128xf32>
    %43 = arith.addf %40, %42 : vector<256x128xf32>
    %cst_58 = arith.constant 0.000000e+00 : f32
    %44 = vector.broadcast %cst_58 : f32 to vector<256x128xf32>
    %45 = arith.maximumf %43, %44 : vector<256x128xf32>
    %cst_59 = arith.constant dense<0.000000e+00> : vector<128xf32>
    %46 = vector.multi_reduction <add>, %45, %cst_59 [0] : vector<256x128xf32> to vector<128xf32>
    %47 = vector.shape_cast %46 : vector<128xf32> to vector<1x128xf32>
    %c0_60 = arith.constant 0 : index
    %c0_61 = arith.constant 0 : index
    %c0_62 = arith.constant 0 : index
    %48 = vector.load %arg4[%c0_60, %c0_61, %c0_62] : memref<1x1x128xf32, #tpu.memory_space<vmem>>, vector<1x1x128xf32>
    %49 = vector.shape_cast %48 : vector<1x1x128xf32> to vector<1x128xf32>
    %50 = vector.shape_cast %47 : vector<1x128xf32> to vector<1x1x128xf32>
    tpu.vector_store %arg4[%c0_60, %c0_61, %c0_62], %50 {strides = array<i32>} : memref<1x1x128xf32, #tpu.memory_space<vmem>>, vector<1x1x128xf32>,
    %51 = arith.mulf %45, %45 : vector<256x128xf32>
    %cst_63 = arith.constant dense<0.000000e+00> : vector<128xf32>
    %52 = vector.multi_reduction <add>, %51, %cst_63 [0] : vector<256x128xf32> to vector<128xf32>
    %53 = vector.shape_cast %52 : vector<128xf32> to vector<1x128xf32>
    %c0_64 = arith.constant 0 : index
    %c0_65 = arith.constant 0 : index
    %c0_66 = arith.constant 0 : index
    %54 = vector.load %arg5[%c0_64, %c0_65, %c0_66] : memref<1x1x128xf32, #tpu.memory_space<vmem>>, vector<1x1x128xf32>
    %55 = vector.shape_cast %54 : vector<1x1x128xf32> to vector<1x128xf32>
    %56 = vector.shape_cast %53 : vector<1x128xf32> to vector<1x1x128xf32>
    tpu.vector_store %arg5[%c0_64, %c0_65, %c0_66], %56 {strides = array<i32>} : memref<1x1x128xf32, #tpu.memory_space<vmem>>, vector<1x1x128xf32>,
    return
  }
  func.func @transform_0(%arg0: i32) -> (i32, i32) {
    %c0_i32 = arith.constant 0 : i32
    %c0_i32_0 = arith.constant 0 : i32
    return %arg0, %c0_i32 : i32, i32
  }
  func.func @transform_1(%arg0: i32) -> (i32, i32) {
    %c0_i32 = arith.constant 0 : i32
    %c0_i32_0 = arith.constant 0 : i32
    %c0_i32_1 = arith.constant 0 : i32
    return %c0_i32, %c0_i32_0 : i32, i32
  }
  func.func @transform_2(%arg0: i32) -> (i32, i32) {
    %c0_i32 = arith.constant 0 : i32
    %c0_i32_0 = arith.constant 0 : i32
    %c0_i32_1 = arith.constant 0 : i32
    return %c0_i32, %c0_i32_0 : i32, i32
  }
  func.func @transform_3(%arg0: i32) -> (i32, i32, i32) {
    %c0_i32 = arith.constant 0 : i32
    %c0_i32_0 = arith.constant 0 : i32
    %c0_i32_1 = arith.constant 0 : i32
    return %arg0, %c0_i32, %c0_i32_0 : i32, i32, i32
  }
  func.func @transform_4(%arg0: i32) -> (i32, i32, i32) {
    %c0_i32 = arith.constant 0 : i32
    %c0_i32_0 = arith.constant 0 : i32
    %c0_i32_1 = arith.constant 0 : i32
    return %arg0, %c0_i32, %c0_i32_0 : i32, i32, i32
  }
}

module attributes {stable_mosaic.version = 11 : i64} {
  func.func @_apply_kernel(%arg0: i32, %arg1: memref<256x24xf32, #tpu.memory_space<vmem>>, %arg2: memref<128x128xf32, #tpu.memory_space<vmem>>, %arg3: memref<1x128xf32, #tpu.memory_space<vmem>>, %arg4: memref<1x128xf32, #tpu.memory_space<vmem>>, %arg5: memref<1x128xf32, #tpu.memory_space<vmem>>, %arg6: memref<256x128xf32, #tpu.memory_space<vmem>>, %arg7: memref<256x128xf32, #tpu.memory_space<vmem>>) attributes {dimension_semantics = [#tpu.dimension_semantics<parallel>], iteration_bounds = array<i64: 2>, scalar_prefetch = 0 : i64, scratch_operands = 1 : i64, tpu.core_type = #tpu.core_type<tc>, window_params = [{transform_indices = @transform_0, window_bounds = array<i64: 256, 24>}, {pipeline_mode = #tpu.pipeline_mode<synchronous>, transform_indices = @transform_1, window_bounds = array<i64: 128, 128>}, {pipeline_mode = #tpu.pipeline_mode<synchronous>, transform_indices = @transform_2, window_bounds = array<i64: 1, 128>}, {pipeline_mode = #tpu.pipeline_mode<synchronous>, transform_indices = @transform_3, window_bounds = array<i64: 1, 128>}, {pipeline_mode = #tpu.pipeline_mode<synchronous>, transform_indices = @transform_4, window_bounds = array<i64: 1, 128>}, {transform_indices = @transform_5, window_bounds = array<i64: 256, 128>}]} {
    %cst = arith.constant 0.000000e+00 : f32
    %0 = vector.broadcast %cst : f32 to vector<256x8xf32>
    %c0 = arith.constant 0 : index
    %c120 = arith.constant 120 : index
    %1 = vector.load %arg7[%c0, %c120] : memref<256x128xf32, #tpu.memory_space<vmem>>, vector<256x8xf32>
    tpu.vector_store %arg7[%c0, %c120], %0 {strides = array<i32>} : memref<256x128xf32, #tpu.memory_space<vmem>>, vector<256x8xf32>,
    %cst_0 = arith.constant 0.000000e+00 : f32
    %2 = vector.broadcast %cst_0 : f32 to vector<2x24xf32>
    %c0_1 = arith.constant 0 : index
    %c0_2 = arith.constant 0 : index
    %3 = vector.load %arg7[%c0_1, %c0_2] : memref<256x128xf32, #tpu.memory_space<vmem>>, vector<2x24xf32>
    tpu.vector_store %arg7[%c0_1, %c0_2], %2 {strides = array<i32>} : memref<256x128xf32, #tpu.memory_space<vmem>>, vector<2x24xf32>,
    %c0_3 = arith.constant 0 : index
    %c0_4 = arith.constant 0 : index
    %4 = vector.load %arg1[%c0_3, %c0_4] : memref<256x24xf32, #tpu.memory_space<vmem>>, vector<126x24xf32>
    %c2 = arith.constant 2 : index
    %c0_5 = arith.constant 0 : index
    %5 = vector.load %arg7[%c2, %c0_5] : memref<256x128xf32, #tpu.memory_space<vmem>>, vector<126x24xf32>
    tpu.vector_store %arg7[%c2, %c0_5], %4 {strides = array<i32>} : memref<256x128xf32, #tpu.memory_space<vmem>>, vector<126x24xf32>,
    %cst_6 = arith.constant 0.000000e+00 : f32
    %6 = vector.broadcast %cst_6 : f32 to vector<1x24xf32>
    %c0_7 = arith.constant 0 : index
    %c24 = arith.constant 24 : index
    %7 = vector.load %arg7[%c0_7, %c24] : memref<256x128xf32, #tpu.memory_space<vmem>>, vector<1x24xf32>
    tpu.vector_store %arg7[%c0_7, %c24], %6 {strides = array<i32>} : memref<256x128xf32, #tpu.memory_space<vmem>>, vector<1x24xf32>,
    %c0_8 = arith.constant 0 : index
    %c0_9 = arith.constant 0 : index
    %8 = vector.load %arg1[%c0_8, %c0_9] : memref<256x24xf32, #tpu.memory_space<vmem>>, vector<127x24xf32>
    %c1 = arith.constant 1 : index
    %c24_10 = arith.constant 24 : index
    %9 = vector.load %arg7[%c1, %c24_10] : memref<256x128xf32, #tpu.memory_space<vmem>>, vector<127x24xf32>
    tpu.vector_store %arg7[%c1, %c24_10], %8 {strides = array<i32>} : memref<256x128xf32, #tpu.memory_space<vmem>>, vector<127x24xf32>,
    %c0_11 = arith.constant 0 : index
    %c0_12 = arith.constant 0 : index
    %10 = vector.load %arg1[%c0_11, %c0_12] : memref<256x24xf32, #tpu.memory_space<vmem>>, vector<128x24xf32>
    %c0_13 = arith.constant 0 : index
    %c48 = arith.constant 48 : index
    %11 = vector.load %arg7[%c0_13, %c48] : memref<256x128xf32, #tpu.memory_space<vmem>>, vector<128x24xf32>
    tpu.vector_store %arg7[%c0_13, %c48], %10 {strides = array<i32>} : memref<256x128xf32, #tpu.memory_space<vmem>>, vector<128x24xf32>,
    %c1_14 = arith.constant 1 : index
    %c0_15 = arith.constant 0 : index
    %12 = vector.load %arg1[%c1_14, %c0_15] : memref<256x24xf32, #tpu.memory_space<vmem>>, vector<127x24xf32>
    %c0_16 = arith.constant 0 : index
    %c72 = arith.constant 72 : index
    %13 = vector.load %arg7[%c0_16, %c72] : memref<256x128xf32, #tpu.memory_space<vmem>>, vector<127x24xf32>
    tpu.vector_store %arg7[%c0_16, %c72], %12 {strides = array<i32>} : memref<256x128xf32, #tpu.memory_space<vmem>>, vector<127x24xf32>,
    %cst_17 = arith.constant 0.000000e+00 : f32
    %14 = vector.broadcast %cst_17 : f32 to vector<1x24xf32>
    %c127 = arith.constant 127 : index
    %c72_18 = arith.constant 72 : index
    %15 = vector.load %arg7[%c127, %c72_18] : memref<256x128xf32, #tpu.memory_space<vmem>>, vector<1x24xf32>
    tpu.vector_store %arg7[%c127, %c72_18], %14 {strides = array<i32>} : memref<256x128xf32, #tpu.memory_space<vmem>>, vector<1x24xf32>,
    %c2_19 = arith.constant 2 : index
    %c0_20 = arith.constant 0 : index
    %16 = vector.load %arg1[%c2_19, %c0_20] : memref<256x24xf32, #tpu.memory_space<vmem>>, vector<126x24xf32>
    %c0_21 = arith.constant 0 : index
    %c96 = arith.constant 96 : index
    %17 = vector.load %arg7[%c0_21, %c96] : memref<256x128xf32, #tpu.memory_space<vmem>>, vector<126x24xf32>
    tpu.vector_store %arg7[%c0_21, %c96], %16 {strides = array<i32>} : memref<256x128xf32, #tpu.memory_space<vmem>>, vector<126x24xf32>,
    %cst_22 = arith.constant 0.000000e+00 : f32
    %18 = vector.broadcast %cst_22 : f32 to vector<2x24xf32>
    %c126 = arith.constant 126 : index
    %c96_23 = arith.constant 96 : index
    %19 = vector.load %arg7[%c126, %c96_23] : memref<256x128xf32, #tpu.memory_space<vmem>>, vector<2x24xf32>
    tpu.vector_store %arg7[%c126, %c96_23], %18 {strides = array<i32>} : memref<256x128xf32, #tpu.memory_space<vmem>>, vector<2x24xf32>,
    %cst_24 = arith.constant 0.000000e+00 : f32
    %20 = vector.broadcast %cst_24 : f32 to vector<2x24xf32>
    %c128 = arith.constant 128 : index
    %c0_25 = arith.constant 0 : index
    %21 = vector.load %arg7[%c128, %c0_25] : memref<256x128xf32, #tpu.memory_space<vmem>>, vector<2x24xf32>
    tpu.vector_store %arg7[%c128, %c0_25], %20 {strides = array<i32>} : memref<256x128xf32, #tpu.memory_space<vmem>>, vector<2x24xf32>,
    %c128_26 = arith.constant 128 : index
    %c0_27 = arith.constant 0 : index
    %22 = vector.load %arg1[%c128_26, %c0_27] : memref<256x24xf32, #tpu.memory_space<vmem>>, vector<126x24xf32>
    %c130 = arith.constant 130 : index
    %c0_28 = arith.constant 0 : index
    %23 = vector.load %arg7[%c130, %c0_28] : memref<256x128xf32, #tpu.memory_space<vmem>>, vector<126x24xf32>
    tpu.vector_store %arg7[%c130, %c0_28], %22 {strides = array<i32>} : memref<256x128xf32, #tpu.memory_space<vmem>>, vector<126x24xf32>,
    %cst_29 = arith.constant 0.000000e+00 : f32
    %24 = vector.broadcast %cst_29 : f32 to vector<1x24xf32>
    %c128_30 = arith.constant 128 : index
    %c24_31 = arith.constant 24 : index
    %25 = vector.load %arg7[%c128_30, %c24_31] : memref<256x128xf32, #tpu.memory_space<vmem>>, vector<1x24xf32>
    tpu.vector_store %arg7[%c128_30, %c24_31], %24 {strides = array<i32>} : memref<256x128xf32, #tpu.memory_space<vmem>>, vector<1x24xf32>,
    %c128_32 = arith.constant 128 : index
    %c0_33 = arith.constant 0 : index
    %26 = vector.load %arg1[%c128_32, %c0_33] : memref<256x24xf32, #tpu.memory_space<vmem>>, vector<127x24xf32>
    %c129 = arith.constant 129 : index
    %c24_34 = arith.constant 24 : index
    %27 = vector.load %arg7[%c129, %c24_34] : memref<256x128xf32, #tpu.memory_space<vmem>>, vector<127x24xf32>
    tpu.vector_store %arg7[%c129, %c24_34], %26 {strides = array<i32>} : memref<256x128xf32, #tpu.memory_space<vmem>>, vector<127x24xf32>,
    %c128_35 = arith.constant 128 : index
    %c0_36 = arith.constant 0 : index
    %28 = vector.load %arg1[%c128_35, %c0_36] : memref<256x24xf32, #tpu.memory_space<vmem>>, vector<128x24xf32>
    %c128_37 = arith.constant 128 : index
    %c48_38 = arith.constant 48 : index
    %29 = vector.load %arg7[%c128_37, %c48_38] : memref<256x128xf32, #tpu.memory_space<vmem>>, vector<128x24xf32>
    tpu.vector_store %arg7[%c128_37, %c48_38], %28 {strides = array<i32>} : memref<256x128xf32, #tpu.memory_space<vmem>>, vector<128x24xf32>,
    %c129_39 = arith.constant 129 : index
    %c0_40 = arith.constant 0 : index
    %30 = vector.load %arg1[%c129_39, %c0_40] : memref<256x24xf32, #tpu.memory_space<vmem>>, vector<127x24xf32>
    %c128_41 = arith.constant 128 : index
    %c72_42 = arith.constant 72 : index
    %31 = vector.load %arg7[%c128_41, %c72_42] : memref<256x128xf32, #tpu.memory_space<vmem>>, vector<127x24xf32>
    tpu.vector_store %arg7[%c128_41, %c72_42], %30 {strides = array<i32>} : memref<256x128xf32, #tpu.memory_space<vmem>>, vector<127x24xf32>,
    %cst_43 = arith.constant 0.000000e+00 : f32
    %32 = vector.broadcast %cst_43 : f32 to vector<1x24xf32>
    %c255 = arith.constant 255 : index
    %c72_44 = arith.constant 72 : index
    %33 = vector.load %arg7[%c255, %c72_44] : memref<256x128xf32, #tpu.memory_space<vmem>>, vector<1x24xf32>
    tpu.vector_store %arg7[%c255, %c72_44], %32 {strides = array<i32>} : memref<256x128xf32, #tpu.memory_space<vmem>>, vector<1x24xf32>,
    %c130_45 = arith.constant 130 : index
    %c0_46 = arith.constant 0 : index
    %34 = vector.load %arg1[%c130_45, %c0_46] : memref<256x24xf32, #tpu.memory_space<vmem>>, vector<126x24xf32>
    %c128_47 = arith.constant 128 : index
    %c96_48 = arith.constant 96 : index
    %35 = vector.load %arg7[%c128_47, %c96_48] : memref<256x128xf32, #tpu.memory_space<vmem>>, vector<126x24xf32>
    tpu.vector_store %arg7[%c128_47, %c96_48], %34 {strides = array<i32>} : memref<256x128xf32, #tpu.memory_space<vmem>>, vector<126x24xf32>,
    %cst_49 = arith.constant 0.000000e+00 : f32
    %36 = vector.broadcast %cst_49 : f32 to vector<2x24xf32>
    %c254 = arith.constant 254 : index
    %c96_50 = arith.constant 96 : index
    %37 = vector.load %arg7[%c254, %c96_50] : memref<256x128xf32, #tpu.memory_space<vmem>>, vector<2x24xf32>
    tpu.vector_store %arg7[%c254, %c96_50], %36 {strides = array<i32>} : memref<256x128xf32, #tpu.memory_space<vmem>>, vector<2x24xf32>,
    %c0_51 = arith.constant 0 : index
    %c0_52 = arith.constant 0 : index
    %38 = vector.load %arg7[%c0_51, %c0_52] : memref<256x128xf32, #tpu.memory_space<vmem>>, vector<256x128xf32>
    %c0_53 = arith.constant 0 : index
    %c0_54 = arith.constant 0 : index
    %39 = vector.load %arg2[%c0_53, %c0_54] : memref<128x128xf32, #tpu.memory_space<vmem>>, vector<128x128xf32>
    %cst_55 = arith.constant dense<0.000000e+00> : vector<256x128xf32>
    %40 = tpu.matmul %38, %39, %cst_55 {dimension_numbers = #tpu.dot_dimension_numbers<[1], [0], [0], [1], [0, 0, 1, 1], [], []>} : vector<256x128xf32>, vector<128x128xf32>, vector<256x128xf32> -> vector<256x128xf32>
    %c0_56 = arith.constant 0 : index
    %c0_57 = arith.constant 0 : index
    %41 = vector.load %arg3[%c0_56, %c0_57] : memref<1x128xf32, #tpu.memory_space<vmem>>, vector<1x128xf32>
    %42 = vector.broadcast %41 : vector<1x128xf32> to vector<256x128xf32>
    %43 = arith.addf %40, %42 : vector<256x128xf32>
    %cst_58 = arith.constant 0.000000e+00 : f32
    %44 = vector.broadcast %cst_58 : f32 to vector<256x128xf32>
    %45 = arith.maximumf %43, %44 : vector<256x128xf32>
    %c0_59 = arith.constant 0 : index
    %c0_60 = arith.constant 0 : index
    %46 = vector.load %arg4[%c0_59, %c0_60] : memref<1x128xf32, #tpu.memory_space<vmem>>, vector<1x128xf32>
    %47 = vector.broadcast %46 : vector<1x128xf32> to vector<256x128xf32>
    %48 = arith.mulf %45, %47 : vector<256x128xf32>
    %c0_61 = arith.constant 0 : index
    %c0_62 = arith.constant 0 : index
    %49 = vector.load %arg5[%c0_61, %c0_62] : memref<1x128xf32, #tpu.memory_space<vmem>>, vector<1x128xf32>
    %50 = vector.broadcast %49 : vector<1x128xf32> to vector<256x128xf32>
    %51 = arith.addf %48, %50 : vector<256x128xf32>
    %c0_63 = arith.constant 0 : index
    %c0_64 = arith.constant 0 : index
    %52 = vector.load %arg6[%c0_63, %c0_64] : memref<256x128xf32, #tpu.memory_space<vmem>>, vector<256x128xf32>
    tpu.vector_store %arg6[%c0_63, %c0_64], %51 {strides = array<i32>} : memref<256x128xf32, #tpu.memory_space<vmem>>, vector<256x128xf32>,
    return
  }
  func.func @transform_0(%arg0: i32) -> (i32, i32) {
    %c0_i32 = arith.constant 0 : i32
    %c0_i32_0 = arith.constant 0 : i32
    return %arg0, %c0_i32 : i32, i32
  }
  func.func @transform_1(%arg0: i32) -> (i32, i32) {
    %c0_i32 = arith.constant 0 : i32
    %c0_i32_0 = arith.constant 0 : i32
    %c0_i32_1 = arith.constant 0 : i32
    return %c0_i32, %c0_i32_0 : i32, i32
  }
  func.func @transform_2(%arg0: i32) -> (i32, i32) {
    %c0_i32 = arith.constant 0 : i32
    %c0_i32_0 = arith.constant 0 : i32
    %c0_i32_1 = arith.constant 0 : i32
    return %c0_i32, %c0_i32_0 : i32, i32
  }
  func.func @transform_3(%arg0: i32) -> (i32, i32) {
    %c0_i32 = arith.constant 0 : i32
    %c0_i32_0 = arith.constant 0 : i32
    %c0_i32_1 = arith.constant 0 : i32
    return %c0_i32, %c0_i32_0 : i32, i32
  }
  func.func @transform_4(%arg0: i32) -> (i32, i32) {
    %c0_i32 = arith.constant 0 : i32
    %c0_i32_0 = arith.constant 0 : i32
    %c0_i32_1 = arith.constant 0 : i32
    return %c0_i32, %c0_i32_0 : i32, i32
  }
  func.func @transform_5(%arg0: i32) -> (i32, i32) {
    %c0_i32 = arith.constant 0 : i32
    %c0_i32_0 = arith.constant 0 : i32
    return %arg0, %c0_i32 : i32, i32
  }
}

</mosaic_0001>

<bundles_post_ra>
// kernel: tdnn_forward.3
= control target key start
LH: loop header
LB: loop body
LE: loop exit
PB: predicated region body
PF: predicated region fallthrough
CT: control target
= control target key end

     0   :  { %10 = vsyncpa [#allocation4], 0  ;;  %s2831_s0 = inlined_call_operand.vmem [shape: f32[512,24], index: 0, kind: input, shape index: {}]   ;;  %s2832_s1 = inlined_call_operand.vmem [shape: f32[128,128], index: 1, kind: input, shape index: {}]   ;;  %s2833_s2 = inlined_call_operand.vmem [shape: f32[1,128], index: 2, kind: input, shape index: {}]   ;;  %s2834_s3 = inlined_call_operand.vmem [shape: f32[1,128], index: 3, kind: input, shape index: {}]   ;;  %s2835_s4 = inlined_call_operand.vmem [shape: f32[1,128], index: 4, kind: input, shape index: {}]   ;;  %s2836_s5 = inlined_call_operand.hbm [shape: f32[512,128], index: 5, kind: output, shape index: {}]  }
   0x1   :  { %12 = vsyncpa [#allocation4 + $0x1], 0  ;;  %s1932_s18 = smov 0   ;;  %s1934_s19 = smov 0  }
   0x2   :  { %s1936_s20 = smov 0   ;;  %s1938_s21 = smov 0  }
   0x3 LB: > { %s1953_s22 = sadd.s32 4294967295, %s1892_s21   ;;  %s1610_s23 = sadd.s32 4294967294, %s1892_s21   ;;  %s1892_s21 = sphi %s1938_s21, %s2843_s21   ;;  %s1888_s20 = sphi %s1936_s20, %s2842_s20   ;;  %s1884_s19 = sphi %s1934_s19, %s2841_s19   ;;  %s1880_s18 = sphi %s1932_s18, %s2840_s18  }
   0x4   : > { %s1957_s24 = sadd.s32 1, %s1892_s21   ;;  %s135_s25 = sadd.s32 1, %s1888_s20 }
   0x5   : > { %s132_s26 = ssub.s32 %s1892_s21, %s1957_s24  ;;  %p145_p0 = scmp.ne.s32.totalorder %s1888_s20, %s1884_s19 }
   0x6   : > { %p133_p1 = scmp.eq.s32.totalorder %s132_s26, 0  ;;  %p146_p2 = scmp.eq.s32.totalorder %s1953_s22, 1 }
   0x7   : > { %p151_p3 = scmp.ne.s32.totalorder %s1884_s19, %s1880_s18  ;;  %p152_p4 = scmp.eq.s32.totalorder %s1610_s23, 1 }
   0x8   : > { %s1968_s27 = scalar_select %p133_p1, %s1888_s20, %s135_s25  }
   0x9   : > { %p1970_p5 = por %p146_p2, %p145_p0  ;;  %p1974_p6 = por %p152_p4, %p151_p3 }
   0xa   : > { %p1613_p7 = scmp.ge.s32.totalorder %s1892_s21, 1  ;;  %p191_p8 = scmp.lt.s32.totalorder %s1892_s21, 3 }
   0xc   : > { %p192_p9 = pnand %p1613_p7, %p191_p8 }
   0xd   : > { %s1615_s30 = sshll.u32 (!%p192_p9), %s1953_s22, 5  ;;  %s1895_s25 = smov (!%p192_p9), 24  }
   0xe   : > { %195 = sbr.rel (%p192_p9) target bundleno = 619 (0x26b), region = 40  ;;  %p1983_p10 = scmp.lt.s32.totalorder (!%p192_p9), %s1615_s30, 63 }
   0xf   : > { %s1896_s6 = smov (!%p192_p9), 48   ;;  %s1897_s7 = smov (!%p192_p9), 72  }
  0x10   : > { %s1898_s12 = smov (!%p192_p9), 96  }
  0x13   : > { %vm226_vm0 = vcmask 1048512   ;;  %v1894_v0 = vmov 0.0   ;;  %vm259_vm1 = vcmask 189440   ;;  %vm295_vm2 = vcmask 385216   ;;  %v1159_v1 = vld [vmem:[%s2832_s1 + $0x78] sm:$0xff]  ;;  %v1158_v2 = vld [vmem:[%s2832_s1 + $0x70] sm:$0xff] }
  0x14   : > { %227 = vst.msk [vmem:[#allocation2] sm:$0xff] %vm226_vm0, %v1894_v0  ;;  %228 = vst.msk [vmem:[#allocation2 + $0x8] sm:$0xff] %vm226_vm0, %v1894_v0  ;;  %1674 = vmatprep.subr.mxu0 %v1159_v1  ;;  %1754 = vmatprep.subr.mxu1 %v1159_v1  ;;  %s2845_s30 = smov (!%p1983_p10, %s1615_s30), 63  ;;  %v1157_v3 = vld [vmem:[%s2832_s1 + $0x68] sm:$0xff]  ;;  %vm277_vm3 = vcmask 195584   ;;  %v1156_v4 = vld [vmem:[%s2832_s1 + $0x60] sm:$0xff] }
  0x15   : > { %229 = vst.msk [vmem:[#allocation2 + $0x10] sm:$0xff] %vm226_vm0, %v1894_v0  ;;  %230 = vst.msk [vmem:[#allocation2 + $0x18] sm:$0xff] %vm226_vm0, %v1894_v0  ;;  %1675 = vmatpush3.msra.mxu0 %v1159_v1  ;;  %1770 = vmatpush3.msra.mxu1 %v1159_v1  ;;  %s1616_s13 = sshll.u32 %s2845_s30, 3  ;;  %v1155_v9 = vld [vmem:[%s2832_s1 + $0x58] sm:$0xff]  ;;  %v1154_v28 = vld [vmem:[%s2832_s1 + $0x50] sm:$0xff]  ;;  %vm377_vm4 = vcmask 392384  }
  0x16   : > { %231 = vst.msk [vmem:[#allocation2 + $0x20] sm:$0xff] %vm226_vm0, %v1894_v0  ;;  %232 = vst.msk [vmem:[#allocation2 + $0x28] sm:$0xff] %vm226_vm0, %v1894_v0  ;;  %1676 = vmatprep.subr.mxu0 %v1158_v2  ;;  %1755 = vmatprep.subr.mxu1 %v1158_v2  ;;  %s2071_s16 = scalar_lea.vmem %s2831_s0, %s1616_s13  ;;  %v1153_v29 = vld [vmem:[%s2832_s1 + $0x48] sm:$0xff]  ;;  %v1152_v32 = vld [vmem:[%s2832_s1 + $0x40] sm:$0xff]  ;;  %vm475_vm5 = vcmask 589184   ;;  %vm572_vm6 = vcmask 785984  }
  0x17   : > { %233 = vst.msk [vmem:[#allocation2 + $0x30] sm:$0xff] %vm226_vm0, %v1894_v0  ;;  %234 = vst.msk [vmem:[#allocation2 + $0x38] sm:$0xff] %vm226_vm0, %v1894_v0  ;;  %1677 = vmatpush3.msra.mxu0 %v1158_v2  ;;  %1771 = vmatpush3.msra.mxu1 %v1158_v2  ;;  %v298_v5 = vld [vmem:[%s2071_s16 + $0x8] sm:$0xff]  ;;  %v297_v6 = vld [vmem:[%s2071_s16] sm:$0xff]  ;;  %vm672_vm7 = vcmask 982784   ;;  %vm293_vm8 = vcmask 193536  }
  0x18   : > { %235 = vst.msk [vmem:[#allocation2 + $0x40] sm:$0xff] %vm226_vm0, %v1894_v0  ;;  %236 = vst.msk [vmem:[#allocation2 + $0x48] sm:$0xff] %vm226_vm0, %v1894_v0  ;;  %1678 = vmatprep.subr.mxu0 %v1157_v3  ;;  %1756 = vmatprep.subr.mxu1 %v1157_v3  ;;  %v726_v7 = vld [vmem:[%s2071_s16 + $0x80] sm:$0xff]  ;;  %v727_v8 = vld [vmem:[%s2071_s16 + $0x88] sm:$0xff]  ;;  %vm393_vm9 = vcmask 391360   ;;  %vm590_vm10 = vcmask 778816  }
  0x19   : > { %237 = vst.msk [vmem:[#allocation2 + $0x50] sm:$0xff] %vm226_vm0, %v1894_v0  ;;  %238 = vst.msk [vmem:[#allocation2 + $0x58] sm:$0xff] %vm226_vm0, %v1894_v0  ;;  %1679 = vmatpush3.msra.mxu0 %v1157_v3  ;;  %1772 = vmatpush3.msra.mxu1 %v1157_v3  ;;  %v2090_v10 = vld [vmem:[%s2071_s16 + $0x10] sm:$0xff]  ;;  %v2098_v12 = vld [vmem:[%s2071_s16 + $0x18] sm:$0xff]  ;;  %vm588_vm11 = vcmask 784960   ;;  %vm690_vm12 = vcmask 976640  }
  0x1a   : > { %239 = vst.msk [vmem:[#allocation2 + $0x60] sm:$0xff] %vm226_vm0, %v1894_v0  ;;  %240 = vst.msk [vmem:[#allocation2 + $0x68] sm:$0xff] %vm226_vm0, %v1894_v0  ;;  %331 = vrot.lane.b32.xlu1 %v298_v5, %s1895_s25  ;;  %329 = vrot.lane.b32.xlu0 %v297_v6, %s1895_s25  ;;  %v2093_v11 = vld [vmem:[%s2071_s16 + $0x90] sm:$0xff]  ;;  %v2101_v13 = vld [vmem:[%s2071_s16 + $0x98] sm:$0xff]  ;;  %vm688_vm13 = vcmask 980736   ;;  %s1625_s13 = sshll.u32 %s1953_s22, 12 }
  0x1b   : > { %241 = vst.msk [vmem:[#allocation2 + $0x70] sm:$0xff] %vm226_vm0, %v1894_v0  ;;  %242 = vst.msk [vmem:[#allocation2 + $0x78] sm:$0xff] %vm226_vm0, %v1894_v0  ;;  %1680 = vmatprep.subr.mxu0 %v1156_v4  ;;  %1757 = vmatprep.subr.mxu1 %v1156_v4  ;;  %v2112_v14 = vld [vmem:[%s2071_s16 + $0x20] sm:$0xff]  ;;  %v2120_v16 = vld [vmem:[%s2071_s16 + $0x28] sm:$0xff]  ;;  %s2779_s23 = scalar_lea.hbm %s2836_s5, %s1625_s13  ;;  %s1899_s30 = smov [#allocation3]  }
  0x1c   : > { %243 = vst.msk [vmem:[#allocation2 + $0x80] sm:$0xff] %vm226_vm0, %v1894_v0  ;;  %244 = vst.msk [vmem:[#allocation2 + $0x88] sm:$0xff] %vm226_vm0, %v1894_v0  ;;  %1681 = vmatpush3.msra.mxu0 %v1156_v4  ;;  %1773 = vmatpush3.msra.mxu1 %v1156_v4  ;;  %v2117_v15 = vld [vmem:[%s2071_s16 + $0xa0] sm:$0xff]  ;;  %v2126_v18 = vld [vmem:[%s2071_s16 + $0xa8] sm:$0xff] }
  0x1d   : > { %245 = vst.msk [vmem:[#allocation2 + $0x90] sm:$0xff] %vm226_vm0, %v1894_v0  ;;  %246 = vst.msk [vmem:[#allocation2 + $0x98] sm:$0xff] %vm226_vm0, %v1894_v0  ;;  %1682 = vmatprep.subr.mxu0 %v1155_v9  ;;  %1758 = vmatprep.subr.mxu1 %v1155_v9  ;;  %v492_v17 = vld [vmem:[%s2071_s16 + $0x1] sm:$0xff]  ;;  %v2135_v19 = vld [vmem:[%s2071_s16 + $0x30] sm:$0xff] }
  0x1e   : > { %247 = vst.msk [vmem:[#allocation2 + $0xa0] sm:$0xff] %vm226_vm0, %v1894_v0  ;;  %248 = vst.msk [vmem:[#allocation2 + $0xa8] sm:$0xff] %vm226_vm0, %v1894_v0  ;;  %427 = vrot.lane.b32.xlu1 %v297_v6, %s1896_s6  ;;  %758 = vrot.lane.b32.xlu0 %v726_v7, %s1895_s25  ;;  %v2140_v20 = vld [vmem:[%s2071_s16 + $0xb0] sm:$0xff]  ;;  %v918_v21 = vld [vmem:[%s2071_s16 + $0x81] sm:$0xff] }
  0x1f   : > { %249 = vst.msk [vmem:[#allocation2 + $0xb0] sm:$0xff] %vm226_vm0, %v1894_v0  ;;  %250 = vst.msk [vmem:[#allocation2 + $0xb8] sm:$0xff] %vm226_vm0, %v1894_v0  ;;  %1683 = vmatpush3.msra.mxu0 %v1155_v9  ;;  %1774 = vmatpush3.msra.mxu1 %v1155_v9  ;;  %v2146_v22 = vld [vmem:[%s2071_s16 + $0x38] sm:$0xff]  ;;  %v592_v24 = vld [vmem:[%s2071_s16 + $0x2] sm:$0xff] }
  0x20   : > { %251 = vst.msk [vmem:[#allocation2 + $0xc0] sm:$0xff] %vm226_vm0, %v1894_v0  ;;  %252 = vst.msk [vmem:[#allocation2 + $0xc8] sm:$0xff] %vm226_vm0, %v1894_v0  ;;  %v2149_v23 = vld [vmem:[%s2071_s16 + $0xb8] sm:$0xff]  ;;  %v2161_v25 = vld [vmem:[%s2071_s16 + $0x40] sm:$0xff]  ;;  %1684 = vmatprep.subr.mxu0 %v1154_v28  ;;  %1759 = vmatprep.subr.mxu1 %v1154_v28 }
  0x21   : > { %253 = vst.msk [vmem:[#allocation2 + $0xd0] sm:$0xff] %vm226_vm0, %v1894_v0  ;;  %254 = vst.msk [vmem:[#allocation2 + $0xd8] sm:$0xff] %vm226_vm0, %v1894_v0  ;;  %v493_v26 = vld [vmem:[%s2071_s16 + $0x9] sm:$0xff]  ;;  %v2165_v27 = vld [vmem:[%s2071_s16 + $0xc0] sm:$0xff]  ;;  %1685 = vmatpush3.msra.mxu0 %v1154_v28  ;;  %1775 = vmatpush3.msra.mxu1 %v1154_v28 }
  0x22   : > { %255 = vst.msk [vmem:[#allocation2 + $0xe0] sm:$0xff] %vm226_vm0, %v1894_v0  ;;  %256 = vst.msk [vmem:[#allocation2 + $0xe8] sm:$0xff] %vm226_vm0, %v1894_v0  ;;  %854 = vrot.lane.b32.xlu1 %v726_v7, %s1896_s6  ;;  %760 = vrot.lane.b32.xlu0 %v727_v8, %s1895_s25  ;;  %v2176_v30 = vld [vmem:[%s2071_s16 + $0x48] sm:$0xff]  ;;  %v1151_v35 = vld [vmem:[%s2832_s1 + $0x38] sm:$0xff] }
  0x23   : > { %257 = vst.msk [vmem:[#allocation2 + $0xf0] sm:$0xff] %vm226_vm0, %v1894_v0  ;;  %258 = vst.msk [vmem:[#allocation2 + $0xf8] sm:$0xff] %vm226_vm0, %v1894_v0  ;;  %v2181_v31 = vld [vmem:[%s2071_s16 + $0xc8] sm:$0xff]  ;;  %1686 = vmatprep.subr.mxu0 %v1153_v29  ;;  %1760 = vmatprep.subr.mxu1 %v1153_v29  ;;  %v1150_v37 = vld [vmem:[%s2832_s1 + $0x30] sm:$0xff] }
  0x24   : > { %260 = vst.msk [vmem:[#allocation2] sm:$0x3] %vm259_vm1, %v1894_v0  ;;  %692 = vst.msk [vmem:[#allocation2 + $0x80] sm:$0x3] %vm259_vm1, %v1894_v0  ;;  %v1015_v33 = vld [vmem:[%s2071_s16 + $0x82] sm:$0xff]  ;;  %1687 = vmatpush3.msra.mxu0 %v1153_v29  ;;  %1776 = vmatpush3.msra.mxu1 %v1153_v29  ;;  %v593_v36 = vld [vmem:[%s2071_s16 + $0xa] sm:$0xff] }
  0x25   : > { %296 = vst.msk [vmem:[#allocation2] sm:$0x1] %vm295_vm2, %v1894_v0  ;;  %725 = vst.msk [vmem:[#allocation2 + $0x80] sm:$0x1] %vm295_vm2, %v1894_v0  ;;  %v919_v34 = vld [vmem:[%s2071_s16 + $0x89] sm:$0xff]  ;;  %1688 = vmatprep.subr.mxu0 %v1152_v32  ;;  %1761 = vmatprep.subr.mxu1 %v1152_v32  ;;  %v1148_v41 = vld [vmem:[%s2832_s1 + $0x20] sm:$0xff] }
  0x26   : > { %278 = vst.msk [vmem:[#allocation2 + $0x2] sm:$0xff] %vm277_vm3, %v297_v6  ;;  %279 = vst.msk [vmem:[#allocation2 + $0xa] sm:$0xff] %vm277_vm3, %v298_v5  ;;  %524 = vrot.lane.b32.xlu1 %v492_v17, %s1897_s7  ;;  %429 = vrot.lane.b32.xlu0 %v298_v5, %s1896_s6  ;;  %v2204_v38 = vld [vmem:[%s2071_s16 + $0x50] sm:$0xff]  ;;  %v1149_v39 = vld [vmem:[%s2832_s1 + $0x28] sm:$0xff] }
  0x27   : > { %709 = vst.msk [vmem:[#allocation2 + $0x82] sm:$0xff] %vm277_vm3, %v726_v7  ;;  %710 = vst.msk [vmem:[#allocation2 + $0x8a] sm:$0xff] %vm277_vm3, %v727_v8  ;;  %1689 = vmatpush3.msra.mxu0 %v1152_v32  ;;  %1777 = vmatpush3.msra.mxu1 %v1152_v32  ;;  %v1016_v40 = vld [vmem:[%s2071_s16 + $0x8a] sm:$0xff]  ;;  %v1147_v43 = vld [vmem:[%s2832_s1 + $0x18] sm:$0xff] }
  0x28   : > { %280 = vst.msk [vmem:[#allocation2 + $0x12] sm:$0xff] %vm277_vm3, %v2090_v10  ;;  %711 = vst.msk [vmem:[#allocation2 + $0x92] sm:$0xff] %vm277_vm3, %v2093_v11  ;;  %1690 = vmatprep.subr.mxu0 %v1151_v35  ;;  %1762 = vmatprep.subr.mxu1 %v1151_v35  ;;  %v2219_v42 = vld [vmem:[%s2071_s16 + $0xd0] sm:$0xff]  ;;  %v2230_v44 = vld [vmem:[%s2071_s16 + $0x58] sm:$0xff] }
  0x29   : > { %281 = vst.msk [vmem:[#allocation2 + $0x1a] sm:$0xff] %vm277_vm3, %v2098_v12  ;;  %712 = vst.msk [vmem:[#allocation2 + $0x9a] sm:$0xff] %vm277_vm3, %v2101_v13  ;;  %1691 = vmatpush3.msra.mxu0 %v1151_v35  ;;  %1778 = vmatpush3.msra.mxu1 %v1151_v35  ;;  %v1146_v45 = vld [vmem:[%s2832_s1 + $0x10] sm:$0xff]  ;;  %v1145_v46 = vld [vmem:[%s2832_s1 + $0x8] sm:$0xff] }
  0x2a   : > { %282 = vst.msk [vmem:[#allocation2 + $0x22] sm:$0xff] %vm277_vm3, %v2112_v14  ;;  %713 = vst.msk [vmem:[#allocation2 + $0xa2] sm:$0xff] %vm277_vm3, %v2117_v15  ;;  %950 = vrot.lane.b32.xlu1 %v918_v21, %s1897_s7  ;;  %856 = vrot.lane.b32.xlu0 %v727_v8, %s1896_s6  ;;  %v2245_v47 = vld [vmem:[%s2071_s16 + $0xd8] sm:$0xff]  ;;  %v1144_v49 = vld [vmem:[%s2832_s1] sm:$0xff] }
  0x2b   : > { %283 = vst.msk [vmem:[#allocation2 + $0x2a] sm:$0xff] %vm277_vm3, %v2120_v16  ;;  %714 = vst.msk [vmem:[#allocation2 + $0xaa] sm:$0xff] %vm277_vm3, %v2126_v18  ;;  %1692 = vmatprep.subr.mxu0 %v1150_v37  ;;  %1763 = vmatprep.subr.mxu1 %v1150_v37  ;;  %v494_v48 = vld [vmem:[%s2071_s16 + $0x11] sm:$0xff]  ;;  %v495_v52 = vld [vmem:[%s2071_s16 + $0x19] sm:$0xff] }
  0x2c   : > { %284 = vst.msk [vmem:[#allocation2 + $0x32] sm:$0xff] %vm277_vm3, %v2135_v19  ;;  %715 = vst.msk [vmem:[#allocation2 + $0xb2] sm:$0xff] %vm277_vm3, %v2140_v20  ;;  %1693 = vmatpush3.msra.mxu0 %v1150_v37  ;;  %1779 = vmatpush3.msra.mxu1 %v1150_v37  ;;  %v920_v50 = vld [vmem:[%s2071_s16 + $0x91] sm:$0xff]  ;;  %v921_v54 = vld [vmem:[%s2071_s16 + $0x99] sm:$0xff] }
  0x2d   : > { %285 = vst.msk [vmem:[#allocation2 + $0x3a] sm:$0xff] %vm277_vm3, %v2146_v22  ;;  %716 = vst.msk [vmem:[#allocation2 + $0xba] sm:$0xff] %vm277_vm3, %v2149_v23  ;;  %1694 = vmatprep.subr.mxu0 %v1149_v39  ;;  %1764 = vmatprep.subr.mxu1 %v1149_v39  ;;  %v594_v51 = vld [vmem:[%s2071_s16 + $0x12] sm:$0xff]  ;;  %v595_v55 = vld [vmem:[%s2071_s16 + $0x1a] sm:$0xff] }
  0x2e   : > { %286 = vst.msk [vmem:[#allocation2 + $0x42] sm:$0xff] %vm277_vm3, %v2161_v25  ;;  %717 = vst.msk [vmem:[#allocation2 + $0xc2] sm:$0xff] %vm277_vm3, %v2165_v27  ;;  %624 = vrot.lane.b32.xlu1 %v592_v24, %s1898_s12  ;;  %526 = vrot.lane.b32.xlu0 %v493_v26, %s1897_s7  ;;  %v1017_v53 = vld [vmem:[%s2071_s16 + $0x92] sm:$0xff]  ;;  %v2274_v56 = vld [vmem:[%s2071_s16 + $0x60] sm:$0xff] }
  0x2f   : > { %287 = vst.msk [vmem:[#allocation2 + $0x4a] sm:$0xff] %vm277_vm3, %v2176_v30  ;;  %718 = vst.msk [vmem:[#allocation2 + $0xca] sm:$0xff] %vm277_vm3, %v2181_v31  ;;  %1695 = vmatpush3.msra.mxu0 %v1149_v39  ;;  %1780 = vmatpush3.msra.mxu1 %v1149_v39  ;;  %v1018_v57 = vld [vmem:[%s2071_s16 + $0x9a] sm:$0xff]  ;;  %v2291_v59 = vld [vmem:[%s2071_s16 + $0x68] sm:$0xff] }
  0x30   : > { %288 = vst.msk [vmem:[#allocation2 + $0x52] sm:$0xff] %vm277_vm3, %v2204_v38  ;;  %719 = vst.msk [vmem:[#allocation2 + $0xd2] sm:$0xff] %vm277_vm3, %v2219_v42  ;;  %1696 = vmatprep.subr.mxu0 %v1148_v41  ;;  %1765 = vmatprep.subr.mxu1 %v1148_v41  ;;  %v2283_v58 = vld [vmem:[%s2071_s16 + $0xe0] sm:$0xff]  ;;  %v2300_v60 = vld [vmem:[%s2071_s16 + $0xe8] sm:$0xff] }
  0x31   : > { %1697 = vmatpush3.msra.mxu0 %v1148_v41  ;;  %1781 = vmatpush3.msra.mxu1 %v1148_v41  ;;  %289 = vst.msk [vmem:[#allocation2 + $0x5a] sm:$0xff] %vm277_vm3, %v2230_v44  ;;  %720 = vst.msk [vmem:[#allocation2 + $0xda] sm:$0xff] %vm277_vm3, %v2245_v47  ;;  %v496_v61 = vld [vmem:[%s2071_s16 + $0x21] sm:$0xff]  ;;  %v497_v1 = vld [vmem:[%s2071_s16 + $0x29] sm:$0xff] }
  0x32   : > { %1047 = vrot.lane.b32.xlu1 %v1015_v33, %s1898_s12  ;;  %952 = vrot.lane.b32.xlu0 %v919_v34, %s1897_s7  ;;  %290 = vst.msk [vmem:[#allocation2 + $0x62] sm:$0xff] %vm277_vm3, %v2274_v56  ;;  %721 = vst.msk [vmem:[#allocation2 + $0xe2] sm:$0xff] %vm277_vm3, %v2283_v58  ;;  %v922_v62 = vld [vmem:[%s2071_s16 + $0xa1] sm:$0xff]  ;;  %v923_v3 = vld [vmem:[%s2071_s16 + $0xa9] sm:$0xff] }
  0x33   : > { %1698 = vmatprep.subr.mxu0 %v1147_v43  ;;  %1766 = vmatprep.subr.mxu1 %v1147_v43  ;;  %291 = vst.msk [vmem:[#allocation2 + $0x6a] sm:$0xff] %vm277_vm3, %v2291_v59  ;;  %722 = vst.msk [vmem:[#allocation2 + $0xea] sm:$0xff] %vm277_vm3, %v2300_v60  ;;  %v596_v63 = vld [vmem:[%s2071_s16 + $0x22] sm:$0xff]  ;;  %v597_v4 = vld [vmem:[%s2071_s16 + $0x2a] sm:$0xff] }
  0x34   : > { %1699 = vmatpush3.msra.mxu0 %v1147_v43  ;;  %1782 = vmatpush3.msra.mxu1 %v1147_v43  ;;  %v1019_v2 = vld [vmem:[%s2071_s16 + $0xa2] sm:$0xff]  ;;  %v2326_v5 = vld [vmem:[%s2071_s16 + $0x70] sm:$0xff]  ;;  %v1022_v21 = vld [vmem:[%s2071_s16 + $0xba] sm:$0xff] }
  0x35   : > { %1700 = vmatprep.subr.mxu0 %v1146_v45  ;;  %1767 = vmatprep.subr.mxu1 %v1146_v45  ;;  %292 = vst.msk [vmem:[#allocation2 + $0x72] sm:$0xff] %vm277_vm3, %v2326_v5  ;;  %v1020_v6 = vld [vmem:[%s2071_s16 + $0xaa] sm:$0xff]  ;;  %v500_v32 = vld [vmem:[%s2071_s16 + $0x41] sm:$0xff] }
  0x36   : > { %626 = vrot.lane.b32.xlu1 %v593_v36, %s1898_s12  ;;  %333 = vrot.lane.b32.xlu0 %v2090_v10, %s1895_s25  ;;  %v2335_v7 = vld [vmem:[%s2071_s16 + $0xf0] sm:$0xff]  ;;  %v926_v34 = vld [vmem:[%s2071_s16 + $0xc1] sm:$0xff] }
  0x37   : > { %1701 = vmatpush3.msra.mxu0 %v1146_v45  ;;  %1783 = vmatpush3.msra.mxu1 %v1146_v45  ;;  %723 = vst.msk [vmem:[#allocation2 + $0xf2] sm:$0xff] %vm277_vm3, %v2335_v7  ;;  %v498_v8 = vld [vmem:[%s2071_s16 + $0x31] sm:$0xff]  ;;  %v600_v37 = vld [vmem:[%s2071_s16 + $0x42] sm:$0xff] }
  0x38   : > { %1702 = vmatprep.subr.mxu0 %v1145_v46  ;;  %1768 = vmatprep.subr.mxu1 %v1145_v46  ;;  %v924_v9 = vld [vmem:[%s2071_s16 + $0xb1] sm:$0xff]  ;;  %v501_v39 = vld [vmem:[%s2071_s16 + $0x49] sm:$0xff] }
  0x39   : > { %1703 = vmatpush3.msra.mxu0 %v1145_v46  ;;  %1784 = vmatpush3.msra.mxu1 %v1145_v46  ;;  %v1023_v43 = vld [vmem:[%s2071_s16 + $0xc2] sm:$0xff] }
  0x3a   : > { %1049 = vrot.lane.b32.xlu1 %v1016_v40, %s1898_s12  ;;  %762 = vrot.lane.b32.xlu0 %v2093_v11, %s1895_s25  ;;  %v927_v45 = vld [vmem:[%s2071_s16 + $0xc9] sm:$0xff] }
  0x3b   : > { %1704 = vmatprep.subr.mxu0 %v1144_v49  ;;  %1769 = vmatprep.subr.mxu1 %v1144_v49 }
  0x3c   : > { %1705 = vmatpush3.msra.mxu0 %v1144_v49  ;;  %1785 = vmatpush3.msra.mxu1 %v1144_v49  ;;  %v601_v49 = vld [vmem:[%s2071_s16 + $0x4a] sm:$0xff] }
  0x3e   : > { %431 = vrot.lane.b32.xlu1 %v2090_v10, %s1896_s6  ;;  %335 = vrot.lane.b32.xlu0 %v2098_v12, %s1895_s25  ;;  %v598_v10 = vld [vmem:[%s2071_s16 + $0x32] sm:$0xff] }
  0x42   : > { %858 = vrot.lane.b32.xlu1 %v2093_v11, %s1896_s6  ;;  %764 = vrot.lane.b32.xlu0 %v2101_v13, %s1895_s25  ;;  %v499_v11 = vld [vmem:[%s2071_s16 + $0x39] sm:$0xff] }
  0x46   : > { %528 = vrot.lane.b32.xlu1 %v494_v48, %s1897_s7  ;;  %433 = vrot.lane.b32.xlu0 %v2098_v12, %s1896_s6 }
  0x4a   : > { %954 = vrot.lane.b32.xlu1 %v920_v50, %s1897_s7  ;;  %860 = vrot.lane.b32.xlu0 %v2101_v13, %s1896_s6 }
  0x4e   : > { %628 = vrot.lane.b32.xlu1 %v594_v51, %s1898_s12  ;;  %530 = vrot.lane.b32.xlu0 %v495_v52, %s1897_s7 }
  0x52   : > { %1051 = vrot.lane.b32.xlu1 %v1017_v53, %s1898_s12  ;;  %956 = vrot.lane.b32.xlu0 %v921_v54, %s1897_s7  ;;  %v1024_v53 = vld [vmem:[%s2071_s16 + $0xca] sm:$0xff] }
  0x56   : > { %630 = vrot.lane.b32.xlu1 %v595_v55, %s1898_s12  ;;  %337 = vrot.lane.b32.xlu0 %v2112_v14, %s1895_s25 }
  0x5a   : > { %1053 = vrot.lane.b32.xlu1 %v1018_v57, %s1898_s12  ;;  %766 = vrot.lane.b32.xlu0 %v2117_v15, %s1895_s25 }
  0x5e   : > { %435 = vrot.lane.b32.xlu1 %v2112_v14, %s1896_s6  ;;  %339 = vrot.lane.b32.xlu0 %v2120_v16, %s1895_s25  ;;  %v1021_v14 = vld [vmem:[%s2071_s16 + $0xb2] sm:$0xff] }
  0x62   : > { %862 = vrot.lane.b32.xlu1 %v2117_v15, %s1896_s6  ;;  %768 = vrot.lane.b32.xlu0 %v2126_v18, %s1895_s25  ;;  %v925_v15 = vld [vmem:[%s2071_s16 + $0xb9] sm:$0xff] }
  0x66   : > { %532 = vrot.lane.b32.xlu1 %v496_v61, %s1897_s7  ;;  %437 = vrot.lane.b32.xlu0 %v2120_v16, %s1896_s6 }
  0x6a   : > { %958 = vrot.lane.b32.xlu1 %v922_v62, %s1897_s7  ;;  %864 = vrot.lane.b32.xlu0 %v2126_v18, %s1896_s6  ;;  %v599_v18 = vld [vmem:[%s2071_s16 + $0x3a] sm:$0xff] }
  0x6e   : > { %632 = vrot.lane.b32.xlu1 %v596_v63, %s1898_s12  ;;  %534 = vrot.lane.b32.xlu0 %v497_v1, %s1897_s7  ;;  %v502_v1 = vld [vmem:[%s2071_s16 + $0x51] sm:$0xff] }
  0x72   : > { %1055 = vrot.lane.b32.xlu1 %v1019_v2, %s1898_s12  ;;  %960 = vrot.lane.b32.xlu0 %v923_v3, %s1897_s7  ;;  %v928_v3 = vld [vmem:[%s2071_s16 + $0xd1] sm:$0xff] }
  0x76   : > { %634 = vrot.lane.b32.xlu1 %v597_v4, %s1898_s12  ;;  %341 = vrot.lane.b32.xlu0 %v2135_v19, %s1895_s25 }
  0x7a   : > { %1057 = vrot.lane.b32.xlu1 %v1020_v6, %s1898_s12  ;;  %770 = vrot.lane.b32.xlu0 %v2140_v20, %s1895_s25 }
  0x7e   : > { %439 = vrot.lane.b32.xlu1 %v2135_v19, %s1896_s6  ;;  %343 = vrot.lane.b32.xlu0 %v2146_v22, %s1895_s25 }
  0x82   : > { %866 = vrot.lane.b32.xlu1 %v2140_v20, %s1896_s6  ;;  %772 = vrot.lane.b32.xlu0 %v2149_v23, %s1895_s25 }
  0x86   : > { %536 = vrot.lane.b32.xlu1 %v498_v8, %s1897_s7  ;;  %441 = vrot.lane.b32.xlu0 %v2146_v22, %s1896_s6  ;;  %v602_v8 = vld [vmem:[%s2071_s16 + $0x52] sm:$0xff] }
  0x8a   : > { %962 = vrot.lane.b32.xlu1 %v924_v9, %s1897_s7  ;;  %868 = vrot.lane.b32.xlu0 %v2149_v23, %s1896_s6  ;;  %v503_v9 = vld [vmem:[%s2071_s16 + $0x59] sm:$0xff] }
  0x8c   : > { %v332_v12 = vpop.permute.xlu1 %331  ;;  %v330_v13 = vpop.permute.xlu0 %329 }
  0x8d   : > { %379 = vst.msk [vmem:[#allocation2 + $0x9] sm:$0xff] %vm377_vm4, %v332_v12  ;;  %378 = vst.msk [vmem:[#allocation2 + $0x1] sm:$0xff] %vm377_vm4, %v330_v13  ;;  %v1025_v12 = vld [vmem:[%s2071_s16 + $0xd2] sm:$0xff] }
  0x8e   : > { %636 = vrot.lane.b32.xlu1 %v598_v10, %s1898_s12  ;;  %538 = vrot.lane.b32.xlu0 %v499_v11, %s1897_s7  ;;  %v929_v13 = vld [vmem:[%s2071_s16 + $0xd9] sm:$0xff] }
  0x90   : > { %v428_v16 = vpop.permute.xlu1 %427  ;;  %v759_v17 = vpop.permute.xlu0 %758 }
  0x91   : > { %476 = vst.msk [vmem:[#allocation2] sm:$0xff] %vm475_vm5, %v428_v16  ;;  %v603_v16 = vld [vmem:[%s2071_s16 + $0x5a] sm:$0xff] }
  0x92   : > { %806 = vst.msk [vmem:[#allocation2 + $0x81] sm:$0xff] %vm377_vm4, %v759_v17  ;;  %1059 = vrot.lane.b32.xlu1 %v1021_v14, %s1898_s12  ;;  %964 = vrot.lane.b32.xlu0 %v925_v15, %s1897_s7 }
  0x94   : > { %v855_v19 = vpop.permute.xlu1 %854  ;;  %v761_v20 = vpop.permute.xlu0 %760 }
  0x95   : > { %902 = vst.msk [vmem:[#allocation2 + $0x80] sm:$0xff] %vm475_vm5, %v855_v19 }
  0x96   : > { %807 = vst.msk [vmem:[#allocation2 + $0x89] sm:$0xff] %vm377_vm4, %v761_v20  ;;  %638 = vrot.lane.b32.xlu1 %v599_v18, %s1898_s12  ;;  %345 = vrot.lane.b32.xlu0 %v2161_v25, %s1895_s25  ;;  %v1026_v20 = vld [vmem:[%s2071_s16 + $0xda] sm:$0xff] }
  0x98   : > { %v525_v22 = vpop.permute.xlu1 %524  ;;  %v430_v23 = vpop.permute.xlu0 %429 }
  0x99   : > { %573 = vst.msk [vmem:[#allocation2] sm:$0xff] %vm572_vm6, %v525_v22 }
  0x9a   : > { %477 = vst.msk [vmem:[#allocation2 + $0x8] sm:$0xff] %vm475_vm5, %v430_v23  ;;  %1061 = vrot.lane.b32.xlu1 %v1022_v21, %s1898_s12  ;;  %774 = vrot.lane.b32.xlu0 %v2165_v27, %s1895_s25 }
  0x9c   : > { %v951_v24 = vpop.permute.xlu1 %950  ;;  %v857_v26 = vpop.permute.xlu0 %856 }
  0x9d   : > { %998 = vst.msk [vmem:[#allocation2 + $0x80] sm:$0xff] %vm572_vm6, %v951_v24 }
  0x9e   : > { %903 = vst.msk [vmem:[#allocation2 + $0x88] sm:$0xff] %vm475_vm5, %v857_v26  ;;  %443 = vrot.lane.b32.xlu1 %v2161_v25, %s1896_s6  ;;  %347 = vrot.lane.b32.xlu0 %v2176_v30, %s1895_s25 }
  0xa0   : > { %v625_v28 = vpop.permute.xlu1 %624  ;;  %v527_v29 = vpop.permute.xlu0 %526 }
  0xa1   : > { %673 = vst.msk [vmem:[#allocation2] sm:$0xff] %vm672_vm7, %v625_v28 }
  0xa2   : > { %574 = vst.msk [vmem:[#allocation2 + $0x8] sm:$0xff] %vm572_vm6, %v527_v29  ;;  %870 = vrot.lane.b32.xlu1 %v2165_v27, %s1896_s6  ;;  %776 = vrot.lane.b32.xlu0 %v2181_v31, %s1895_s25  ;;  %v504_v29 = vld [vmem:[%s2071_s16 + $0x61] sm:$0xff] }
  0xa4   : > { %v1048_v25 = vpop.permute.xlu1 %1047  ;;  %v953_v33 = vpop.permute.xlu0 %952 }
  0xa5   : > { %1095 = vst.msk [vmem:[#allocation2 + $0x80] sm:$0xff] %vm672_vm7, %v1048_v25  ;;  %v930_v25 = vld [vmem:[%s2071_s16 + $0xe1] sm:$0xff] }
  0xa6   : > { %999 = vst.msk [vmem:[#allocation2 + $0x88] sm:$0xff] %vm572_vm6, %v953_v33  ;;  %540 = vrot.lane.b32.xlu1 %v500_v32, %s1897_s7  ;;  %445 = vrot.lane.b32.xlu0 %v2176_v30, %s1896_s6 }
  0xa8   : > { %v627_v35 = vpop.permute.xlu1 %626  ;;  %v334_v27 = vpop.permute.xlu0 %333  ;;  %v1112_v36 = vld [vmem:[#allocation2] sm:$0xff] }
  0xa9   : > { %674 = vst.msk [vmem:[#allocation2 + $0x8] sm:$0xff] %vm672_vm7, %v627_v35  ;;  %1706 = vmatprep.mubr.f32.mxu0 %v1112_v36  ;;  %v604_v35 = vld [vmem:[%s2071_s16 + $0x62] sm:$0xff] }
  0xaa   : > { %380 = vst.msk [vmem:[#allocation2 + $0x11] sm:$0xff] %vm377_vm4, %v334_v27  ;;  %966 = vrot.lane.b32.xlu1 %v926_v34, %s1897_s7  ;;  %872 = vrot.lane.b32.xlu0 %v2181_v31, %s1896_s6  ;;  %v505_v27 = vld [vmem:[%s2071_s16 + $0x69] sm:$0xff] }
  0xac   : > { %v1050_v40 = vpop.permute.xlu1 %1049  ;;  %v763_v30 = vpop.permute.xlu0 %762  ;;  %v1128_v41 = vld [vmem:[#allocation2 + $0x80] sm:$0xff] }
  0xad   : > { %1096 = vst.msk [vmem:[#allocation2 + $0x88] sm:$0xff] %vm672_vm7, %v1050_v40  ;;  %1730 = vmatprep.mubr.f32.mxu1 %v1128_v41  ;;  %v931_v40 = vld [vmem:[%s2071_s16 + $0xe9] sm:$0xff] }
  0xae   : > { %808 = vst.msk [vmem:[#allocation2 + $0x91] sm:$0xff] %vm377_vm4, %v763_v30  ;;  %640 = vrot.lane.b32.xlu1 %v600_v37, %s1898_s12  ;;  %542 = vrot.lane.b32.xlu0 %v501_v39, %s1897_s7  ;;  %v1027_v39 = vld [vmem:[%s2071_s16 + $0xe2] sm:$0xff] }
  0xb0   : > { %v432_v46 = vpop.permute.xlu1 %431  ;;  %v336_v48 = vpop.permute.xlu0 %335  ;;  %v1113_v31 = vld [vmem:[#allocation2 + $0x8] sm:$0xff] }
  0xb1   : > { %478 = vst.msk [vmem:[#allocation2 + $0x10] sm:$0xff] %vm475_vm5, %v432_v46  ;;  %1707 = vmatmul.mubr.f32.vlgmr.msra.gmra.mxu0 %v1113_v31  ;;  %v708_v46 = vld [vmem:[%s2071_s16 + $0xf8] sm:$0x3f] }
  0xb2   : > { %381 = vst.msk [vmem:[#allocation2 + $0x19] sm:$0xff] %vm377_vm4, %v336_v48  ;;  %1063 = vrot.lane.b32.xlu1 %v1023_v43, %s1898_s12  ;;  %968 = vrot.lane.b32.xlu0 %v927_v45, %s1897_s7  ;;  %v605_v45 = vld [vmem:[%s2071_s16 + $0x6a] sm:$0xff] }
  0xb3   : > { %724 = vst.msk [vmem:[#allocation2 + $0xfa] sm:$0x3f] %vm293_vm8, %v708_v46 }
  0xb4   : > { %v859_v50 = vpop.permute.xlu1 %858  ;;  %v765_v51 = vpop.permute.xlu0 %764  ;;  %v1129_v52 = vld [vmem:[#allocation2 + $0x88] sm:$0xff] }
  0xb5   : > { %904 = vst.msk [vmem:[#allocation2 + $0x90] sm:$0xff] %vm475_vm5, %v859_v50  ;;  %1731 = vmatmul.mubr.f32.vlgmr.msra.gmra.mxu1 %v1129_v52  ;;  %v1028_v50 = vld [vmem:[%s2071_s16 + $0xea] sm:$0xff] }
  0xb6   : > { %809 = vst.msk [vmem:[#allocation2 + $0x99] sm:$0xff] %vm377_vm4, %v765_v51  ;;  %642 = vrot.lane.b32.xlu1 %v601_v49, %s1898_s12  ;;  %349 = vrot.lane.b32.xlu0 %v2204_v38, %s1895_s25 }
  0xb8   : > { %v529_v54 = vpop.permute.xlu1 %528  ;;  %v434_v55 = vpop.permute.xlu0 %433 }
  0xb9   : > { %575 = vst.msk [vmem:[#allocation2 + $0x10] sm:$0xff] %vm572_vm6, %v529_v54 }
  0xba   : > { %479 = vst.msk [vmem:[#allocation2 + $0x18] sm:$0xff] %vm475_vm5, %v434_v55  ;;  %1065 = vrot.lane.b32.xlu1 %v1024_v53, %s1898_s12  ;;  %778 = vrot.lane.b32.xlu0 %v2219_v42, %s1895_s25  ;;  %v312_v53 = vld [vmem:[%s2071_s16 + $0x78] sm:$0x7f] }
  0xbc   : > { %v955_v57 = vpop.permute.xlu1 %954  ;;  %v861_v61 = vpop.permute.xlu0 %860 }
  0xbd   : > { %1000 = vst.msk [vmem:[#allocation2 + $0x90] sm:$0xff] %vm572_vm6, %v955_v57  ;;  %v741_v57 = vld [vmem:[%s2071_s16 + $0xf8] sm:$0x7f] }
  0xbe   : > { %905 = vst.msk [vmem:[#allocation2 + $0x98] sm:$0xff] %vm475_vm5, %v861_v61  ;;  %447 = vrot.lane.b32.xlu1 %v2204_v38, %s1896_s6  ;;  %351 = vrot.lane.b32.xlu0 %v2230_v44, %s1895_s25 }
  0xc0   : > { %v629_v62 = vpop.permute.xlu1 %628  ;;  %v531_v63 = vpop.permute.xlu0 %530 }
  0xc1   : > { %675 = vst.msk [vmem:[#allocation2 + $0x10] sm:$0xff] %vm672_vm7, %v629_v62 }
  0xc2   : > { %576 = vst.msk [vmem:[#allocation2 + $0x18] sm:$0xff] %vm572_vm6, %v531_v63  ;;  %874 = vrot.lane.b32.xlu1 %v2219_v42, %s1896_s6  ;;  %780 = vrot.lane.b32.xlu0 %v2245_v47, %s1895_s25  ;;  %v506_v63 = vld [vmem:[%s2071_s16 + $0x71] sm:$0xff] }
  0xc4   : > { %v1052_v2 = vpop.permute.xlu1 %1051  ;;  %v957_v38 = vpop.permute.xlu0 %956 }
  0xc5   : > { %1097 = vst.msk [vmem:[#allocation2 + $0x90] sm:$0xff] %vm672_vm7, %v1052_v2 }
  0xc6   : > { %1001 = vst.msk [vmem:[#allocation2 + $0x98] sm:$0xff] %vm572_vm6, %v957_v38  ;;  %544 = vrot.lane.b32.xlu1 %v502_v1, %s1897_s7  ;;  %449 = vrot.lane.b32.xlu0 %v2230_v44, %s1896_s6  ;;  %v410_v1 = vld [vmem:[%s2071_s16 + $0x78] sm:$0xff] }
  0xc7   : > { %v932_v38 = vld [vmem:[%s2071_s16 + $0xf1] sm:$0xff] }
  0xc8   : > { %v631_v4 = vpop.permute.xlu1 %630  ;;  %v338_v42 = vpop.permute.xlu0 %337  ;;  %v1114_v6 = vld [vmem:[#allocation2 + $0x10] sm:$0xff] }
  0xc9   : > { %676 = vst.msk [vmem:[#allocation2 + $0x18] sm:$0xff] %vm672_vm7, %v631_v4  ;;  %1709 = vmatprep.mubr.f32.mxu0 %v1114_v6  ;;  %v606_v6 = vld [vmem:[%s2071_s16 + $0x72] sm:$0xff] }
  0xca   : > { %382 = vst.msk [vmem:[#allocation2 + $0x21] sm:$0xff] %vm377_vm4, %v338_v42  ;;  %970 = vrot.lane.b32.xlu1 %v928_v3, %s1897_s7  ;;  %876 = vrot.lane.b32.xlu0 %v2245_v47, %s1896_s6  ;;  %v837_v3 = vld [vmem:[%s2071_s16 + $0xf8] sm:$0xff] }
  0xcc   : > { %v1054_v10 = vpop.permute.xlu1 %1053  ;;  %v767_v44 = vpop.permute.xlu0 %766  ;;  %v1130_v11 = vld [vmem:[#allocation2 + $0x90] sm:$0xff] }
  0xcd   : > { %1098 = vst.msk [vmem:[#allocation2 + $0x98] sm:$0xff] %vm672_vm7, %v1054_v10  ;;  %1733 = vmatprep.mubr.f32.mxu1 %v1130_v11  ;;  %v1029_v11 = vld [vmem:[%s2071_s16 + $0xf2] sm:$0xff] }
  0xce   : > { %810 = vst.msk [vmem:[#allocation2 + $0xa1] sm:$0xff] %vm377_vm4, %v767_v44  ;;  %644 = vrot.lane.b32.xlu1 %v602_v8, %s1898_s12  ;;  %546 = vrot.lane.b32.xlu0 %v503_v9, %s1897_s7  ;;  %v507_v8 = vld [vmem:[%s2071_s16 + $0x79] sm:$0x7f] }
  0xd0   : > { %v436_v14 = vpop.permute.xlu1 %435  ;;  %v340_v15 = vpop.permute.xlu0 %339  ;;  %v1115_v47 = vld [vmem:[#allocation2 + $0x18] sm:$0xff] }
  0xd1   : > { %480 = vst.msk [vmem:[#allocation2 + $0x20] sm:$0xff] %vm475_vm5, %v436_v14  ;;  %1710 = vmatmul.mubr.f32.gmra.mxu0 %v1115_v47  ;;  %v1030_v47 = vld [vmem:[%s2071_s16 + $0xfa] sm:$0x3f] }
  0xd2   : > { %383 = vst.msk [vmem:[#allocation2 + $0x29] sm:$0xff] %vm377_vm4, %v340_v15  ;;  %1067 = vrot.lane.b32.xlu1 %v1025_v12, %s1898_s12  ;;  %972 = vrot.lane.b32.xlu0 %v929_v13, %s1897_s7  ;;  %v933_v12 = vld [vmem:[%s2071_s16 + $0xf9] sm:$0x7f] }
  0xd4   : > { %v863_v17 = vpop.permute.xlu1 %862  ;;  %v769_v18 = vpop.permute.xlu0 %768  ;;  %v1131_v19 = vld [vmem:[#allocation2 + $0x98] sm:$0xff] }
  0xd5   : > { %906 = vst.msk [vmem:[#allocation2 + $0xa0] sm:$0xff] %vm475_vm5, %v863_v17  ;;  %1734 = vmatmul.mubr.f32.gmra.mxu1 %v1131_v19 }
  0xd6   : > { %811 = vst.msk [vmem:[#allocation2 + $0xa9] sm:$0xff] %vm377_vm4, %v769_v18  ;;  %646 = vrot.lane.b32.xlu1 %v603_v16, %s1898_s12  ;;  %353 = vrot.lane.b32.xlu0 %v2274_v56, %s1895_s25  ;;  %v607_v16 = vld [vmem:[%s2071_s16 + $0x7a] sm:$0x3f] }
  0xd8   : > { %v533_v21 = vpop.permute.xlu1 %532  ;;  %v438_v22 = vpop.permute.xlu0 %437 }
  0xd9   : > { %577 = vst.msk [vmem:[#allocation2 + $0x20] sm:$0xff] %vm572_vm6, %v533_v21 }
  0xda   : > { %481 = vst.msk [vmem:[#allocation2 + $0x28] sm:$0xff] %vm475_vm5, %v438_v22  ;;  %1069 = vrot.lane.b32.xlu1 %v1026_v20, %s1898_s12  ;;  %782 = vrot.lane.b32.xlu0 %v2283_v58, %s1895_s25 }
  0xdc   : > { %v959_v23 = vpop.permute.xlu1 %958  ;;  %v865_v24 = vpop.permute.xlu0 %864 }
  0xdd   : > { %1002 = vst.msk [vmem:[#allocation2 + $0xa0] sm:$0xff] %vm572_vm6, %v959_v23 }
  0xde   : > { %907 = vst.msk [vmem:[#allocation2 + $0xa8] sm:$0xff] %vm475_vm5, %v865_v24  ;;  %451 = vrot.lane.b32.xlu1 %v2274_v56, %s1896_s6  ;;  %355 = vrot.lane.b32.xlu0 %v2291_v59, %s1895_s25 }
  0xe0   : > { %v633_v26 = vpop.permute.xlu1 %632  ;;  %v535_v28 = vpop.permute.xlu0 %534 }
  0xe1   : > { %677 = vst.msk [vmem:[#allocation2 + $0x20] sm:$0xff] %vm672_vm7, %v633_v26 }
  0xe2   : > { %578 = vst.msk [vmem:[#allocation2 + $0x28] sm:$0xff] %vm572_vm6, %v535_v28  ;;  %878 = vrot.lane.b32.xlu1 %v2283_v58, %s1896_s6  ;;  %784 = vrot.lane.b32.xlu0 %v2300_v60, %s1895_s25 }
  0xe4   : > { %v1056_v32 = vpop.permute.xlu1 %1055  ;;  %v961_v56 = vpop.permute.xlu0 %960 }
  0xe5   : > { %1099 = vst.msk [vmem:[#allocation2 + $0xa0] sm:$0xff] %vm672_vm7, %v1056_v32 }
  0xe6   : > { %1003 = vst.msk [vmem:[#allocation2 + $0xa8] sm:$0xff] %vm572_vm6, %v961_v56  ;;  %548 = vrot.lane.b32.xlu1 %v504_v29, %s1897_s7  ;;  %453 = vrot.lane.b32.xlu0 %v2291_v59, %s1896_s6 }
  0xe8   : > { %v635_v33 = vpop.permute.xlu1 %634  ;;  %v342_v58 = vpop.permute.xlu0 %341  ;;  %v1116_v34 = vld [vmem:[#allocation2 + $0x20] sm:$0xff] }
  0xe9   : > { %678 = vst.msk [vmem:[#allocation2 + $0x28] sm:$0xff] %vm672_vm7, %v635_v33  ;;  %1712 = vmatprep.mubr.f32.mxu0 %v1116_v34 }
  0xea   : > { %384 = vst.msk [vmem:[#allocation2 + $0x31] sm:$0xff] %vm377_vm4, %v342_v58  ;;  %974 = vrot.lane.b32.xlu1 %v930_v25, %s1897_s7  ;;  %880 = vrot.lane.b32.xlu0 %v2300_v60, %s1896_s6  ;;  %v276_v60 = vld [vmem:[%s2071_s16 + $0x78] sm:$0x3f]  ;;  %s1836_s16 = sshll.u32 %s1899_s30, 4  ;;  %s1837_s16 = int_to_ptr.vmem [resolvable:$false] %s1836_s16 }
  0xeb   : > { %294 = vst.msk [vmem:[#allocation2 + $0x7a] sm:$0x3f] %vm293_vm8, %v276_v60 }
  0xec   : > { %v1058_v59 = vpop.permute.xlu1 %1057  ;;  %v771_v36 = vpop.permute.xlu0 %770  ;;  %v1132_v37 = vld [vmem:[#allocation2 + $0xa0] sm:$0xff] }
  0xed   : > { %1100 = vst.msk [vmem:[#allocation2 + $0xa8] sm:$0xff] %vm672_vm7, %v1058_v59  ;;  %1736 = vmatprep.mubr.f32.mxu1 %v1132_v37 }
  0xee   : > { %812 = vst.msk [vmem:[#allocation2 + $0xb1] sm:$0xff] %vm377_vm4, %v771_v36  ;;  %648 = vrot.lane.b32.xlu1 %v604_v35, %s1898_s12  ;;  %550 = vrot.lane.b32.xlu0 %v505_v27, %s1897_s7 }
  0xf0   : > { %v440_v30 = vpop.permute.xlu1 %439  ;;  %v344_v41 = vpop.permute.xlu0 %343  ;;  %v1117_v43 = vld [vmem:[#allocation2 + $0x28] sm:$0xff] }
  0xf1   : > { %482 = vst.msk [vmem:[#allocation2 + $0x30] sm:$0xff] %vm475_vm5, %v440_v30  ;;  %1713 = vmatmul.mubr.f32.gmra.mxu0 %v1117_v43 }
  0xf2   : > { %385 = vst.msk [vmem:[#allocation2 + $0x39] sm:$0xff] %vm377_vm4, %v344_v41  ;;  %1071 = vrot.lane.b32.xlu1 %v1027_v39, %s1898_s12  ;;  %976 = vrot.lane.b32.xlu0 %v931_v40, %s1897_s7 }
  0xf4   : > { %v867_v48 = vpop.permute.xlu1 %866  ;;  %v773_v31 = vpop.permute.xlu0 %772  ;;  %v1133_v49 = vld [vmem:[#allocation2 + $0xa8] sm:$0xff] }
  0xf5   : > { %908 = vst.msk [vmem:[#allocation2 + $0xb0] sm:$0xff] %vm475_vm5, %v867_v48  ;;  %1737 = vmatmul.mubr.f32.gmra.mxu1 %v1133_v49 }
  0xf6   : > { %813 = vst.msk [vmem:[#allocation2 + $0xb9] sm:$0xff] %vm377_vm4, %v773_v31  ;;  %650 = vrot.lane.b32.xlu1 %v605_v45, %s1898_s12  ;;  %357 = vrot.lane.b32.xlu0 %v2326_v5, %s1895_s25 }
  0xf8   : > { %v537_v51 = vpop.permute.xlu1 %536  ;;  %v442_v52 = vpop.permute.xlu0 %441 }
  0xf9   : > { %579 = vst.msk [vmem:[#allocation2 + $0x30] sm:$0xff] %vm572_vm6, %v537_v51 }
  0xfa   : > { %483 = vst.msk [vmem:[#allocation2 + $0x38] sm:$0xff] %vm475_vm5, %v442_v52  ;;  %1073 = vrot.lane.b32.xlu1 %v1028_v50, %s1898_s12  ;;  %786 = vrot.lane.b32.xlu0 %v2335_v7, %s1895_s25 }
  0xfc   : > { %v963_v54 = vpop.permute.xlu1 %962  ;;  %v869_v55 = vpop.permute.xlu0 %868 }
  0xfd   : > { %1004 = vst.msk [vmem:[#allocation2 + $0xb0] sm:$0xff] %vm572_vm6, %v963_v54 }
  0xfe   : > { %909 = vst.msk [vmem:[#allocation2 + $0xb8] sm:$0xff] %vm475_vm5, %v869_v55  ;;  %455 = vrot.lane.b32.xlu1 %v2326_v5, %s1896_s6  ;;  %359 = vrot.lane.b32.xlu0 %v312_v53, %s1895_s25 }
 0x100   : > { %v637_v61 = vpop.permute.xlu1 %636  ;;  %v539_v62 = vpop.permute.xlu0 %538 }
 0x101   : > { %679 = vst.msk [vmem:[#allocation2 + $0x30] sm:$0xff] %vm672_vm7, %v637_v61 }
 0x102   : > { %580 = vst.msk [vmem:[#allocation2 + $0x38] sm:$0xff] %vm572_vm6, %v539_v62  ;;  %882 = vrot.lane.b32.xlu1 %v2335_v7, %s1896_s6  ;;  %788 = vrot.lane.b32.xlu0 %v741_v57, %s1895_s25  ;;  %s1838_s25 = scalar_lea.vmem %s1837_s16, 8192 }
 0x104   : > { %v1060_v2 = vpop.permute.xlu1 %1059  ;;  %v965_v5 = vpop.permute.xlu0 %964 }
 0x105   : > { %1101 = vst.msk [vmem:[#allocation2 + $0xb0] sm:$0xff] %vm672_vm7, %v1060_v2 }
 0x106   : > { %1005 = vst.msk [vmem:[#allocation2 + $0xb8] sm:$0xff] %vm572_vm6, %v965_v5  ;;  %552 = vrot.lane.b32.xlu1 %v506_v63, %s1897_s7  ;;  %457 = vrot.lane.b32.xlu0 %v410_v1, %s1896_s6 }
 0x108   : > { %v639_v4 = vpop.permute.xlu1 %638  ;;  %v346_v7 = vpop.permute.xlu0 %345  ;;  %v1118_v42 = vld [vmem:[#allocation2 + $0x30] sm:$0xff] }
 0x109   : > { %680 = vst.msk [vmem:[#allocation2 + $0x38] sm:$0xff] %vm672_vm7, %v639_v4  ;;  %1715 = vmatprep.mubr.f32.mxu0 %v1118_v42 }
 0x10a   : > { %386 = vst.msk [vmem:[#allocation2 + $0x41] sm:$0xff] %vm377_vm4, %v346_v7  ;;  %978 = vrot.lane.b32.xlu1 %v932_v38, %s1897_s7  ;;  %884 = vrot.lane.b32.xlu0 %v837_v3, %s1896_s6  ;;  %s216_s6 = sand.u32 1, %s1884_s19  }
 0x10b   : > { %s1614_s8 = sshll.u32 %s216_s6, 8  ;;  %s2791_s22 = scalar_lea.sflag [#allocation4], %s216_s6 }
 0x10c   : > { %v1062_v9 = vpop.permute.xlu1 %1061  ;;  %v775_v10 = vpop.permute.xlu0 %774  ;;  %v1134_v44 = vld [vmem:[#allocation2 + $0xb0] sm:$0xff]  ;;  %s2647_s11 = scalar_lea.vmem [#allocation3], %s1614_s8 }
 0x10d   : > { %1102 = vst.msk [vmem:[#allocation2 + $0xb8] sm:$0xff] %vm672_vm7, %v1062_v9  ;;  %1739 = vmatprep.mubr.f32.mxu1 %v1134_v44  ;;  %s1548_s14 = sshll.u32 %s2647_s11, 4  ;;  %s2781_s14 = int_to_ptr.vmem [resolvable:$true] %s1548_s14 }
 0x10e   : > { %814 = vst.msk [vmem:[#allocation2 + $0xc1] sm:$0xff] %vm377_vm4, %v775_v10  ;;  %652 = vrot.lane.b32.xlu1 %v606_v6, %s1898_s12  ;;  %554 = vrot.lane.b32.xlu0 %v507_v8, %s1897_s7  ;;  %s1832_s26 = scalar_lea.vmem %s2781_s14, 4096  ;;  %p1839_p0 = scmp.lt.s32.totalorder %s2781_s14, %s1837_s16 }
 0x10f   : > { %p1833_p11 = scmp.ne.s32.totalorder %s2781_s14, %s1832_s26  ;;  %p1840_p1 = scmp.lt.s32.totalorder %s1838_s25, %s1832_s26 }
 0x110   : > { %v444_v13 = vpop.permute.xlu1 %443  ;;  %v348_v14 = vpop.permute.xlu0 %347  ;;  %v1119_v15 = vld [vmem:[#allocation2 + $0x38] sm:$0xff] }
 0x111   : > { %484 = vst.msk [vmem:[#allocation2 + $0x40] sm:$0xff] %vm475_vm5, %v444_v13  ;;  %1716 = vmatmul.mubr.f32.gmra.mxu0 %v1119_v15  ;;  %p1834_p12 = pnand %p1833_p11, %p1970_p5  ;;  %p1841_p2 = por %p1840_p1, %p1839_p0 }
 0x112   : > { %387 = vst.msk [vmem:[#allocation2 + $0x49] sm:$0xff] %vm377_vm4, %v348_v14  ;;  %1075 = vrot.lane.b32.xlu1 %v1029_v11, %s1898_s12  ;;  %980 = vrot.lane.b32.xlu0 %v933_v12, %s1897_s7  ;;  %v2619_v12 = vld [vmem:[%s2833_s2] ss:$0 sm:$0xff] }
 0x113   : > { %p1835_p13 = pneg %p1834_p12 }
 0x114   : > { %v871_v17 = vpop.permute.xlu1 %870  ;;  %v777_v18 = vpop.permute.xlu0 %776  ;;  %v1135_v19 = vld [vmem:[#allocation2 + $0xb8] sm:$0xff] }
 0x115   : > { %910 = vst.msk [vmem:[#allocation2 + $0xc0] sm:$0xff] %vm475_vm5, %v871_v17  ;;  %1740 = vmatmul.mubr.f32.gmra.mxu1 %v1135_v19  ;;  %v2628_v17 = vld [vmem:[%s2834_s3] ss:$0 sm:$0xff]  ;;  %p1842_p3 = pnand %p1841_p2, %p1835_p13 }
 0x116   : > { %815 = vst.msk [vmem:[#allocation2 + $0xc9] sm:$0xff] %vm377_vm4, %v777_v18  ;;  %1077 = vrot.lane.b32.xlu1 %v1030_v47, %s1898_s12  ;;  %654 = vrot.lane.b32.xlu0 %v607_v16, %s1898_s12 }
 0x118   : > { %v541_v20 = vpop.permute.xlu1 %540  ;;  %v446_v21 = vpop.permute.xlu0 %445 }
 0x119   : > { %581 = vst.msk [vmem:[#allocation2 + $0x40] sm:$0xff] %vm572_vm6, %v541_v20 }
 0x11a   : > { %485 = vst.msk [vmem:[#allocation2 + $0x48] sm:$0xff] %vm475_vm5, %v446_v21 }
 0x11c   : > { %v967_v22 = vpop.permute.xlu1 %966  ;;  %v873_v23 = vpop.permute.xlu0 %872 }
 0x11d   : > { %1006 = vst.msk [vmem:[#allocation2 + $0xc0] sm:$0xff] %vm572_vm6, %v967_v22 }
 0x11e   : > { %911 = vst.msk [vmem:[#allocation2 + $0xc8] sm:$0xff] %vm475_vm5, %v873_v23 }
 0x120   : > { %v641_v24 = vpop.permute.xlu1 %640  ;;  %v543_v26 = vpop.permute.xlu0 %542 }
 0x121   : > { %681 = vst.msk [vmem:[#allocation2 + $0x40] sm:$0xff] %vm672_vm7, %v641_v24  ;;  %v2636_v24 = vld [vmem:[%s2835_s4] ss:$0 sm:$0xff] }
 0x122   : > { %582 = vst.msk [vmem:[#allocation2 + $0x48] sm:$0xff] %vm572_vm6, %v543_v26 }
 0x124   : > { %v1064_v28 = vpop.permute.xlu1 %1063  ;;  %v969_v29 = vpop.permute.xlu0 %968 }
 0x125   : > { %1103 = vst.msk [vmem:[#allocation2 + $0xc0] sm:$0xff] %vm672_vm7, %v1064_v28 }
 0x126   : > { %1007 = vst.msk [vmem:[#allocation2 + $0xc8] sm:$0xff] %vm572_vm6, %v969_v29 }
 0x128   : > { %v643_v32 = vpop.permute.xlu1 %642  ;;  %v350_v56 = vpop.permute.xlu0 %349  ;;  %v1120_v25 = vld [vmem:[#allocation2 + $0x40] sm:$0xff] }
 0x129   : > { %682 = vst.msk [vmem:[#allocation2 + $0x48] sm:$0xff] %vm672_vm7, %v643_v32  ;;  %1718 = vmatprep.mubr.f32.mxu0 %v1120_v25 }
 0x12a   : > { %388 = vst.msk [vmem:[#allocation2 + $0x51] sm:$0xff] %vm377_vm4, %v350_v56 }
 0x12c   : > { %v1066_v33 = vpop.permute.xlu1 %1065  ;;  %v779_v58 = vpop.permute.xlu0 %778  ;;  %v1136_v34 = vld [vmem:[#allocation2 + $0xc0] sm:$0xff] }
 0x12d   : > { %1104 = vst.msk [vmem:[#allocation2 + $0xc8] sm:$0xff] %vm672_vm7, %v1066_v33  ;;  %1742 = vmatprep.mubr.f32.mxu1 %v1136_v34 }
 0x12e   : > { %816 = vst.msk [vmem:[#allocation2 + $0xd1] sm:$0xff] %vm377_vm4, %v779_v58 }
 0x130   : > { %v448_v35 = vpop.permute.xlu1 %447  ;;  %v352_v27 = vpop.permute.xlu0 %351  ;;  %v1121_v59 = vld [vmem:[#allocation2 + $0x48] sm:$0xff] }
 0x131   : > { %486 = vst.msk [vmem:[#allocation2 + $0x50] sm:$0xff] %vm475_vm5, %v448_v35  ;;  %1719 = vmatmul.mubr.f32.gmra.mxu0 %v1121_v59 }
 0x132   : > { %389 = vst.msk [vmem:[#allocation2 + $0x59] sm:$0xff] %vm377_vm4, %v352_v27 }
 0x134   : > { %v875_v36 = vpop.permute.xlu1 %874  ;;  %v781_v37 = vpop.permute.xlu0 %780  ;;  %v1137_v39 = vld [vmem:[#allocation2 + $0xc8] sm:$0xff] }
 0x135   : > { %912 = vst.msk [vmem:[#allocation2 + $0xd0] sm:$0xff] %vm475_vm5, %v875_v36  ;;  %1743 = vmatmul.mubr.f32.gmra.mxu1 %v1137_v39 }
 0x136   : > { %817 = vst.msk [vmem:[#allocation2 + $0xd9] sm:$0xff] %vm377_vm4, %v781_v37 }
 0x138   : > { %v545_v40 = vpop.permute.xlu1 %544  ;;  %v450_v60 = vpop.permute.xlu0 %449 }
 0x139   : > { %583 = vst.msk [vmem:[#allocation2 + $0x50] sm:$0xff] %vm572_vm6, %v545_v40 }
 0x13a   : > { %487 = vst.msk [vmem:[#allocation2 + $0x58] sm:$0xff] %vm475_vm5, %v450_v60 }
 0x13c   : > { %v971_v30 = vpop.permute.xlu1 %970  ;;  %v877_v41 = vpop.permute.xlu0 %876 }
 0x13d   : > { %1008 = vst.msk [vmem:[#allocation2 + $0xd0] sm:$0xff] %vm572_vm6, %v971_v30 }
 0x13e   : > { %913 = vst.msk [vmem:[#allocation2 + $0xd8] sm:$0xff] %vm475_vm5, %v877_v41 }
 0x140   : > { %v645_v43 = vpop.permute.xlu1 %644  ;;  %v547_v45 = vpop.permute.xlu0 %546 }
 0x141   : > { %683 = vst.msk [vmem:[#allocation2 + $0x50] sm:$0xff] %vm672_vm7, %v645_v43 }
 0x142   : > { %584 = vst.msk [vmem:[#allocation2 + $0x58] sm:$0xff] %vm572_vm6, %v547_v45 }
 0x144   : > { %v1068_v46 = vpop.permute.xlu1 %1067  ;;  %v973_v48 = vpop.permute.xlu0 %972 }
 0x145   : > { %1105 = vst.msk [vmem:[#allocation2 + $0xd0] sm:$0xff] %vm672_vm7, %v1068_v46 }
 0x146   : > { %1009 = vst.msk [vmem:[#allocation2 + $0xd8] sm:$0xff] %vm572_vm6, %v973_v48 }
 0x148   : > { %v647_v31 = vpop.permute.xlu1 %646  ;;  %v354_v49 = vpop.permute.xlu0 %353  ;;  %v1122_v50 = vld [vmem:[#allocation2 + $0x50] sm:$0xff] }
 0x149   : > { %684 = vst.msk [vmem:[#allocation2 + $0x58] sm:$0xff] %vm672_vm7, %v647_v31  ;;  %1721 = vmatprep.mubr.f32.mxu0 %v1122_v50 }
 0x14a   : > { %390 = vst.msk [vmem:[#allocation2 + $0x61] sm:$0xff] %vm377_vm4, %v354_v49 }
 0x14c   : > { %v1070_v51 = vpop.permute.xlu1 %1069  ;;  %v783_v52 = vpop.permute.xlu0 %782  ;;  %v1138_v53 = vld [vmem:[#allocation2 + $0xd0] sm:$0xff] }
 0x14d   : > { %1106 = vst.msk [vmem:[#allocation2 + $0xd8] sm:$0xff] %vm672_vm7, %v1070_v51  ;;  %1745 = vmatprep.mubr.f32.mxu1 %v1138_v53 }
 0x14e   : > { %818 = vst.msk [vmem:[#allocation2 + $0xe1] sm:$0xff] %vm377_vm4, %v783_v52 }
 0x150   : > { %v452_v54 = vpop.permute.xlu1 %451  ;;  %v356_v55 = vpop.permute.xlu0 %355  ;;  %v1123_v57 = vld [vmem:[#allocation2 + $0x58] sm:$0xff] }
 0x151   : > { %488 = vst.msk [vmem:[#allocation2 + $0x60] sm:$0xff] %vm475_vm5, %v452_v54  ;;  %1722 = vmatmul.mubr.f32.gmra.mxu0 %v1123_v57 }
 0x152   : > { %391 = vst.msk [vmem:[#allocation2 + $0x69] sm:$0xff] %vm377_vm4, %v356_v55 }
 0x154   : > { %v879_v61 = vpop.permute.xlu1 %878  ;;  %v785_v62 = vpop.permute.xlu0 %784  ;;  %v1139_v63 = vld [vmem:[#allocation2 + $0xd8] sm:$0xff] }
 0x155   : > { %914 = vst.msk [vmem:[#allocation2 + $0xe0] sm:$0xff] %vm475_vm5, %v879_v61  ;;  %1746 = vmatmul.mubr.f32.gmra.mxu1 %v1139_v63 }
 0x156   : > { %819 = vst.msk [vmem:[#allocation2 + $0xe9] sm:$0xff] %vm377_vm4, %v785_v62 }
 0x158   : > { %v549_v1 = vpop.permute.xlu1 %548  ;;  %v454_v2 = vpop.permute.xlu0 %453 }
 0x159   : > { %585 = vst.msk [vmem:[#allocation2 + $0x60] sm:$0xff] %vm572_vm6, %v549_v1 }
 0x15a   : > { %489 = vst.msk [vmem:[#allocation2 + $0x68] sm:$0xff] %vm475_vm5, %v454_v2 }
 0x15c   : > { %v975_v5 = vpop.permute.xlu1 %974  ;;  %v881_v38 = vpop.permute.xlu0 %880 }
 0x15d   : > { %1010 = vst.msk [vmem:[#allocation2 + $0xe0] sm:$0xff] %vm572_vm6, %v975_v5 }
 0x15e   : > { %915 = vst.msk [vmem:[#allocation2 + $0xe8] sm:$0xff] %vm475_vm5, %v881_v38 }
 0x160   : > { %v649_v3 = vpop.permute.xlu1 %648  ;;  %v551_v4 = vpop.permute.xlu0 %550 }
 0x161   : > { %685 = vst.msk [vmem:[#allocation2 + $0x60] sm:$0xff] %vm672_vm7, %v649_v3 }
 0x162   : > { %586 = vst.msk [vmem:[#allocation2 + $0x68] sm:$0xff] %vm572_vm6, %v551_v4 }
 0x164   : > { %v1072_v7 = vpop.permute.xlu1 %1071  ;;  %v977_v42 = vpop.permute.xlu0 %976 }
 0x165   : > { %1107 = vst.msk [vmem:[#allocation2 + $0xe0] sm:$0xff] %vm672_vm7, %v1072_v7 }
 0x166   : > { %1011 = vst.msk [vmem:[#allocation2 + $0xe8] sm:$0xff] %vm572_vm6, %v977_v42 }
 0x168   : > { %v651_v6 = vpop.permute.xlu1 %650  ;;  %v358_v8 = vpop.permute.xlu0 %357  ;;  %v1124_v9 = vld [vmem:[#allocation2 + $0x60] sm:$0xff] }
 0x169   : > { %686 = vst.msk [vmem:[#allocation2 + $0x68] sm:$0xff] %vm672_vm7, %v651_v6  ;;  %1724 = vmatprep.mubr.f32.mxu0 %v1124_v9 }
 0x16a   : > { %392 = vst.msk [vmem:[#allocation2 + $0x71] sm:$0xff] %vm377_vm4, %v358_v8 }
 0x16c   : > { %v1074_v10 = vpop.permute.xlu1 %1073  ;;  %v787_v44 = vpop.permute.xlu0 %786  ;;  %v1140_v11 = vld [vmem:[#allocation2 + $0xe0] sm:$0xff] }
 0x16d   : > { %1108 = vst.msk [vmem:[#allocation2 + $0xe8] sm:$0xff] %vm672_vm7, %v1074_v10  ;;  %1748 = vmatprep.mubr.f32.mxu1 %v1140_v11 }
 0x16e   : > { %820 = vst.msk [vmem:[#allocation2 + $0xf1] sm:$0xff] %vm377_vm4, %v787_v44 }
 0x170   : > { %v456_v13 = vpop.permute.xlu1 %455  ;;  %v360_v14 = vpop.permute.xlu0 %359  ;;  %v1125_v15 = vld [vmem:[#allocation2 + $0x68] sm:$0xff] }
 0x171   : > { %490 = vst.msk [vmem:[#allocation2 + $0x70] sm:$0xff] %vm475_vm5, %v456_v13  ;;  %v1708_v47 = vpop.f32.mrf.mxu0  ;;  %1725 = vmatmul.mubr.f32.gmra.mxu0 %v1125_v15 }
 0x172   : > { %394 = vst.msk [vmem:[#allocation2 + $0x79] sm:$0x7f] %vm393_vm9, %v360_v14  ;;  %v1239_v16 = vadd.f32 %v1708_v47, %v2619_v12 }
 0x173   : > { %v1233_v18 = vpop.f32.mrf.mxu0 }
 0x174   : > { %v1393_v19 = vmax.f32 %v1239_v16, 0.0  ;;  %v1234_v20 = vadd.f32 %v2619_v12, %v1233_v18  ;;  %v883_v21 = vpop.permute.xlu1 %882  ;;  %v789_v22 = vpop.permute.xlu0 %788  ;;  %v1141_v23 = vld [vmem:[#allocation2 + $0xe8] sm:$0xff] }
 0x175   : > { %916 = vst.msk [vmem:[#allocation2 + $0xf0] sm:$0xff] %vm475_vm5, %v883_v21  ;;  %v1732_v26 = vpop.f32.mrf.mxu1  ;;  %1749 = vmatmul.mubr.f32.gmra.mxu1 %v1141_v23 }
 0x176   : > { %821 = vst.msk [vmem:[#allocation2 + $0xf9] sm:$0x7f] %vm393_vm9, %v789_v22  ;;  %v1432_v28 = vmul.f32 %v2628_v17, %v1393_v19  ;;  %v1392_v29 = vmax.f32 %v1234_v20, 0.0  ;;  %v1319_v32 = vadd.f32 %v1732_v26, %v2619_v12 }
 0x177   : > { %v1313_v56 = vpop.f32.mrf.mxu1 }
 0x178   : > { %v1471_v25 = vadd.f32 %v2636_v24, %v1432_v28  ;;  %v1431_v33 = vmul.f32 %v2628_v17, %v1392_v29  ;;  %v1409_v58 = vmax.f32 %v1319_v32, 0.0  ;;  %v1314_v34 = vadd.f32 %v2619_v12, %v1313_v56  ;;  %v553_v35 = vpop.permute.xlu1 %552  ;;  %v458_v27 = vpop.permute.xlu0 %457 }
 0x179   : > { %587 = vst.msk [vmem:[#allocation2 + $0x70] sm:$0xff] %vm572_vm6, %v553_v35 }
 0x17a   : > { %491 = vst.msk [vmem:[#allocation2 + $0x78] sm:$0xff] %vm475_vm5, %v458_v27  ;;  %1503 = vst [vmem:[%s2647_s11 + $0x8] sm:$0xff] %v1471_v25  ;;  %v1470_v59 = vadd.f32 %v2636_v24, %v1431_v33  ;;  %v1448_v36 = vmul.f32 %v2628_v17, %v1409_v58  ;;  %v1408_v37 = vmax.f32 %v1314_v34, 0.0 }
 0x17b   : > { %591 = vst.msk [vmem:[#allocation2 + $0x7f] sm:$0x1] %vm590_vm10, %v1894_v0 }
 0x17c   : > { %1502 = vst [vmem:[%s2647_s11] sm:$0xff] %v1470_v59  ;;  %v1487_v39 = vadd.f32 %v2636_v24, %v1448_v36  ;;  %v1447_v40 = vmul.f32 %v2628_v17, %v1408_v37  ;;  %v979_v60 = vpop.permute.xlu1 %978  ;;  %v885_v30 = vpop.permute.xlu0 %884 }
 0x17d   : > { %1012 = vst.msk [vmem:[#allocation2 + $0xf0] sm:$0xff] %vm572_vm6, %v979_v60 }
 0x17e   : > { %917 = vst.msk [vmem:[#allocation2 + $0xf8] sm:$0xff] %vm475_vm5, %v885_v30  ;;  %1519 = vst [vmem:[%s2647_s11 + $0x88] sm:$0xff] %v1487_v39  ;;  %v1486_v41 = vadd.f32 %v2636_v24, %v1447_v40 }
 0x17f   : > { %1014 = vst.msk [vmem:[#allocation2 + $0xff] sm:$0x1] %vm590_vm10, %v1894_v0 }
 0x180   : > { %1518 = vst [vmem:[%s2647_s11 + $0x80] sm:$0xff] %v1486_v41  ;;  %v653_v43 = vpop.permute.xlu1 %652  ;;  %v555_v45 = vpop.permute.xlu0 %554 }
 0x181   : > { %687 = vst.msk [vmem:[#allocation2 + $0x70] sm:$0xff] %vm672_vm7, %v653_v43 }
 0x182   : > { %589 = vst.msk [vmem:[#allocation2 + $0x78] sm:$0x7f] %vm588_vm11, %v555_v45 }
 0x183   : > { %691 = vst.msk [vmem:[#allocation2 + $0x7e] sm:$0x3] %vm690_vm12, %v1894_v0 }
 0x184   : > { %v1076_v46 = vpop.permute.xlu1 %1075  ;;  %v981_v48 = vpop.permute.xlu0 %980 }
 0x185   : > { %1109 = vst.msk [vmem:[#allocation2 + $0xf0] sm:$0xff] %vm672_vm7, %v1076_v46 }
 0x186   : > { %1013 = vst.msk [vmem:[#allocation2 + $0xf8] sm:$0x7f] %vm588_vm11, %v981_v48 }
 0x187   : > { %1111 = vst.msk [vmem:[#allocation2 + $0xfe] sm:$0x3] %vm690_vm12, %v1894_v0 }
 0x188   : > { %v1078_v31 = vpop.permute.xlu1 %1077  ;;  %v655_v49 = vpop.permute.xlu0 %654  ;;  %v1126_v50 = vld [vmem:[#allocation2 + $0x70] sm:$0xff] }
 0x189   : > { %1110 = vst.msk [vmem:[#allocation2 + $0xf8] sm:$0x3f] %vm688_vm13, %v1078_v31  ;;  %689 = vst.msk [vmem:[#allocation2 + $0x78] sm:$0x3f] %vm688_vm13, %v655_v49  ;;  %1727 = vmatprep.mubr.f32.mxu0 %v1126_v50 }
 0x18c   : > { %v1142_v51 = vld [vmem:[#allocation2 + $0xf0] sm:$0xff] }
 0x18d   : > { %1751 = vmatprep.mubr.f32.mxu1 %v1142_v51 }
 0x190   : > { %v1127_v52 = vld [vmem:[#allocation2 + $0x78] sm:$0xff] }
 0x191   : > { %v1143_v53 = vld [vmem:[#allocation2 + $0xf8] sm:$0xff]  ;;  %v1711_v54 = vpop.f32.mrf.mxu0  ;;  %1728 = vmatmul.mubr.f32.gmra.mxu0 %v1127_v52 }
 0x192   : > { %1752 = vmatmul.mubr.f32.gmra.mxu1 %v1143_v53  ;;  %v1249_v55 = vadd.f32 %v1711_v54, %v2619_v12 }
 0x193   : > { %v1243_v57 = vpop.f32.mrf.mxu0 }
 0x194   : > { %v1395_v0 = vmax.f32 %v1249_v55, 0.0  ;;  %v1244_v61 = vadd.f32 %v2619_v12, %v1243_v57 }
 0x195   : > { %v1735_v62 = vpop.f32.mrf.mxu1 }
 0x196   : > { %v1434_v63 = vmul.f32 %v2628_v17, %v1395_v0  ;;  %v1394_v1 = vmax.f32 %v1244_v61, 0.0  ;;  %v1329_v2 = vadd.f32 %v1735_v62, %v2619_v12 }
 0x197   : > { %v1323_v5 = vpop.f32.mrf.mxu1 }
 0x198   : > { %v1473_v38 = vadd.f32 %v2636_v24, %v1434_v63  ;;  %v1433_v3 = vmul.f32 %v2628_v17, %v1394_v1  ;;  %v1411_v4 = vmax.f32 %v1329_v2, 0.0  ;;  %v1324_v7 = vadd.f32 %v2619_v12, %v1323_v5 }
 0x19a   : > { %1505 = vst [vmem:[%s2647_s11 + $0x18] sm:$0xff] %v1473_v38  ;;  %v1472_v42 = vadd.f32 %v2636_v24, %v1433_v3  ;;  %v1450_v6 = vmul.f32 %v2628_v17, %v1411_v4  ;;  %v1410_v8 = vmax.f32 %v1324_v7, 0.0 }
 0x19c   : > { %1504 = vst [vmem:[%s2647_s11 + $0x10] sm:$0xff] %v1472_v42  ;;  %v1489_v9 = vadd.f32 %v2636_v24, %v1450_v6  ;;  %v1449_v10 = vmul.f32 %v2628_v17, %v1410_v8 }
 0x19e   : > { %1521 = vst [vmem:[%s2647_s11 + $0x98] sm:$0xff] %v1489_v9  ;;  %v1488_v44 = vadd.f32 %v2636_v24, %v1449_v10 }
 0x1a0   : > { %1520 = vst [vmem:[%s2647_s11 + $0x90] sm:$0xff] %v1488_v44 }
 0x1b1   : > { %v1714_v11 = vpop.f32.mrf.mxu0 }
 0x1b2   : > { %v1259_v13 = vadd.f32 %v1714_v11, %v2619_v12 }
 0x1b3   : > { %v1253_v14 = vpop.f32.mrf.mxu0 }
 0x1b4   : > { %v1397_v15 = vmax.f32 %v1259_v13, 0.0  ;;  %v1254_v47 = vadd.f32 %v2619_v12, %v1253_v14 }
 0x1b5   : > { %v1738_v16 = vpop.f32.mrf.mxu1 }
 0x1b6   : > { %v1436_v18 = vmul.f32 %v2628_v17, %v1397_v15  ;;  %v1396_v19 = vmax.f32 %v1254_v47, 0.0  ;;  %v1339_v20 = vadd.f32 %v1738_v16, %v2619_v12 }
 0x1b7   : > { %v1333_v21 = vpop.f32.mrf.mxu1 }
 0x1b8   : > { %v1475_v22 = vadd.f32 %v2636_v24, %v1436_v18  ;;  %v1435_v23 = vmul.f32 %v2628_v17, %v1396_v19  ;;  %v1413_v26 = vmax.f32 %v1339_v20, 0.0  ;;  %v1334_v28 = vadd.f32 %v2619_v12, %v1333_v21 }
 0x1ba   : > { %1507 = vst [vmem:[%s2647_s11 + $0x28] sm:$0xff] %v1475_v22  ;;  %v1474_v29 = vadd.f32 %v2636_v24, %v1435_v23  ;;  %v1452_v32 = vmul.f32 %v2628_v17, %v1413_v26  ;;  %v1412_v56 = vmax.f32 %v1334_v28, 0.0 }
 0x1bc   : > { %1506 = vst [vmem:[%s2647_s11 + $0x20] sm:$0xff] %v1474_v29  ;;  %v1491_v25 = vadd.f32 %v2636_v24, %v1452_v32  ;;  %v1451_v33 = vmul.f32 %v2628_v17, %v1412_v56 }
 0x1be   : > { %1523 = vst [vmem:[%s2647_s11 + $0xa8] sm:$0xff] %v1491_v25  ;;  %v1490_v58 = vadd.f32 %v2636_v24, %v1451_v33 }
 0x1c0   : > { %1522 = vst [vmem:[%s2647_s11 + $0xa0] sm:$0xff] %v1490_v58 }
 0x1d1   : > { %v1717_v34 = vpop.f32.mrf.mxu0 }
 0x1d2   : > { %v1269_v35 = vadd.f32 %v1717_v34, %v2619_v12 }
 0x1d3   : > { %v1263_v27 = vpop.f32.mrf.mxu0 }
 0x1d4   : > { %v1399_v59 = vmax.f32 %v1269_v35, 0.0  ;;  %v1264_v36 = vadd.f32 %v2619_v12, %v1263_v27 }
 0x1d5   : > { %v1741_v37 = vpop.f32.mrf.mxu1 }
 0x1d6   : > { %v1438_v39 = vmul.f32 %v2628_v17, %v1399_v59  ;;  %v1398_v40 = vmax.f32 %v1264_v36, 0.0  ;;  %v1349_v60 = vadd.f32 %v1741_v37, %v2619_v12 }
 0x1d7   : > { %v1343_v30 = vpop.f32.mrf.mxu1 }
 0x1d8   : > { %v1477_v41 = vadd.f32 %v2636_v24, %v1438_v39  ;;  %v1437_v43 = vmul.f32 %v2628_v17, %v1398_v40  ;;  %v1415_v45 = vmax.f32 %v1349_v60, 0.0  ;;  %v1344_v46 = vadd.f32 %v2619_v12, %v1343_v30 }
 0x1da   : > { %1509 = vst [vmem:[%s2647_s11 + $0x38] sm:$0xff] %v1477_v41  ;;  %v1476_v48 = vadd.f32 %v2636_v24, %v1437_v43  ;;  %v1454_v31 = vmul.f32 %v2628_v17, %v1415_v45  ;;  %v1414_v49 = vmax.f32 %v1344_v46, 0.0 }
 0x1dc   : > { %1508 = vst [vmem:[%s2647_s11 + $0x30] sm:$0xff] %v1476_v48  ;;  %v1493_v50 = vadd.f32 %v2636_v24, %v1454_v31  ;;  %v1453_v51 = vmul.f32 %v2628_v17, %v1414_v49 }
 0x1de   : > { %1525 = vst [vmem:[%s2647_s11 + $0xb8] sm:$0xff] %v1493_v50  ;;  %v1492_v52 = vadd.f32 %v2636_v24, %v1453_v51 }
 0x1e0   : > { %1524 = vst [vmem:[%s2647_s11 + $0xb0] sm:$0xff] %v1492_v52 }
 0x1f1   : > { %v1720_v53 = vpop.f32.mrf.mxu0 }
 0x1f2   : > { %v1279_v54 = vadd.f32 %v1720_v53, %v2619_v12 }
 0x1f3   : > { %v1273_v55 = vpop.f32.mrf.mxu0 }
 0x1f4   : > { %v1401_v57 = vmax.f32 %v1279_v54, 0.0  ;;  %v1274_v0 = vadd.f32 %v2619_v12, %v1273_v55 }
 0x1f5   : > { %v1744_v61 = vpop.f32.mrf.mxu1 }
 0x1f6   : > { %v1440_v62 = vmul.f32 %v2628_v17, %v1401_v57  ;;  %v1400_v63 = vmax.f32 %v1274_v0, 0.0  ;;  %v1359_v1 = vadd.f32 %v1744_v61, %v2619_v12 }
 0x1f7   : > { %v1353_v2 = vpop.f32.mrf.mxu1 }
 0x1f8   : > { %v1479_v5 = vadd.f32 %v2636_v24, %v1440_v62  ;;  %v1439_v38 = vmul.f32 %v2628_v17, %v1400_v63  ;;  %v1417_v3 = vmax.f32 %v1359_v1, 0.0  ;;  %v1354_v4 = vadd.f32 %v2619_v12, %v1353_v2 }
 0x1fa   : > { %1511 = vst [vmem:[%s2647_s11 + $0x48] sm:$0xff] %v1479_v5  ;;  %v1478_v7 = vadd.f32 %v2636_v24, %v1439_v38  ;;  %v1456_v42 = vmul.f32 %v2628_v17, %v1417_v3  ;;  %v1416_v6 = vmax.f32 %v1354_v4, 0.0 }
 0x1fc   : > { %1510 = vst [vmem:[%s2647_s11 + $0x40] sm:$0xff] %v1478_v7  ;;  %v1495_v8 = vadd.f32 %v2636_v24, %v1456_v42  ;;  %v1455_v9 = vmul.f32 %v2628_v17, %v1416_v6 }
 0x1fe   : > { %1527 = vst [vmem:[%s2647_s11 + $0xc8] sm:$0xff] %v1495_v8  ;;  %v1494_v10 = vadd.f32 %v2636_v24, %v1455_v9 }
 0x200   : > { %1526 = vst [vmem:[%s2647_s11 + $0xc0] sm:$0xff] %v1494_v10 }
 0x211   : > { %v1723_v44 = vpop.f32.mrf.mxu0 }
 0x212   : > { %v1289_v11 = vadd.f32 %v1723_v44, %v2619_v12 }
 0x213   : > { %v1283_v13 = vpop.f32.mrf.mxu0 }
 0x214   : > { %v1403_v14 = vmax.f32 %v1289_v11, 0.0  ;;  %v1284_v15 = vadd.f32 %v2619_v12, %v1283_v13 }
 0x215   : > { %v1747_v47 = vpop.f32.mrf.mxu1 }
 0x216   : > { %v1442_v16 = vmul.f32 %v2628_v17, %v1403_v14  ;;  %v1402_v18 = vmax.f32 %v1284_v15, 0.0  ;;  %v1369_v19 = vadd.f32 %v1747_v47, %v2619_v12 }
 0x217   : > { %v1363_v20 = vpop.f32.mrf.mxu1 }
 0x218   : > { %v1481_v21 = vadd.f32 %v2636_v24, %v1442_v16  ;;  %v1441_v22 = vmul.f32 %v2628_v17, %v1402_v18  ;;  %v1419_v23 = vmax.f32 %v1369_v19, 0.0  ;;  %v1364_v26 = vadd.f32 %v2619_v12, %v1363_v20 }
 0x21a   : > { %1513 = vst [vmem:[%s2647_s11 + $0x58] sm:$0xff] %v1481_v21  ;;  %v1480_v28 = vadd.f32 %v2636_v24, %v1441_v22  ;;  %v1458_v29 = vmul.f32 %v2628_v17, %v1419_v23  ;;  %v1418_v32 = vmax.f32 %v1364_v26, 0.0 }
 0x21c   : > { %1512 = vst [vmem:[%s2647_s11 + $0x50] sm:$0xff] %v1480_v28  ;;  %v1497_v56 = vadd.f32 %v2636_v24, %v1458_v29  ;;  %v1457_v25 = vmul.f32 %v2628_v17, %v1418_v32 }
 0x21e   : > { %1529 = vst [vmem:[%s2647_s11 + $0xd8] sm:$0xff] %v1497_v56  ;;  %v1496_v33 = vadd.f32 %v2636_v24, %v1457_v25 }
 0x220   : > { %1528 = vst [vmem:[%s2647_s11 + $0xd0] sm:$0xff] %v1496_v33 }
 0x231   : > { %v1726_v58 = vpop.f32.mrf.mxu0 }
 0x232   : > { %v1299_v34 = vadd.f32 %v1726_v58, %v2619_v12 }
 0x233   : > { %v1293_v35 = vpop.f32.mrf.mxu0 }
 0x234   : > { %v1405_v27 = vmax.f32 %v1299_v34, 0.0  ;;  %v1294_v59 = vadd.f32 %v2619_v12, %v1293_v35 }
 0x235   : > { %v1750_v36 = vpop.f32.mrf.mxu1 }
 0x236   : > { %v1444_v37 = vmul.f32 %v2628_v17, %v1405_v27  ;;  %v1404_v39 = vmax.f32 %v1294_v59, 0.0  ;;  %v1379_v40 = vadd.f32 %v1750_v36, %v2619_v12 }
 0x237   : > { %v1373_v60 = vpop.f32.mrf.mxu1 }
 0x238   : > { %v1483_v30 = vadd.f32 %v2636_v24, %v1444_v37  ;;  %v1443_v41 = vmul.f32 %v2628_v17, %v1404_v39  ;;  %v1421_v43 = vmax.f32 %v1379_v40, 0.0  ;;  %v1374_v45 = vadd.f32 %v2619_v12, %v1373_v60 }
 0x23a   : > { %1515 = vst [vmem:[%s2647_s11 + $0x68] sm:$0xff] %v1483_v30  ;;  %v1482_v46 = vadd.f32 %v2636_v24, %v1443_v41  ;;  %v1460_v48 = vmul.f32 %v2628_v17, %v1421_v43  ;;  %v1420_v31 = vmax.f32 %v1374_v45, 0.0 }
 0x23c   : > { %1514 = vst [vmem:[%s2647_s11 + $0x60] sm:$0xff] %v1482_v46  ;;  %v1499_v49 = vadd.f32 %v2636_v24, %v1460_v48  ;;  %v1459_v50 = vmul.f32 %v2628_v17, %v1420_v31 }
 0x23e   : > { %1531 = vst [vmem:[%s2647_s11 + $0xe8] sm:$0xff] %v1499_v49  ;;  %v1498_v51 = vadd.f32 %v2636_v24, %v1459_v50 }
 0x240   : > { %1530 = vst [vmem:[%s2647_s11 + $0xe0] sm:$0xff] %v1498_v51 }
 0x251   : > { %v1729_v52 = vpop.f32.mrf.mxu0 }
 0x252   : > { %v1753_v53 = vpop.f32.mrf.mxu1  ;;  %v1309_v54 = vadd.f32 %v1729_v52, %v2619_v12 }
 0x253   : > { %v1389_v55 = vadd.f32 %v1753_v53, %v2619_v12  ;;  %v1303_v57 = vpop.f32.mrf.mxu0 }
 0x254   : > { %v1383_v0 = vpop.f32.mrf.mxu1  ;;  %v1407_v61 = vmax.f32 %v1309_v54, 0.0  ;;  %v1304_v63 = vadd.f32 %v2619_v12, %v1303_v57 }
 0x255   : > { %v1423_v62 = vmax.f32 %v1389_v55, 0.0  ;;  %v1384_v1 = vadd.f32 %v2619_v12, %v1383_v0 }
 0x256   : > { %v1446_v2 = vmul.f32 %v2628_v17, %v1407_v61  ;;  %v1406_v38 = vmax.f32 %v1304_v63, 0.0 }
 0x257   : > { %v1462_v5 = vmul.f32 %v2628_v17, %v1423_v62  ;;  %v1422_v3 = vmax.f32 %v1384_v1, 0.0 }
 0x258   : > { %v1485_v4 = vadd.f32 %v2636_v24, %v1446_v2  ;;  %v1445_v42 = vmul.f32 %v2628_v17, %v1406_v38 }
 0x259   : > { %v1501_v7 = vadd.f32 %v2636_v24, %v1462_v5  ;;  %v1461_v12 = vmul.f32 %v2628_v17, %v1422_v3 }
 0x25a   : > { %1517 = vst [vmem:[%s2647_s11 + $0x78] sm:$0xff] %v1485_v4  ;;  %v1484_v6 = vadd.f32 %v2636_v24, %v1445_v42 }
 0x25b   : > { %1533 = vst [vmem:[%s2647_s11 + $0xf8] sm:$0xff] %v1501_v7  ;;  %v1500_v8 = vadd.f32 %v2636_v24, %v1461_v12 }
 0x25c   : > { %1516 = vst [vmem:[%s2647_s11 + $0x70] sm:$0xff] %v1484_v6 }
 0x25d   : > { %1532 = vst [vmem:[%s2647_s11 + $0xf0] sm:$0xff] %v1500_v8 }
 0x25e   : > { %1845 = shalt.err (!%p1842_p3)
}
 0x25f   : > { %s1846_s6 = scalar_lea.hbm %s2779_s23, 4096  ;;  %s1850_s8 = scalar_lea.hbm %s2836_s5, 8192 }
 0x260   : > { %p1847_p4 = scmp.ne.s32.totalorder %s2779_s23, %s1846_s6  ;;  %p1851_p9 = scmp.lt.s32.totalorder %s2779_s23, %s2836_s5 }
 0x261   : > { %p1852_p10 = scmp.lt.s32.totalorder %s1850_s8, %s1846_s6 }
 0x262   : > { %p1848_p7 = pnand %p1847_p4, %p1970_p5 }
 0x263   : > { %p1853_p11 = por %p1852_p10, %p1851_p9 }
 0x264   : > { %p1849_p8 = pneg %p1848_p7 }
 0x266   : > { %p1854_p12 = pnand %p1853_p11, %p1849_p8 }
 0x268   : > { %1857 = shalt.err (!%p1854_p12)
}
 0x269   : > { %s1900_s11 = smov 128   ;;  %s1901_s13 = smov 8  }
 0x26a   : > { %1786 = dma.vmem_to_hbm [thread:$0]  (%p1970_p5), %s2781_s14, 4096, %s2779_s23, %s2791_s22, %s1900_s11, %s1900_s11, %s1901_s13  }
 0x26b PF: > { %p1792_p13 = scmp.ge.s32.totalorder %s1892_s21, 2  ;;  %s1563_s15 = sand.u32 1, %s1880_s18  }
 0x26c   : > { %s1564_s17 = scalar_lea.sflag [#allocation4], %s1563_s15 }
 0x26d   : > { %p1789_p0 = pnand %p1792_p13, %p1974_p6 }
 0x26f   : > { %p1790_p1 = pneg %p1789_p0 }
 0x271   : > { %1875 = dma.done.wait (%p1790_p1), %s1564_s17, 4096  }
 0x272   : > { %1877 = vsyncadd (%p1790_p1), %s1564_s17, 4294963200  ;;  %p15_p2 = scmp.ge.s32.totalorder %s1957_s24, 4   ;;  %s2840_s18 = smov %s1884_s19 }
 0x273   : > { %s2841_s19 = smov %s1888_s20  ;;  %s2842_s20 = smov %s1968_s27 }
 0x274   : > { %s2843_s21 = smov %s1957_s24  ;;  %17 = sbr.rel (!%p15_p2) target bundleno = 3 (0x3), region = 75 }
 0x279   :  { %1569 = vsyncpa [#allocation4], 1 }
 0x27a   :  { %1571 = vsyncpa [#allocation4 + $0x1], 1 }

// kernel: tdnn_forward.2
= control target key start
LH: loop header
LB: loop body
LE: loop exit
PB: predicated region body
PF: predicated region fallthrough
CT: control target
= control target key end

     0   :  { %s1804_s15 = smov 0   ;;  %s2532_s0 = inlined_call_operand.vmem [shape: f32[512,24], index: 0, kind: input, shape index: {}]   ;;  %s2533_s1 = inlined_call_operand.vmem [shape: f32[128,128], index: 1, kind: input, shape index: {}]   ;;  %s2534_s2 = inlined_call_operand.vmem [shape: f32[1,128], index: 2, kind: input, shape index: {}]   ;;  %s2535_s3 = inlined_call_operand.vmem [shape: f32[2,1,128], index: 3, kind: output, shape index: {0}]   ;;  %s2536_s4 = inlined_call_operand.vmem [shape: f32[2,1,128], index: 4, kind: output, shape index: {1}]  }
   0x1 LB: > { %s1810_s16 = sadd.s32 4294967295, %s1772_s15   ;;  %p1587_p0 = scmp.ge.s32.totalorder %s1772_s15, 1  ;;  %s1772_s15 = sphi %s1804_s15, %s15_s15  }
   0x2   : > { %p166_p1 = scmp.lt.s32.totalorder %s1772_s15, 3 }
   0x4   : > { %p167_p2 = pnand %p1587_p0, %p166_p1 }
   0x5   : > { %s1588_s17 = sshll.u32 (!%p167_p2), %s1810_s16, 5  ;;  %s1775_s7 = smov (!%p167_p2), 24  }
   0x6   : > { %170 = sbr.rel (%p167_p2) target bundleno = 613 (0x265), region = 32  ;;  %p1823_p3 = scmp.lt.s32.totalorder (!%p167_p2), %s1588_s17, 63 }
   0x7   : > { %s1776_s8 = smov (!%p167_p2), 48   ;;  %s1778_s20 = smov (!%p167_p2), 96  }
   0x8   : > { %p199_p4 = scmp.lt.s32.totalorder (!%p167_p2), %s1810_s16, 1 }
   0xb   : > { %v1138_v0 = vld [vmem:[%s2533_s1 + $0x78] sm:$0xff]  ;;  %v1137_v1 = vld [vmem:[%s2533_s1 + $0x70] sm:$0xff]  ;;  %vm205_vm0 = vcmask 1048512   ;;  %vm238_vm1 = vcmask 189440   ;;  %v1136_v2 = vld [vmem:[%s2533_s1 + $0x68] sm:$0xff]  ;;  %v1774_v3 = vmov 0.0  }
   0xc   : > { %1641 = vmatprep.subr.mxu0 %v1138_v0  ;;  %1721 = vmatprep.subr.mxu1 %v1138_v0  ;;  %206 = vst.msk [vmem:[#allocation2] sm:$0xff] %vm205_vm0, %v1774_v3  ;;  %207 = vst.msk [vmem:[#allocation2 + $0x8] sm:$0xff] %vm205_vm0, %v1774_v3  ;;  %vm274_vm2 = vcmask 385216   ;;  %s2539_s17 = smov (!%p1823_p3, %s1588_s17), 63  ;;  %v1135_v4 = vld [vmem:[%s2533_s1 + $0x60] sm:$0xff]  ;;  %vm256_vm3 = vcmask 195584  }
   0xd   : > { %1642 = vmatpush3.msra.mxu0 %v1138_v0  ;;  %208 = vst.msk [vmem:[#allocation2 + $0x10] sm:$0xff] %vm205_vm0, %v1774_v3  ;;  %209 = vst.msk [vmem:[#allocation2 + $0x18] sm:$0xff] %vm205_vm0, %v1774_v3  ;;  %1737 = vmatpush3.msra.mxu1 %v1138_v0  ;;  %s1589_s27 = sshll.u32 %s2539_s17, 3  ;;  %v1134_v7 = vld [vmem:[%s2533_s1 + $0x58] sm:$0xff]  ;;  %v1133_v10 = vld [vmem:[%s2533_s1 + $0x50] sm:$0xff]  ;;  %s1777_s17 = smov 72  }
   0xe   : > { %210 = vst.msk [vmem:[#allocation2 + $0x20] sm:$0xff] %vm205_vm0, %v1774_v3  ;;  %211 = vst.msk [vmem:[#allocation2 + $0x28] sm:$0xff] %vm205_vm0, %v1774_v3  ;;  %1643 = vmatprep.subr.mxu0 %v1137_v1  ;;  %1722 = vmatprep.subr.mxu1 %v1137_v1  ;;  %s1910_s30 = scalar_lea.vmem %s2532_s0, %s1589_s27  ;;  %v1132_v13 = vld [vmem:[%s2533_s1 + $0x48] sm:$0xff]  ;;  %v1131_v19 = vld [vmem:[%s2533_s1 + $0x40] sm:$0xff]  ;;  %vm272_vm4 = vcmask 193536   ;;  %vm356_vm5 = vcmask 392384  }
   0xf   : > { %212 = vst.msk [vmem:[#allocation2 + $0x30] sm:$0xff] %vm205_vm0, %v1774_v3  ;;  %213 = vst.msk [vmem:[#allocation2 + $0x38] sm:$0xff] %vm205_vm0, %v1774_v3  ;;  %1644 = vmatpush3.msra.mxu0 %v1137_v1  ;;  %1738 = vmatpush3.msra.mxu1 %v1137_v1  ;;  %v276_v5 = vld [vmem:[%s1910_s30] sm:$0xff]  ;;  %v277_v6 = vld [vmem:[%s1910_s30 + $0x8] sm:$0xff]  ;;  %vm454_vm6 = vcmask 589184   ;;  %vm551_vm7 = vcmask 785984  }
  0x10   : > { %214 = vst.msk [vmem:[#allocation2 + $0x40] sm:$0xff] %vm205_vm0, %v1774_v3  ;;  %215 = vst.msk [vmem:[#allocation2 + $0x48] sm:$0xff] %vm205_vm0, %v1774_v3  ;;  %1645 = vmatprep.subr.mxu0 %v1136_v2  ;;  %1723 = vmatprep.subr.mxu1 %v1136_v2  ;;  %v1922_v8 = vld [vmem:[%s1910_s30 + $0x10] sm:$0xff]  ;;  %v1925_v9 = vld [vmem:[%s1910_s30 + $0x18] sm:$0xff]  ;;  %vm651_vm8 = vcmask 982784   ;;  %vm372_vm9 = vcmask 391360  }
  0x11   : > { %216 = vst.msk [vmem:[#allocation2 + $0x50] sm:$0xff] %vm205_vm0, %v1774_v3  ;;  %217 = vst.msk [vmem:[#allocation2 + $0x58] sm:$0xff] %vm205_vm0, %v1774_v3  ;;  %1646 = vmatpush3.msra.mxu0 %v1136_v2  ;;  %1739 = vmatpush3.msra.mxu1 %v1136_v2  ;;  %v1935_v11 = vld [vmem:[%s1910_s30 + $0x20] sm:$0xff]  ;;  %v1938_v12 = vld [vmem:[%s1910_s30 + $0x28] sm:$0xff]  ;;  %vm569_vm10 = vcmask 778816   ;;  %vm567_vm11 = vcmask 784960  }
  0x12   : > { %218 = vst.msk [vmem:[#allocation2 + $0x60] sm:$0xff] %vm205_vm0, %v1774_v3  ;;  %219 = vst.msk [vmem:[#allocation2 + $0x68] sm:$0xff] %vm205_vm0, %v1774_v3  ;;  %1647 = vmatprep.subr.mxu0 %v1135_v4  ;;  %1724 = vmatprep.subr.mxu1 %v1135_v4  ;;  %v471_v14 = vld [vmem:[%s1910_s30 + $0x1] sm:$0xff]  ;;  %v472_v15 = vld [vmem:[%s1910_s30 + $0x9] sm:$0xff]  ;;  %vm669_vm12 = vcmask 976640   ;;  %vm667_vm13 = vcmask 980736  }
  0x13   : > { %220 = vst.msk [vmem:[#allocation2 + $0x70] sm:$0xff] %vm205_vm0, %v1774_v3  ;;  %221 = vst.msk [vmem:[#allocation2 + $0x78] sm:$0xff] %vm205_vm0, %v1774_v3  ;;  %308 = vrot.lane.b32.xlu0 %v276_v5, %s1775_s7  ;;  %406 = vrot.lane.b32.xlu1 %v276_v5, %s1776_s8  ;;  %v1952_v16 = vld [vmem:[%s1910_s30 + $0x30] sm:$0xff]  ;;  %v1955_v17 = vld [vmem:[%s1910_s30 + $0x38] sm:$0xff]  ;;  %s2541_s16 = smov (!%p199_p4, %s1810_s16), 1 }
  0x14   : > { %222 = vst.msk [vmem:[#allocation2 + $0x80] sm:$0xff] %vm205_vm0, %v1774_v3  ;;  %223 = vst.msk [vmem:[#allocation2 + $0x88] sm:$0xff] %vm205_vm0, %v1774_v3  ;;  %1648 = vmatpush3.msra.mxu0 %v1135_v4  ;;  %1740 = vmatpush3.msra.mxu1 %v1135_v4  ;;  %v1960_v18 = vld [vmem:[%s1910_s30 + $0x40] sm:$0xff]  ;;  %v1970_v20 = vld [vmem:[%s1910_s30 + $0x48] sm:$0xff]  ;;  %s201_s13 = scalar_lea.vmem %s2535_s3, %s2541_s16  ;;  %s204_s18 = scalar_lea.vmem %s2536_s4, %s2541_s16 }
  0x15   : > { %224 = vst.msk [vmem:[#allocation2 + $0x90] sm:$0xff] %vm205_vm0, %v1774_v3  ;;  %225 = vst.msk [vmem:[#allocation2 + $0x98] sm:$0xff] %vm205_vm0, %v1774_v3  ;;  %1649 = vmatprep.subr.mxu0 %v1134_v7  ;;  %1725 = vmatprep.subr.mxu1 %v1134_v7  ;;  %v571_v21 = vld [vmem:[%s1910_s30 + $0x2] sm:$0xff]  ;;  %v1976_v22 = vld [vmem:[%s1910_s30 + $0x50] sm:$0xff] }
  0x16   : > { %226 = vst.msk [vmem:[#allocation2 + $0xa0] sm:$0xff] %vm205_vm0, %v1774_v3  ;;  %227 = vst.msk [vmem:[#allocation2 + $0xa8] sm:$0xff] %vm205_vm0, %v1774_v3  ;;  %1650 = vmatpush3.msra.mxu0 %v1134_v7  ;;  %1741 = vmatpush3.msra.mxu1 %v1134_v7  ;;  %v1981_v23 = vld [vmem:[%s1910_s30 + $0x58] sm:$0xff]  ;;  %v1989_v25 = vld [vmem:[%s1910_s30 + $0x60] sm:$0xff] }
  0x17   : > { %228 = vst.msk [vmem:[#allocation2 + $0xb0] sm:$0xff] %vm205_vm0, %v1774_v3  ;;  %229 = vst.msk [vmem:[#allocation2 + $0xb8] sm:$0xff] %vm205_vm0, %v1774_v3  ;;  %310 = vrot.lane.b32.xlu0 %v277_v6, %s1775_s7  ;;  %408 = vrot.lane.b32.xlu1 %v277_v6, %s1776_s8  ;;  %v1130_v24 = vld [vmem:[%s2533_s1 + $0x38] sm:$0xff]  ;;  %v1997_v26 = vld [vmem:[%s1910_s30 + $0x68] sm:$0xff] }
  0x18   : > { %230 = vst.msk [vmem:[#allocation2 + $0xc0] sm:$0xff] %vm205_vm0, %v1774_v3  ;;  %231 = vst.msk [vmem:[#allocation2 + $0xc8] sm:$0xff] %vm205_vm0, %v1774_v3  ;;  %1651 = vmatprep.subr.mxu0 %v1133_v10  ;;  %1726 = vmatprep.subr.mxu1 %v1133_v10  ;;  %v1129_v27 = vld [vmem:[%s2533_s1 + $0x30] sm:$0xff]  ;;  %v1128_v30 = vld [vmem:[%s2533_s1 + $0x28] sm:$0xff] }
  0x19   : > { %232 = vst.msk [vmem:[#allocation2 + $0xd0] sm:$0xff] %vm205_vm0, %v1774_v3  ;;  %233 = vst.msk [vmem:[#allocation2 + $0xd8] sm:$0xff] %vm205_vm0, %v1774_v3  ;;  %1652 = vmatpush3.msra.mxu0 %v1133_v10  ;;  %1742 = vmatpush3.msra.mxu1 %v1133_v10  ;;  %v572_v28 = vld [vmem:[%s1910_s30 + $0xa] sm:$0xff]  ;;  %v2019_v31 = vld [vmem:[%s1910_s30 + $0x80] sm:$0xff] }
  0x1a   : > { %234 = vst.msk [vmem:[#allocation2 + $0xe0] sm:$0xff] %vm205_vm0, %v1774_v3  ;;  %235 = vst.msk [vmem:[#allocation2 + $0xe8] sm:$0xff] %vm205_vm0, %v1774_v3  ;;  %1653 = vmatprep.subr.mxu0 %v1132_v13  ;;  %1727 = vmatprep.subr.mxu1 %v1132_v13  ;;  %v2008_v29 = vld [vmem:[%s1910_s30 + $0x70] sm:$0xff]  ;;  %v2022_v32 = vld [vmem:[%s1910_s30 + $0x88] sm:$0xff] }
  0x1b   : > { %236 = vst.msk [vmem:[#allocation2 + $0xf0] sm:$0xff] %vm205_vm0, %v1774_v3  ;;  %237 = vst.msk [vmem:[#allocation2 + $0xf8] sm:$0xff] %vm205_vm0, %v1774_v3  ;;  %503 = vrot.lane.b32.xlu0 %v471_v14, %s1777_s17  ;;  %505 = vrot.lane.b32.xlu1 %v472_v15, %s1777_s17  ;;  %v1127_v33 = vld [vmem:[%s2533_s1 + $0x20] sm:$0xff]  ;;  %v1126_v34 = vld [vmem:[%s2533_s1 + $0x18] sm:$0xff] }
  0x1c   : > { %239 = vst.msk [vmem:[#allocation2] sm:$0x3] %vm238_vm1, %v1774_v3  ;;  %671 = vst.msk [vmem:[#allocation2 + $0x80] sm:$0x3] %vm238_vm1, %v1774_v3  ;;  %1654 = vmatpush3.msra.mxu0 %v1132_v13  ;;  %1743 = vmatpush3.msra.mxu1 %v1132_v13  ;;  %v2039_v35 = vld [vmem:[%s1910_s30 + $0x90] sm:$0xff]  ;;  %v474_v37 = vld [vmem:[%s1910_s30 + $0x19] sm:$0xff] }
  0x1d   : > { %275 = vst.msk [vmem:[#allocation2] sm:$0x1] %vm274_vm2, %v1774_v3  ;;  %704 = vst.msk [vmem:[#allocation2 + $0x80] sm:$0x1] %vm274_vm2, %v1774_v3  ;;  %1655 = vmatprep.subr.mxu0 %v1131_v19  ;;  %1728 = vmatprep.subr.mxu1 %v1131_v19  ;;  %v473_v36 = vld [vmem:[%s1910_s30 + $0x11] sm:$0xff]  ;;  %v1124_v41 = vld [vmem:[%s2533_s1 + $0x8] sm:$0xff] }
  0x1e   : > { %257 = vst.msk [vmem:[#allocation2 + $0x2] sm:$0xff] %vm256_vm3, %v276_v5  ;;  %258 = vst.msk [vmem:[#allocation2 + $0xa] sm:$0xff] %vm256_vm3, %v277_v6  ;;  %1656 = vmatpush3.msra.mxu0 %v1131_v19  ;;  %1744 = vmatpush3.msra.mxu1 %v1131_v19  ;;  %v2044_v38 = vld [vmem:[%s1910_s30 + $0x98] sm:$0xff]  ;;  %v1125_v39 = vld [vmem:[%s2533_s1 + $0x10] sm:$0xff] }
  0x1f   : > { %259 = vst.msk [vmem:[#allocation2 + $0x12] sm:$0xff] %vm256_vm3, %v1922_v8  ;;  %260 = vst.msk [vmem:[#allocation2 + $0x1a] sm:$0xff] %vm256_vm3, %v1925_v9  ;;  %603 = vrot.lane.b32.xlu0 %v571_v21, %s1778_s20  ;;  %312 = vrot.lane.b32.xlu1 %v1922_v8, %s1775_s7  ;;  %v573_v40 = vld [vmem:[%s1910_s30 + $0x12] sm:$0xff]  ;;  %v1123_v42 = vld [vmem:[%s2533_s1] sm:$0xff] }
  0x20   : > { %261 = vst.msk [vmem:[#allocation2 + $0x22] sm:$0xff] %vm256_vm3, %v1935_v11  ;;  %262 = vst.msk [vmem:[#allocation2 + $0x2a] sm:$0xff] %vm256_vm3, %v1938_v12  ;;  %1657 = vmatprep.subr.mxu0 %v1130_v24  ;;  %1729 = vmatprep.subr.mxu1 %v1130_v24  ;;  %v2066_v43 = vld [vmem:[%s1910_s30 + $0xa0] sm:$0xff]  ;;  %v2075_v45 = vld [vmem:[%s1910_s30 + $0xa8] sm:$0xff] }
  0x21   : > { %263 = vst.msk [vmem:[#allocation2 + $0x32] sm:$0xff] %vm256_vm3, %v1952_v16  ;;  %264 = vst.msk [vmem:[#allocation2 + $0x3a] sm:$0xff] %vm256_vm3, %v1955_v17  ;;  %1658 = vmatpush3.msra.mxu0 %v1130_v24  ;;  %1745 = vmatpush3.msra.mxu1 %v1130_v24  ;;  %v574_v44 = vld [vmem:[%s1910_s30 + $0x1a] sm:$0xff]  ;;  %v476_v47 = vld [vmem:[%s1910_s30 + $0x29] sm:$0xff] }
  0x22   : > { %265 = vst.msk [vmem:[#allocation2 + $0x42] sm:$0xff] %vm256_vm3, %v1960_v18  ;;  %266 = vst.msk [vmem:[#allocation2 + $0x4a] sm:$0xff] %vm256_vm3, %v1970_v20  ;;  %1659 = vmatprep.subr.mxu0 %v1129_v27  ;;  %1730 = vmatprep.subr.mxu1 %v1129_v27  ;;  %v475_v46 = vld [vmem:[%s1910_s30 + $0x21] sm:$0xff]  ;;  %v2092_v49 = vld [vmem:[%s1910_s30 + $0xb0] sm:$0xff] }
  0x23   : > { %267 = vst.msk [vmem:[#allocation2 + $0x52] sm:$0xff] %vm256_vm3, %v1976_v22  ;;  %268 = vst.msk [vmem:[#allocation2 + $0x5a] sm:$0xff] %vm256_vm3, %v1981_v23  ;;  %605 = vrot.lane.b32.xlu0 %v572_v28, %s1778_s20  ;;  %314 = vrot.lane.b32.xlu1 %v1925_v9, %s1775_s7  ;;  %v575_v48 = vld [vmem:[%s1910_s30 + $0x22] sm:$0xff]  ;;  %v576_v50 = vld [vmem:[%s1910_s30 + $0x2a] sm:$0xff] }
  0x24   : > { %269 = vst.msk [vmem:[#allocation2 + $0x62] sm:$0xff] %vm256_vm3, %v1989_v25  ;;  %270 = vst.msk [vmem:[#allocation2 + $0x6a] sm:$0xff] %vm256_vm3, %v1997_v26  ;;  %1660 = vmatpush3.msra.mxu0 %v1129_v27  ;;  %1746 = vmatpush3.msra.mxu1 %v1129_v27  ;;  %v2101_v51 = vld [vmem:[%s1910_s30 + $0xb8] sm:$0xff]  ;;  %v2118_v55 = vld [vmem:[%s1910_s30 + $0xc0] sm:$0xff] }
  0x25   : > { %271 = vst.msk [vmem:[#allocation2 + $0x72] sm:$0xff] %vm256_vm3, %v2008_v29  ;;  %1661 = vmatprep.subr.mxu0 %v1128_v30  ;;  %688 = vst.msk [vmem:[#allocation2 + $0x82] sm:$0xff] %vm256_vm3, %v2019_v31  ;;  %1731 = vmatprep.subr.mxu1 %v1128_v30  ;;  %v477_v52 = vld [vmem:[%s1910_s30 + $0x31] sm:$0xff]  ;;  %v478_v53 = vld [vmem:[%s1910_s30 + $0x39] sm:$0xff] }
  0x26   : > { %689 = vst.msk [vmem:[#allocation2 + $0x8a] sm:$0xff] %vm256_vm3, %v2022_v32  ;;  %1662 = vmatpush3.msra.mxu0 %v1128_v30  ;;  %1747 = vmatpush3.msra.mxu1 %v1128_v30  ;;  %690 = vst.msk [vmem:[#allocation2 + $0x92] sm:$0xff] %vm256_vm3, %v2039_v35  ;;  %v577_v54 = vld [vmem:[%s1910_s30 + $0x32] sm:$0xff]  ;;  %v578_v56 = vld [vmem:[%s1910_s30 + $0x3a] sm:$0xff] }
  0x27   : > { %410 = vrot.lane.b32.xlu0 %v1922_v8, %s1776_s8  ;;  %412 = vrot.lane.b32.xlu1 %v1925_v9, %s1776_s8  ;;  %691 = vst.msk [vmem:[#allocation2 + $0x9a] sm:$0xff] %vm256_vm3, %v2044_v38  ;;  %692 = vst.msk [vmem:[#allocation2 + $0xa2] sm:$0xff] %vm256_vm3, %v2066_v43  ;;  %v2127_v57 = vld [vmem:[%s1910_s30 + $0xc8] sm:$0xff]  ;;  %v2144_v61 = vld [vmem:[%s1910_s30 + $0xd0] sm:$0xff] }
  0x28   : > { %1663 = vmatprep.subr.mxu0 %v1127_v33  ;;  %1732 = vmatprep.subr.mxu1 %v1127_v33  ;;  %693 = vst.msk [vmem:[#allocation2 + $0xaa] sm:$0xff] %vm256_vm3, %v2075_v45  ;;  %694 = vst.msk [vmem:[#allocation2 + $0xb2] sm:$0xff] %vm256_vm3, %v2092_v49  ;;  %v479_v58 = vld [vmem:[%s1910_s30 + $0x41] sm:$0xff]  ;;  %v480_v59 = vld [vmem:[%s1910_s30 + $0x49] sm:$0xff] }
  0x29   : > { %1664 = vmatpush3.msra.mxu0 %v1127_v33  ;;  %1748 = vmatpush3.msra.mxu1 %v1127_v33  ;;  %695 = vst.msk [vmem:[#allocation2 + $0xba] sm:$0xff] %vm256_vm3, %v2101_v51  ;;  %696 = vst.msk [vmem:[#allocation2 + $0xc2] sm:$0xff] %vm256_vm3, %v2118_v55  ;;  %v579_v60 = vld [vmem:[%s1910_s30 + $0x42] sm:$0xff]  ;;  %v580_v62 = vld [vmem:[%s1910_s30 + $0x4a] sm:$0xff] }
  0x2a   : > { %1665 = vmatprep.subr.mxu0 %v1126_v34  ;;  %1733 = vmatprep.subr.mxu1 %v1126_v34  ;;  %697 = vst.msk [vmem:[#allocation2 + $0xca] sm:$0xff] %vm256_vm3, %v2127_v57  ;;  %698 = vst.msk [vmem:[#allocation2 + $0xd2] sm:$0xff] %vm256_vm3, %v2144_v61  ;;  %v2153_v63 = vld [vmem:[%s1910_s30 + $0xd8] sm:$0xff]  ;;  %v2170_v4 = vld [vmem:[%s1910_s30 + $0xe0] sm:$0xff] }
  0x2b   : > { %507 = vrot.lane.b32.xlu0 %v473_v36, %s1777_s17  ;;  %509 = vrot.lane.b32.xlu1 %v474_v37, %s1777_s17  ;;  %699 = vst.msk [vmem:[#allocation2 + $0xda] sm:$0xff] %vm256_vm3, %v2153_v63  ;;  %v481_v0 = vld [vmem:[%s1910_s30 + $0x51] sm:$0xff]  ;;  %v482_v1 = vld [vmem:[%s1910_s30 + $0x59] sm:$0xff]  ;;  %700 = vst.msk [vmem:[#allocation2 + $0xe2] sm:$0xff] %vm256_vm3, %v2170_v4 }
  0x2c   : > { %1666 = vmatpush3.msra.mxu0 %v1126_v34  ;;  %1749 = vmatpush3.msra.mxu1 %v1126_v34  ;;  %v581_v2 = vld [vmem:[%s1910_s30 + $0x52] sm:$0xff]  ;;  %v582_v5 = vld [vmem:[%s1910_s30 + $0x5a] sm:$0xff]  ;;  %v2179_v6 = vld [vmem:[%s1910_s30 + $0xe8] sm:$0xff] }
  0x2d   : > { %1667 = vmatprep.subr.mxu0 %v1125_v39  ;;  %1734 = vmatprep.subr.mxu1 %v1125_v39  ;;  %701 = vst.msk [vmem:[#allocation2 + $0xea] sm:$0xff] %vm256_vm3, %v2179_v6  ;;  %v255_v7 = vld [vmem:[%s1910_s30 + $0x78] sm:$0x3f]  ;;  %v483_v8 = vld [vmem:[%s1910_s30 + $0x61] sm:$0xff]  ;;  %v484_v9 = vld [vmem:[%s1910_s30 + $0x69] sm:$0xff] }
  0x2e   : > { %1668 = vmatpush3.msra.mxu0 %v1125_v39  ;;  %1750 = vmatpush3.msra.mxu1 %v1125_v39  ;;  %273 = vst.msk [vmem:[#allocation2 + $0x7a] sm:$0x3f] %vm272_vm4, %v255_v7  ;;  %v583_v10 = vld [vmem:[%s1910_s30 + $0x62] sm:$0xff]  ;;  %v291_v13 = vld [vmem:[%s1910_s30 + $0x78] sm:$0x7f] }
  0x2f   : > { %607 = vrot.lane.b32.xlu0 %v573_v40, %s1778_s20  ;;  %316 = vrot.lane.b32.xlu1 %v1935_v11, %s1775_s7  ;;  %v389_v14 = vld [vmem:[%s1910_s30 + $0x78] sm:$0xff]  ;;  %v898_v30 = vld [vmem:[%s1910_s30 + $0x89] sm:$0xff] }
  0x30   : > { %1669 = vmatprep.subr.mxu0 %v1124_v41  ;;  %1735 = vmatprep.subr.mxu1 %v1124_v41  ;;  %v585_v21 = vld [vmem:[%s1910_s30 + $0x72] sm:$0xff]  ;;  %v994_v37 = vld [vmem:[%s1910_s30 + $0x82] sm:$0xff] }
  0x31   : > { %1670 = vmatpush3.msra.mxu0 %v1124_v41  ;;  %1751 = vmatpush3.msra.mxu1 %v1124_v41 }
  0x32   : > { %1671 = vmatprep.subr.mxu0 %v1123_v42  ;;  %1736 = vmatprep.subr.mxu1 %v1123_v42 }
  0x33   : > { %609 = vrot.lane.b32.xlu0 %v574_v44, %s1778_s20  ;;  %318 = vrot.lane.b32.xlu1 %v1938_v12, %s1775_s7 }
  0x34   : > { %1672 = vmatpush3.msra.mxu0 %v1123_v42  ;;  %1752 = vmatpush3.msra.mxu1 %v1123_v42 }
  0x37   : > { %414 = vrot.lane.b32.xlu0 %v1935_v11, %s1776_s8  ;;  %416 = vrot.lane.b32.xlu1 %v1938_v12, %s1776_s8  ;;  %v2198_v11 = vld [vmem:[%s1910_s30 + $0xf0] sm:$0xff] }
  0x38   : > { %v584_v12 = vld [vmem:[%s1910_s30 + $0x6a] sm:$0xff]  ;;  %702 = vst.msk [vmem:[#allocation2 + $0xf2] sm:$0xff] %vm256_vm3, %v2198_v11 }
  0x3b   : > { %511 = vrot.lane.b32.xlu0 %v475_v46, %s1777_s17  ;;  %513 = vrot.lane.b32.xlu1 %v476_v47, %s1777_s17  ;;  %v899_v47 = vld [vmem:[%s1910_s30 + $0x91] sm:$0xff] }
  0x3f   : > { %611 = vrot.lane.b32.xlu0 %v575_v48, %s1778_s20  ;;  %320 = vrot.lane.b32.xlu1 %v1952_v16, %s1775_s7  ;;  %v900_v48 = vld [vmem:[%s1910_s30 + $0x99] sm:$0xff] }
  0x43   : > { %613 = vrot.lane.b32.xlu0 %v576_v50, %s1778_s20  ;;  %322 = vrot.lane.b32.xlu1 %v1955_v17, %s1775_s7 }
  0x47   : > { %418 = vrot.lane.b32.xlu0 %v1952_v16, %s1776_s8  ;;  %420 = vrot.lane.b32.xlu1 %v1955_v17, %s1776_s8  ;;  %v485_v17 = vld [vmem:[%s1910_s30 + $0x71] sm:$0xff] }
  0x4b   : > { %515 = vrot.lane.b32.xlu0 %v477_v52, %s1777_s17  ;;  %517 = vrot.lane.b32.xlu1 %v478_v53, %s1777_s17 }
  0x4f   : > { %615 = vrot.lane.b32.xlu0 %v577_v54, %s1778_s20  ;;  %324 = vrot.lane.b32.xlu1 %v1960_v18, %s1775_s7  ;;  %v996_v54 = vld [vmem:[%s1910_s30 + $0x92] sm:$0xff] }
  0x53   : > { %617 = vrot.lane.b32.xlu0 %v578_v56, %s1778_s20  ;;  %326 = vrot.lane.b32.xlu1 %v1970_v20, %s1775_s7 }
  0x57   : > { %422 = vrot.lane.b32.xlu0 %v1960_v18, %s1776_s8  ;;  %424 = vrot.lane.b32.xlu1 %v1970_v20, %s1776_s8  ;;  %v486_v18 = vld [vmem:[%s1910_s30 + $0x79] sm:$0x7f] }
  0x5b   : > { %519 = vrot.lane.b32.xlu0 %v479_v58, %s1777_s17  ;;  %521 = vrot.lane.b32.xlu1 %v480_v59, %s1777_s17 }
  0x5f   : > { %619 = vrot.lane.b32.xlu0 %v579_v60, %s1778_s20  ;;  %328 = vrot.lane.b32.xlu1 %v1976_v22, %s1775_s7 }
  0x63   : > { %621 = vrot.lane.b32.xlu0 %v580_v62, %s1778_s20  ;;  %330 = vrot.lane.b32.xlu1 %v1981_v23, %s1775_s7 }
  0x67   : > { %426 = vrot.lane.b32.xlu0 %v1976_v22, %s1776_s8  ;;  %428 = vrot.lane.b32.xlu1 %v1981_v23, %s1776_s8  ;;  %v586_v22 = vld [vmem:[%s1910_s30 + $0x7a] sm:$0x3f] }
  0x6b   : > { %523 = vrot.lane.b32.xlu0 %v481_v0, %s1777_s17  ;;  %525 = vrot.lane.b32.xlu1 %v482_v1, %s1777_s17  ;;  %v901_v1 = vld [vmem:[%s1910_s30 + $0xa1] sm:$0xff] }
  0x6f   : > { %623 = vrot.lane.b32.xlu0 %v581_v2, %s1778_s20  ;;  %332 = vrot.lane.b32.xlu1 %v1989_v25, %s1775_s7  ;;  %v902_v2 = vld [vmem:[%s1910_s30 + $0xa9] sm:$0xff] }
  0x73   : > { %625 = vrot.lane.b32.xlu0 %v582_v5, %s1778_s20  ;;  %334 = vrot.lane.b32.xlu1 %v1997_v26, %s1775_s7 }
  0x77   : > { %430 = vrot.lane.b32.xlu0 %v1989_v25, %s1776_s8  ;;  %432 = vrot.lane.b32.xlu1 %v1997_v26, %s1776_s8 }
  0x7b   : > { %527 = vrot.lane.b32.xlu0 %v483_v8, %s1777_s17  ;;  %529 = vrot.lane.b32.xlu1 %v484_v9, %s1777_s17  ;;  %v998_v9 = vld [vmem:[%s1910_s30 + $0xa2] sm:$0xff] }
  0x7f   : > { %627 = vrot.lane.b32.xlu0 %v583_v10, %s1778_s20  ;;  %336 = vrot.lane.b32.xlu1 %v2008_v29, %s1775_s7 }
  0x83   : > { %629 = vrot.lane.b32.xlu0 %v584_v12, %s1778_s20  ;;  %338 = vrot.lane.b32.xlu1 %v291_v13, %s1775_s7 }
  0x85   : > { %v309_v15 = vpop.permute.xlu0 %308  ;;  %v407_v16 = vpop.permute.xlu1 %406 }
  0x86   : > { %357 = vst.msk [vmem:[#allocation2 + $0x1] sm:$0xff] %vm356_vm5, %v309_v15 }
  0x87   : > { %455 = vst.msk [vmem:[#allocation2] sm:$0xff] %vm454_vm6, %v407_v16  ;;  %434 = vrot.lane.b32.xlu0 %v2008_v29, %s1776_s8  ;;  %436 = vrot.lane.b32.xlu1 %v389_v14, %s1776_s8  ;;  %v897_v29 = vld [vmem:[%s1910_s30 + $0x81] sm:$0xff] }
  0x89   : > { %v311_v19 = vpop.permute.xlu0 %310  ;;  %v409_v20 = vpop.permute.xlu1 %408 }
  0x8a   : > { %358 = vst.msk [vmem:[#allocation2 + $0x9] sm:$0xff] %vm356_vm5, %v311_v19 }
  0x8b   : > { %456 = vst.msk [vmem:[#allocation2 + $0x8] sm:$0xff] %vm454_vm6, %v409_v20  ;;  %531 = vrot.lane.b32.xlu0 %v485_v17, %s1777_s17  ;;  %533 = vrot.lane.b32.xlu1 %v486_v18, %s1777_s17  ;;  %v903_v17 = vld [vmem:[%s1910_s30 + $0xb1] sm:$0xff]  ;;  %v904_v18 = vld [vmem:[%s1910_s30 + $0xb9] sm:$0xff] }
  0x8d   : > { %v504_v23 = vpop.permute.xlu0 %503  ;;  %v506_v24 = vpop.permute.xlu1 %505 }
  0x8e   : > { %552 = vst.msk [vmem:[#allocation2] sm:$0xff] %vm551_vm7, %v504_v23  ;;  %553 = vst.msk [vmem:[#allocation2 + $0x8] sm:$0xff] %vm551_vm7, %v506_v24 }
  0x8f   : > { %631 = vrot.lane.b32.xlu0 %v585_v21, %s1778_s20  ;;  %633 = vrot.lane.b32.xlu1 %v586_v22, %s1778_s20  ;;  %v1000_v22 = vld [vmem:[%s1910_s30 + $0xb2] sm:$0xff] }
  0x91   : > { %v604_v25 = vpop.permute.xlu0 %603  ;;  %v313_v26 = vpop.permute.xlu1 %312 }
  0x92   : > { %652 = vst.msk [vmem:[#allocation2] sm:$0xff] %vm651_vm8, %v604_v25 }
  0x93   : > { %359 = vst.msk [vmem:[#allocation2 + $0x11] sm:$0xff] %vm356_vm5, %v313_v26  ;;  %737 = vrot.lane.b32.xlu0 %v2019_v31, %s1775_s7  ;;  %739 = vrot.lane.b32.xlu1 %v2022_v32, %s1775_s7 }
  0x95   : > { %v606_v27 = vpop.permute.xlu0 %605  ;;  %v315_v28 = vpop.permute.xlu1 %314 }
  0x96   : > { %653 = vst.msk [vmem:[#allocation2 + $0x8] sm:$0xff] %vm651_vm8, %v606_v27 }
  0x97   : > { %360 = vst.msk [vmem:[#allocation2 + $0x19] sm:$0xff] %vm356_vm5, %v315_v28  ;;  %833 = vrot.lane.b32.xlu0 %v2019_v31, %s1776_s8  ;;  %835 = vrot.lane.b32.xlu1 %v2022_v32, %s1776_s8  ;;  %v995_v32 = vld [vmem:[%s1910_s30 + $0x8a] sm:$0xff] }
  0x99   : > { %v411_v33 = vpop.permute.xlu0 %410  ;;  %v413_v34 = vpop.permute.xlu1 %412  ;;  %v1091_v36 = vld [vmem:[#allocation2] sm:$0xff] }
  0x9a   : > { %457 = vst.msk [vmem:[#allocation2 + $0x10] sm:$0xff] %vm454_vm6, %v411_v33  ;;  %458 = vst.msk [vmem:[#allocation2 + $0x18] sm:$0xff] %vm454_vm6, %v413_v34  ;;  %1673 = vmatprep.mubr.f32.mxu0 %v1091_v36 }
  0x9b   : > { %929 = vrot.lane.b32.xlu0 %v897_v29, %s1777_s17  ;;  %931 = vrot.lane.b32.xlu1 %v898_v30, %s1777_s17  ;;  %v905_v29 = vld [vmem:[%s1910_s30 + $0xc1] sm:$0xff]  ;;  %v906_v30 = vld [vmem:[%s1910_s30 + $0xc9] sm:$0xff] }
  0x9d   : > { %v508_v31 = vpop.permute.xlu0 %507  ;;  %v510_v39 = vpop.permute.xlu1 %509  ;;  %v1092_v40 = vld [vmem:[#allocation2 + $0x8] sm:$0xff] }
  0x9e   : > { %554 = vst.msk [vmem:[#allocation2 + $0x10] sm:$0xff] %vm551_vm7, %v508_v31  ;;  %555 = vst.msk [vmem:[#allocation2 + $0x18] sm:$0xff] %vm551_vm7, %v510_v39  ;;  %1674 = vmatmul.mubr.f32.vlgmr.msra.gmra.mxu0 %v1092_v40 }
  0x9f   : > { %1026 = vrot.lane.b32.xlu0 %v994_v37, %s1778_s20  ;;  %741 = vrot.lane.b32.xlu1 %v2039_v35, %s1775_s7  ;;  %v1002_v37 = vld [vmem:[%s1910_s30 + $0xc2] sm:$0xff] }
  0xa1   : > { %v608_v41 = vpop.permute.xlu0 %607  ;;  %v317_v42 = vpop.permute.xlu1 %316 }
  0xa2   : > { %654 = vst.msk [vmem:[#allocation2 + $0x10] sm:$0xff] %vm651_vm8, %v608_v41 }
  0xa3   : > { %361 = vst.msk [vmem:[#allocation2 + $0x21] sm:$0xff] %vm356_vm5, %v317_v42  ;;  %1028 = vrot.lane.b32.xlu0 %v995_v32, %s1778_s20  ;;  %743 = vrot.lane.b32.xlu1 %v2044_v38, %s1775_s7 }
  0xa5   : > { %v610_v44 = vpop.permute.xlu0 %609  ;;  %v319_v46 = vpop.permute.xlu1 %318 }
  0xa6   : > { %655 = vst.msk [vmem:[#allocation2 + $0x18] sm:$0xff] %vm651_vm8, %v610_v44  ;;  %v907_v44 = vld [vmem:[%s1910_s30 + $0xd1] sm:$0xff] }
  0xa7   : > { %362 = vst.msk [vmem:[#allocation2 + $0x29] sm:$0xff] %vm356_vm5, %v319_v46  ;;  %837 = vrot.lane.b32.xlu0 %v2039_v35, %s1776_s8  ;;  %839 = vrot.lane.b32.xlu1 %v2044_v38, %s1776_s8  ;;  %v997_v38 = vld [vmem:[%s1910_s30 + $0x9a] sm:$0xff] }
  0xa8   : > { %v908_v46 = vld [vmem:[%s1910_s30 + $0xd9] sm:$0xff] }
  0xa9   : > { %v415_v50 = vpop.permute.xlu0 %414  ;;  %v417_v52 = vpop.permute.xlu1 %416  ;;  %v1093_v53 = vld [vmem:[#allocation2 + $0x10] sm:$0xff] }
  0xaa   : > { %459 = vst.msk [vmem:[#allocation2 + $0x20] sm:$0xff] %vm454_vm6, %v415_v50  ;;  %460 = vst.msk [vmem:[#allocation2 + $0x28] sm:$0xff] %vm454_vm6, %v417_v52  ;;  %1676 = vmatprep.mubr.f32.mxu0 %v1093_v53  ;;  %v1004_v52 = vld [vmem:[%s1910_s30 + $0xd2] sm:$0xff] }
  0xab   : > { %933 = vrot.lane.b32.xlu0 %v899_v47, %s1777_s17  ;;  %935 = vrot.lane.b32.xlu1 %v900_v48, %s1777_s17 }
  0xad   : > { %v512_v35 = vpop.permute.xlu0 %511  ;;  %v514_v56 = vpop.permute.xlu1 %513  ;;  %v1094_v58 = vld [vmem:[#allocation2 + $0x18] sm:$0xff] }
  0xae   : > { %556 = vst.msk [vmem:[#allocation2 + $0x20] sm:$0xff] %vm551_vm7, %v512_v35  ;;  %557 = vst.msk [vmem:[#allocation2 + $0x28] sm:$0xff] %vm551_vm7, %v514_v56  ;;  %1677 = vmatmul.mubr.f32.gmra.mxu0 %v1094_v58 }
  0xaf   : > { %1030 = vrot.lane.b32.xlu0 %v996_v54, %s1778_s20  ;;  %745 = vrot.lane.b32.xlu1 %v2066_v43, %s1775_s7 }
  0xb1   : > { %v612_v59 = vpop.permute.xlu0 %611  ;;  %v321_v60 = vpop.permute.xlu1 %320 }
  0xb2   : > { %656 = vst.msk [vmem:[#allocation2 + $0x20] sm:$0xff] %vm651_vm8, %v612_v59  ;;  %v687_v59 = vld [vmem:[%s1910_s30 + $0xf8] sm:$0x3f] }
  0xb3   : > { %363 = vst.msk [vmem:[#allocation2 + $0x31] sm:$0xff] %vm356_vm5, %v321_v60  ;;  %1032 = vrot.lane.b32.xlu0 %v997_v38, %s1778_s20  ;;  %747 = vrot.lane.b32.xlu1 %v2075_v45, %s1775_s7  ;;  %v909_v60 = vld [vmem:[%s1910_s30 + $0xe1] sm:$0xff] }
  0xb4   : > { %703 = vst.msk [vmem:[#allocation2 + $0xfa] sm:$0x3f] %vm272_vm4, %v687_v59 }
  0xb5   : > { %v614_v62 = vpop.permute.xlu0 %613  ;;  %v323_v0 = vpop.permute.xlu1 %322 }
  0xb6   : > { %657 = vst.msk [vmem:[#allocation2 + $0x28] sm:$0xff] %vm651_vm8, %v614_v62  ;;  %v910_v62 = vld [vmem:[%s1910_s30 + $0xe9] sm:$0xff] }
  0xb7   : > { %364 = vst.msk [vmem:[#allocation2 + $0x39] sm:$0xff] %vm356_vm5, %v323_v0  ;;  %841 = vrot.lane.b32.xlu0 %v2066_v43, %s1776_s8  ;;  %843 = vrot.lane.b32.xlu1 %v2075_v45, %s1776_s8  ;;  %v999_v45 = vld [vmem:[%s1910_s30 + $0xaa] sm:$0xff] }
  0xb9   : > { %v419_v5 = vpop.permute.xlu0 %418  ;;  %v421_v7 = vpop.permute.xlu1 %420  ;;  %v1095_v8 = vld [vmem:[#allocation2 + $0x20] sm:$0xff] }
  0xba   : > { %461 = vst.msk [vmem:[#allocation2 + $0x30] sm:$0xff] %vm454_vm6, %v419_v5  ;;  %462 = vst.msk [vmem:[#allocation2 + $0x38] sm:$0xff] %vm454_vm6, %v421_v7  ;;  %1679 = vmatprep.mubr.f32.mxu0 %v1095_v8  ;;  %v1007_v8 = vld [vmem:[%s1910_s30 + $0xea] sm:$0xff] }
  0xbb   : > { %937 = vrot.lane.b32.xlu0 %v901_v1, %s1777_s17  ;;  %939 = vrot.lane.b32.xlu1 %v902_v2, %s1777_s17 }
  0xbd   : > { %v516_v43 = vpop.permute.xlu0 %515  ;;  %v518_v10 = vpop.permute.xlu1 %517  ;;  %v1096_v12 = vld [vmem:[#allocation2 + $0x28] sm:$0xff] }
  0xbe   : > { %558 = vst.msk [vmem:[#allocation2 + $0x30] sm:$0xff] %vm551_vm7, %v516_v43  ;;  %559 = vst.msk [vmem:[#allocation2 + $0x38] sm:$0xff] %vm551_vm7, %v518_v10  ;;  %1680 = vmatmul.mubr.f32.gmra.mxu0 %v1096_v12  ;;  %v816_v12 = vld [vmem:[%s1910_s30 + $0xf8] sm:$0xff] }
  0xbf   : > { %1034 = vrot.lane.b32.xlu0 %v998_v9, %s1778_s20  ;;  %749 = vrot.lane.b32.xlu1 %v2092_v49, %s1775_s7  ;;  %v720_v9 = vld [vmem:[%s1910_s30 + $0xf8] sm:$0x7f] }
  0xc1   : > { %v616_v13 = vpop.permute.xlu0 %615  ;;  %v325_v14 = vpop.permute.xlu1 %324 }
  0xc2   : > { %658 = vst.msk [vmem:[#allocation2 + $0x30] sm:$0xff] %vm651_vm8, %v616_v13 }
  0xc3   : > { %365 = vst.msk [vmem:[#allocation2 + $0x41] sm:$0xff] %vm356_vm5, %v325_v14  ;;  %1036 = vrot.lane.b32.xlu0 %v999_v45, %s1778_s20  ;;  %751 = vrot.lane.b32.xlu1 %v2101_v51, %s1775_s7  ;;  %v911_v14 = vld [vmem:[%s1910_s30 + $0xf1] sm:$0xff] }
  0xc5   : > { %v618_v15 = vpop.permute.xlu0 %617  ;;  %v327_v16 = vpop.permute.xlu1 %326 }
  0xc6   : > { %659 = vst.msk [vmem:[#allocation2 + $0x38] sm:$0xff] %vm651_vm8, %v618_v15 }
  0xc7   : > { %366 = vst.msk [vmem:[#allocation2 + $0x49] sm:$0xff] %vm356_vm5, %v327_v16  ;;  %845 = vrot.lane.b32.xlu0 %v2092_v49, %s1776_s8  ;;  %847 = vrot.lane.b32.xlu1 %v2101_v51, %s1776_s8  ;;  %v1001_v51 = vld [vmem:[%s1910_s30 + $0xba] sm:$0xff] }
  0xc9   : > { %v423_v19 = vpop.permute.xlu0 %422  ;;  %v425_v20 = vpop.permute.xlu1 %424  ;;  %v1097_v21 = vld [vmem:[#allocation2 + $0x30] sm:$0xff] }
  0xca   : > { %463 = vst.msk [vmem:[#allocation2 + $0x40] sm:$0xff] %vm454_vm6, %v423_v19  ;;  %464 = vst.msk [vmem:[#allocation2 + $0x48] sm:$0xff] %vm454_vm6, %v425_v20  ;;  %1682 = vmatprep.mubr.f32.mxu0 %v1097_v21  ;;  %v912_v19 = vld [vmem:[%s1910_s30 + $0xf9] sm:$0x7f] }
  0xcb   : > { %941 = vrot.lane.b32.xlu0 %v903_v17, %s1777_s17  ;;  %943 = vrot.lane.b32.xlu1 %v904_v18, %s1777_s17 }
  0xcd   : > { %v520_v49 = vpop.permute.xlu0 %519  ;;  %v522_v23 = vpop.permute.xlu1 %521  ;;  %v1098_v24 = vld [vmem:[#allocation2 + $0x38] sm:$0xff] }
  0xce   : > { %560 = vst.msk [vmem:[#allocation2 + $0x40] sm:$0xff] %vm551_vm7, %v520_v49  ;;  %561 = vst.msk [vmem:[#allocation2 + $0x48] sm:$0xff] %vm551_vm7, %v522_v23  ;;  %1683 = vmatmul.mubr.f32.gmra.mxu0 %v1098_v24 }
  0xcf   : > { %1038 = vrot.lane.b32.xlu0 %v1000_v22, %s1778_s20  ;;  %753 = vrot.lane.b32.xlu1 %v2118_v55, %s1775_s7  ;;  %v1009_v22 = vld [vmem:[%s1910_s30 + $0xfa] sm:$0x3f] }
  0xd1   : > { %v620_v25 = vpop.permute.xlu0 %619  ;;  %v329_v26 = vpop.permute.xlu1 %328 }
  0xd2   : > { %660 = vst.msk [vmem:[#allocation2 + $0x40] sm:$0xff] %vm651_vm8, %v620_v25 }
  0xd3   : > { %367 = vst.msk [vmem:[#allocation2 + $0x51] sm:$0xff] %vm356_vm5, %v329_v26  ;;  %1040 = vrot.lane.b32.xlu0 %v1001_v51, %s1778_s20  ;;  %755 = vrot.lane.b32.xlu1 %v2127_v57, %s1775_s7 }
  0xd5   : > { %v622_v27 = vpop.permute.xlu0 %621  ;;  %v331_v28 = vpop.permute.xlu1 %330 }
  0xd6   : > { %661 = vst.msk [vmem:[#allocation2 + $0x48] sm:$0xff] %vm651_vm8, %v622_v27 }
  0xd7   : > { %368 = vst.msk [vmem:[#allocation2 + $0x59] sm:$0xff] %vm356_vm5, %v331_v28  ;;  %849 = vrot.lane.b32.xlu0 %v2118_v55, %s1776_s8  ;;  %851 = vrot.lane.b32.xlu1 %v2127_v57, %s1776_s8  ;;  %v1003_v57 = vld [vmem:[%s1910_s30 + $0xca] sm:$0xff] }
  0xd9   : > { %v427_v33 = vpop.permute.xlu0 %426  ;;  %v429_v34 = vpop.permute.xlu1 %428  ;;  %v1099_v36 = vld [vmem:[#allocation2 + $0x40] sm:$0xff] }
  0xda   : > { %465 = vst.msk [vmem:[#allocation2 + $0x50] sm:$0xff] %vm454_vm6, %v427_v33  ;;  %466 = vst.msk [vmem:[#allocation2 + $0x58] sm:$0xff] %vm454_vm6, %v429_v34  ;;  %1685 = vmatprep.mubr.f32.mxu0 %v1099_v36 }
  0xdb   : > { %945 = vrot.lane.b32.xlu0 %v905_v29, %s1777_s17  ;;  %947 = vrot.lane.b32.xlu1 %v906_v30, %s1777_s17 }
  0xdd   : > { %v524_v55 = vpop.permute.xlu0 %523  ;;  %v526_v31 = vpop.permute.xlu1 %525  ;;  %v1100_v39 = vld [vmem:[#allocation2 + $0x48] sm:$0xff] }
  0xde   : > { %562 = vst.msk [vmem:[#allocation2 + $0x50] sm:$0xff] %vm551_vm7, %v524_v55  ;;  %563 = vst.msk [vmem:[#allocation2 + $0x58] sm:$0xff] %vm551_vm7, %v526_v31  ;;  %1686 = vmatmul.mubr.f32.gmra.mxu0 %v1100_v39 }
  0xdf   : > { %1042 = vrot.lane.b32.xlu0 %v1002_v37, %s1778_s20  ;;  %757 = vrot.lane.b32.xlu1 %v2144_v61, %s1775_s7 }
  0xe1   : > { %v624_v40 = vpop.permute.xlu0 %623  ;;  %v333_v32 = vpop.permute.xlu1 %332 }
  0xe2   : > { %662 = vst.msk [vmem:[#allocation2 + $0x50] sm:$0xff] %vm651_vm8, %v624_v40 }
  0xe3   : > { %369 = vst.msk [vmem:[#allocation2 + $0x61] sm:$0xff] %vm356_vm5, %v333_v32  ;;  %1044 = vrot.lane.b32.xlu0 %v1003_v57, %s1778_s20  ;;  %759 = vrot.lane.b32.xlu1 %v2153_v63, %s1775_s7 }
  0xe5   : > { %v626_v41 = vpop.permute.xlu0 %625  ;;  %v335_v42 = vpop.permute.xlu1 %334 }
  0xe6   : > { %663 = vst.msk [vmem:[#allocation2 + $0x58] sm:$0xff] %vm651_vm8, %v626_v41 }
  0xe7   : > { %370 = vst.msk [vmem:[#allocation2 + $0x69] sm:$0xff] %vm356_vm5, %v335_v42  ;;  %853 = vrot.lane.b32.xlu0 %v2144_v61, %s1776_s8  ;;  %855 = vrot.lane.b32.xlu1 %v2153_v63, %s1776_s8  ;;  %v1005_v63 = vld [vmem:[%s1910_s30 + $0xda] sm:$0xff] }
  0xe9   : > { %v431_v47 = vpop.permute.xlu0 %430  ;;  %v433_v48 = vpop.permute.xlu1 %432  ;;  %v1101_v50 = vld [vmem:[#allocation2 + $0x50] sm:$0xff] }
  0xea   : > { %467 = vst.msk [vmem:[#allocation2 + $0x60] sm:$0xff] %vm454_vm6, %v431_v47  ;;  %468 = vst.msk [vmem:[#allocation2 + $0x68] sm:$0xff] %vm454_vm6, %v433_v48  ;;  %1688 = vmatprep.mubr.f32.mxu0 %v1101_v50 }
  0xeb   : > { %949 = vrot.lane.b32.xlu0 %v907_v44, %s1777_s17  ;;  %951 = vrot.lane.b32.xlu1 %v908_v46, %s1777_s17 }
  0xed   : > { %v528_v61 = vpop.permute.xlu0 %527  ;;  %v530_v53 = vpop.permute.xlu1 %529  ;;  %v1102_v54 = vld [vmem:[#allocation2 + $0x58] sm:$0xff] }
  0xee   : > { %564 = vst.msk [vmem:[#allocation2 + $0x60] sm:$0xff] %vm551_vm7, %v528_v61  ;;  %565 = vst.msk [vmem:[#allocation2 + $0x68] sm:$0xff] %vm551_vm7, %v530_v53  ;;  %1689 = vmatmul.mubr.f32.gmra.mxu0 %v1102_v54 }
  0xef   : > { %1046 = vrot.lane.b32.xlu0 %v1004_v52, %s1778_s20  ;;  %761 = vrot.lane.b32.xlu1 %v2170_v4, %s1775_s7 }
  0xf1   : > { %v628_v35 = vpop.permute.xlu0 %627  ;;  %v337_v56 = vpop.permute.xlu1 %336 }
  0xf2   : > { %664 = vst.msk [vmem:[#allocation2 + $0x60] sm:$0xff] %vm651_vm8, %v628_v35 }
  0xf3   : > { %371 = vst.msk [vmem:[#allocation2 + $0x71] sm:$0xff] %vm356_vm5, %v337_v56  ;;  %1048 = vrot.lane.b32.xlu0 %v1005_v63, %s1778_s20  ;;  %763 = vrot.lane.b32.xlu1 %v2179_v6, %s1775_s7 }
  0xf5   : > { %v630_v58 = vpop.permute.xlu0 %629  ;;  %v339_v38 = vpop.permute.xlu1 %338 }
  0xf6   : > { %665 = vst.msk [vmem:[#allocation2 + $0x68] sm:$0xff] %vm651_vm8, %v630_v58 }
  0xf7   : > { %373 = vst.msk [vmem:[#allocation2 + $0x79] sm:$0x7f] %vm372_vm9, %v339_v38  ;;  %857 = vrot.lane.b32.xlu0 %v2170_v4, %s1776_s8  ;;  %859 = vrot.lane.b32.xlu1 %v2179_v6, %s1776_s8  ;;  %v1006_v4 = vld [vmem:[%s1910_s30 + $0xe2] sm:$0xff] }
  0xf9   : > { %v435_v0 = vpop.permute.xlu0 %434  ;;  %v437_v1 = vpop.permute.xlu1 %436  ;;  %v1103_v2 = vld [vmem:[#allocation2 + $0x60] sm:$0xff] }
  0xfa   : > { %469 = vst.msk [vmem:[#allocation2 + $0x70] sm:$0xff] %vm454_vm6, %v435_v0  ;;  %470 = vst.msk [vmem:[#allocation2 + $0x78] sm:$0xff] %vm454_vm6, %v437_v1  ;;  %1691 = vmatprep.mubr.f32.mxu0 %v1103_v2 }
  0xfb   : > { %570 = vst.msk [vmem:[#allocation2 + $0x7f] sm:$0x1] %vm569_vm10, %v1774_v3  ;;  %953 = vrot.lane.b32.xlu0 %v909_v60, %s1777_s17  ;;  %955 = vrot.lane.b32.xlu1 %v910_v62, %s1777_s17 }
  0xfd   : > { %v532_v6 = vpop.permute.xlu0 %531  ;;  %v534_v5 = vpop.permute.xlu1 %533  ;;  %v1104_v7 = vld [vmem:[#allocation2 + $0x68] sm:$0xff] }
  0xfe   : > { %566 = vst.msk [vmem:[#allocation2 + $0x70] sm:$0xff] %vm551_vm7, %v532_v6  ;;  %1692 = vmatmul.mubr.f32.gmra.mxu0 %v1104_v7 }
  0xff   : > { %568 = vst.msk [vmem:[#allocation2 + $0x78] sm:$0x7f] %vm567_vm11, %v534_v5  ;;  %1050 = vrot.lane.b32.xlu0 %v1006_v4, %s1778_s20  ;;  %765 = vrot.lane.b32.xlu1 %v2198_v11, %s1775_s7 }
 0x100   : > { %670 = vst.msk [vmem:[#allocation2 + $0x7e] sm:$0x3] %vm669_vm12, %v1774_v3 }
 0x101   : > { %v632_v43 = vpop.permute.xlu0 %631  ;;  %v634_v10 = vpop.permute.xlu1 %633 }
 0x102   : > { %666 = vst.msk [vmem:[#allocation2 + $0x70] sm:$0xff] %vm651_vm8, %v632_v43 }
 0x103   : > { %668 = vst.msk [vmem:[#allocation2 + $0x78] sm:$0x3f] %vm667_vm13, %v634_v10  ;;  %1052 = vrot.lane.b32.xlu0 %v1007_v8, %s1778_s20  ;;  %767 = vrot.lane.b32.xlu1 %v720_v9, %s1775_s7 }
 0x105   : > { %v738_v45 = vpop.permute.xlu0 %737  ;;  %v740_v13 = vpop.permute.xlu1 %739 }
 0x106   : > { %785 = vst.msk [vmem:[#allocation2 + $0x81] sm:$0xff] %vm356_vm5, %v738_v45  ;;  %786 = vst.msk [vmem:[#allocation2 + $0x89] sm:$0xff] %vm356_vm5, %v740_v13 }
 0x107   : > { %861 = vrot.lane.b32.xlu0 %v2198_v11, %s1776_s8  ;;  %863 = vrot.lane.b32.xlu1 %v816_v12, %s1776_s8  ;;  %v1008_v11 = vld [vmem:[%s1910_s30 + $0xf2] sm:$0xff] }
 0x109   : > { %v834_v15 = vpop.permute.xlu0 %833  ;;  %v836_v16 = vpop.permute.xlu1 %835  ;;  %v1105_v17 = vld [vmem:[#allocation2 + $0x70] sm:$0xff] }
 0x10a   : > { %v1106_v18 = vld [vmem:[#allocation2 + $0x78] sm:$0xff]  ;;  %881 = vst.msk [vmem:[#allocation2 + $0x80] sm:$0xff] %vm454_vm6, %v834_v15  ;;  %882 = vst.msk [vmem:[#allocation2 + $0x88] sm:$0xff] %vm454_vm6, %v836_v16  ;;  %1694 = vmatprep.mubr.f32.mxu0 %v1105_v17 }
 0x10b   : > { %957 = vrot.lane.b32.xlu0 %v911_v14, %s1777_s17  ;;  %1695 = vmatmul.mubr.f32.gmra.mxu0 %v1106_v18 }
 0x10c   : > { %959 = vrot.lane.b32.xlu1 %v912_v19, %s1777_s17 }
 0x10d   : > { %v930_v20 = vpop.permute.xlu0 %929  ;;  %v932_v21 = vpop.permute.xlu1 %931 }
 0x10e   : > { %977 = vst.msk [vmem:[#allocation2 + $0x80] sm:$0xff] %vm551_vm7, %v930_v20  ;;  %978 = vst.msk [vmem:[#allocation2 + $0x88] sm:$0xff] %vm551_vm7, %v932_v21 }
 0x10f   : > { %1054 = vrot.lane.b32.xlu0 %v1008_v11, %s1778_s20 }
 0x110   : > { %1056 = vrot.lane.b32.xlu1 %v1009_v22, %s1778_s20 }
 0x111   : > { %v1027_v49 = vpop.permute.xlu0 %1026  ;;  %v742_v23 = vpop.permute.xlu1 %741 }
 0x112   : > { %1074 = vst.msk [vmem:[#allocation2 + $0x80] sm:$0xff] %vm651_vm8, %v1027_v49 }
 0x113   : > { %787 = vst.msk [vmem:[#allocation2 + $0x91] sm:$0xff] %vm356_vm5, %v742_v23 }
 0x115   : > { %v1029_v24 = vpop.permute.xlu0 %1028  ;;  %v744_v51 = vpop.permute.xlu1 %743 }
 0x116   : > { %1075 = vst.msk [vmem:[#allocation2 + $0x88] sm:$0xff] %vm651_vm8, %v1029_v24 }
 0x117   : > { %788 = vst.msk [vmem:[#allocation2 + $0x99] sm:$0xff] %vm356_vm5, %v744_v51 }
 0x119   : > { %v838_v25 = vpop.permute.xlu0 %837  ;;  %v840_v26 = vpop.permute.xlu1 %839  ;;  %v1107_v27 = vld [vmem:[#allocation2 + $0x80] sm:$0xff] }
 0x11a   : > { %883 = vst.msk [vmem:[#allocation2 + $0x90] sm:$0xff] %vm454_vm6, %v838_v25  ;;  %884 = vst.msk [vmem:[#allocation2 + $0x98] sm:$0xff] %vm454_vm6, %v840_v26  ;;  %1697 = vmatprep.mubr.f32.mxu1 %v1107_v27 }
 0x11d   : > { %v934_v28 = vpop.permute.xlu0 %933  ;;  %v936_v29 = vpop.permute.xlu1 %935  ;;  %v1108_v30 = vld [vmem:[#allocation2 + $0x88] sm:$0xff] }
 0x11e   : > { %979 = vst.msk [vmem:[#allocation2 + $0x90] sm:$0xff] %vm551_vm7, %v934_v28  ;;  %980 = vst.msk [vmem:[#allocation2 + $0x98] sm:$0xff] %vm551_vm7, %v936_v29  ;;  %1698 = vmatmul.mubr.f32.vlgmr.msra.gmra.mxu1 %v1108_v30 }
 0x121   : > { %v1031_v33 = vpop.permute.xlu0 %1030  ;;  %v746_v34 = vpop.permute.xlu1 %745 }
 0x122   : > { %1076 = vst.msk [vmem:[#allocation2 + $0x90] sm:$0xff] %vm651_vm8, %v1031_v33 }
 0x123   : > { %789 = vst.msk [vmem:[#allocation2 + $0xa1] sm:$0xff] %vm356_vm5, %v746_v34 }
 0x125   : > { %v1033_v36 = vpop.permute.xlu0 %1032  ;;  %v748_v37 = vpop.permute.xlu1 %747 }
 0x126   : > { %1077 = vst.msk [vmem:[#allocation2 + $0x98] sm:$0xff] %vm651_vm8, %v1033_v36 }
 0x127   : > { %790 = vst.msk [vmem:[#allocation2 + $0xa9] sm:$0xff] %vm356_vm5, %v748_v37 }
 0x129   : > { %v842_v55 = vpop.permute.xlu0 %841  ;;  %v844_v31 = vpop.permute.xlu1 %843  ;;  %v1109_v39 = vld [vmem:[#allocation2 + $0x90] sm:$0xff] }
 0x12a   : > { %885 = vst.msk [vmem:[#allocation2 + $0xa0] sm:$0xff] %vm454_vm6, %v842_v55  ;;  %886 = vst.msk [vmem:[#allocation2 + $0xa8] sm:$0xff] %vm454_vm6, %v844_v31  ;;  %1700 = vmatprep.mubr.f32.mxu1 %v1109_v39  ;;  %v2487_v55 = vld [vmem:[%s2534_s2] ss:$0 sm:$0xff] }
 0x12d   : > { %v938_v57 = vpop.permute.xlu0 %937  ;;  %v940_v40 = vpop.permute.xlu1 %939  ;;  %v1110_v32 = vld [vmem:[#allocation2 + $0x98] sm:$0xff] }
 0x12e   : > { %981 = vst.msk [vmem:[#allocation2 + $0xa0] sm:$0xff] %vm551_vm7, %v938_v57  ;;  %982 = vst.msk [vmem:[#allocation2 + $0xa8] sm:$0xff] %vm551_vm7, %v940_v40  ;;  %1701 = vmatmul.mubr.f32.gmra.mxu1 %v1110_v32 }
 0x131   : > { %v1035_v41 = vpop.permute.xlu0 %1034  ;;  %v750_v42 = vpop.permute.xlu1 %749 }
 0x132   : > { %1078 = vst.msk [vmem:[#allocation2 + $0xa0] sm:$0xff] %vm651_vm8, %v1035_v41 }
 0x133   : > { %791 = vst.msk [vmem:[#allocation2 + $0xb1] sm:$0xff] %vm356_vm5, %v750_v42 }
 0x135   : > { %v1037_v44 = vpop.permute.xlu0 %1036  ;;  %v752_v46 = vpop.permute.xlu1 %751 }
 0x136   : > { %1079 = vst.msk [vmem:[#allocation2 + $0xa8] sm:$0xff] %vm651_vm8, %v1037_v44 }
 0x137   : > { %792 = vst.msk [vmem:[#allocation2 + $0xb9] sm:$0xff] %vm356_vm5, %v752_v46 }
 0x139   : > { %v846_v47 = vpop.permute.xlu0 %845  ;;  %v848_v48 = vpop.permute.xlu1 %847  ;;  %v1111_v50 = vld [vmem:[#allocation2 + $0xa0] sm:$0xff] }
 0x13a   : > { %887 = vst.msk [vmem:[#allocation2 + $0xb0] sm:$0xff] %vm454_vm6, %v846_v47  ;;  %888 = vst.msk [vmem:[#allocation2 + $0xb8] sm:$0xff] %vm454_vm6, %v848_v48  ;;  %1703 = vmatprep.mubr.f32.mxu1 %v1111_v50 }
 0x13d   : > { %v942_v52 = vpop.permute.xlu0 %941  ;;  %v944_v61 = vpop.permute.xlu1 %943  ;;  %v1112_v53 = vld [vmem:[#allocation2 + $0xa8] sm:$0xff] }
 0x13e   : > { %983 = vst.msk [vmem:[#allocation2 + $0xb0] sm:$0xff] %vm551_vm7, %v942_v52  ;;  %984 = vst.msk [vmem:[#allocation2 + $0xb8] sm:$0xff] %vm551_vm7, %v944_v61  ;;  %1704 = vmatmul.mubr.f32.gmra.mxu1 %v1112_v53 }
 0x141   : > { %v1039_v54 = vpop.permute.xlu0 %1038  ;;  %v754_v63 = vpop.permute.xlu1 %753 }
 0x142   : > { %1080 = vst.msk [vmem:[#allocation2 + $0xb0] sm:$0xff] %vm651_vm8, %v1039_v54 }
 0x143   : > { %793 = vst.msk [vmem:[#allocation2 + $0xc1] sm:$0xff] %vm356_vm5, %v754_v63 }
 0x145   : > { %v1041_v35 = vpop.permute.xlu0 %1040  ;;  %v756_v56 = vpop.permute.xlu1 %755 }
 0x146   : > { %1081 = vst.msk [vmem:[#allocation2 + $0xb8] sm:$0xff] %vm651_vm8, %v1041_v35 }
 0x147   : > { %794 = vst.msk [vmem:[#allocation2 + $0xc9] sm:$0xff] %vm356_vm5, %v756_v56 }
 0x149   : > { %v850_v58 = vpop.permute.xlu0 %849  ;;  %v852_v38 = vpop.permute.xlu1 %851  ;;  %v1113_v59 = vld [vmem:[#allocation2 + $0xb0] sm:$0xff] }
 0x14a   : > { %889 = vst.msk [vmem:[#allocation2 + $0xc0] sm:$0xff] %vm454_vm6, %v850_v58  ;;  %890 = vst.msk [vmem:[#allocation2 + $0xc8] sm:$0xff] %vm454_vm6, %v852_v38  ;;  %1706 = vmatprep.mubr.f32.mxu1 %v1113_v59 }
 0x14d   : > { %v946_v60 = vpop.permute.xlu0 %945  ;;  %v948_v62 = vpop.permute.xlu1 %947  ;;  %v1114_v0 = vld [vmem:[#allocation2 + $0xb8] sm:$0xff] }
 0x14e   : > { %985 = vst.msk [vmem:[#allocation2 + $0xc0] sm:$0xff] %vm551_vm7, %v946_v60  ;;  %986 = vst.msk [vmem:[#allocation2 + $0xc8] sm:$0xff] %vm551_vm7, %v948_v62  ;;  %1707 = vmatmul.mubr.f32.gmra.mxu1 %v1114_v0 }
 0x151   : > { %v1043_v1 = vpop.permute.xlu0 %1042  ;;  %v758_v2 = vpop.permute.xlu1 %757 }
 0x152   : > { %1082 = vst.msk [vmem:[#allocation2 + $0xc0] sm:$0xff] %vm651_vm8, %v1043_v1 }
 0x153   : > { %795 = vst.msk [vmem:[#allocation2 + $0xd1] sm:$0xff] %vm356_vm5, %v758_v2 }
 0x155   : > { %v1045_v4 = vpop.permute.xlu0 %1044  ;;  %v760_v6 = vpop.permute.xlu1 %759 }
 0x156   : > { %1083 = vst.msk [vmem:[#allocation2 + $0xc8] sm:$0xff] %vm651_vm8, %v1045_v4 }
 0x157   : > { %796 = vst.msk [vmem:[#allocation2 + $0xd9] sm:$0xff] %vm356_vm5, %v760_v6 }
 0x159   : > { %v854_v5 = vpop.permute.xlu0 %853  ;;  %v856_v7 = vpop.permute.xlu1 %855  ;;  %v1115_v8 = vld [vmem:[#allocation2 + $0xc0] sm:$0xff] }
 0x15a   : > { %891 = vst.msk [vmem:[#allocation2 + $0xd0] sm:$0xff] %vm454_vm6, %v854_v5  ;;  %892 = vst.msk [vmem:[#allocation2 + $0xd8] sm:$0xff] %vm454_vm6, %v856_v7  ;;  %1709 = vmatprep.mubr.f32.mxu1 %v1115_v8 }
 0x15d   : > { %v950_v9 = vpop.permute.xlu0 %949  ;;  %v952_v43 = vpop.permute.xlu1 %951  ;;  %v1116_v10 = vld [vmem:[#allocation2 + $0xc8] sm:$0xff] }
 0x15e   : > { %987 = vst.msk [vmem:[#allocation2 + $0xd0] sm:$0xff] %vm551_vm7, %v950_v9  ;;  %988 = vst.msk [vmem:[#allocation2 + $0xd8] sm:$0xff] %vm551_vm7, %v952_v43  ;;  %1710 = vmatmul.mubr.f32.gmra.mxu1 %v1116_v10  ;;  %v1675_v34 = vpop.f32.mrf.mxu0 }
 0x15f   : > { %v1218_v57 = vadd.f32 %v1675_v34, %v2487_v55 }
 0x160   : > { %v1212_v36 = vpop.f32.mrf.mxu0 }
 0x161   : > { %v1047_v12 = vpop.permute.xlu0 %1046  ;;  %v762_v45 = vpop.permute.xlu1 %761  ;;  %v1372_v42 = vmax.f32 %v1218_v57, 0.0 }
 0x162   : > { %1084 = vst.msk [vmem:[#allocation2 + $0xd0] sm:$0xff] %vm651_vm8, %v1047_v12 }
 0x163   : > { %797 = vst.msk [vmem:[#allocation2 + $0xe1] sm:$0xff] %vm356_vm5, %v762_v45  ;;  %v1442_v52 = vmul.f32 %v1372_v42, %v1372_v42 }
 0x165   : > { %v1049_v13 = vpop.permute.xlu0 %1048  ;;  %v764_v14 = vpop.permute.xlu1 %763 }
 0x166   : > { %1085 = vst.msk [vmem:[#allocation2 + $0xd8] sm:$0xff] %vm651_vm8, %v1049_v13 }
 0x167   : > { %798 = vst.msk [vmem:[#allocation2 + $0xe9] sm:$0xff] %vm356_vm5, %v764_v14 }
 0x169   : > { %v858_v15 = vpop.permute.xlu0 %857  ;;  %v860_v16 = vpop.permute.xlu1 %859  ;;  %v1117_v17 = vld [vmem:[#allocation2 + $0xd0] sm:$0xff] }
 0x16a   : > { %893 = vst.msk [vmem:[#allocation2 + $0xe0] sm:$0xff] %vm454_vm6, %v858_v15  ;;  %894 = vst.msk [vmem:[#allocation2 + $0xe8] sm:$0xff] %vm454_vm6, %v860_v16  ;;  %1712 = vmatprep.mubr.f32.mxu1 %v1117_v17 }
 0x16d   : > { %v954_v18 = vpop.permute.xlu0 %953  ;;  %v956_v19 = vpop.permute.xlu1 %955  ;;  %v1118_v11 = vld [vmem:[#allocation2 + $0xd8] sm:$0xff] }
 0x16e   : > { %989 = vst.msk [vmem:[#allocation2 + $0xe0] sm:$0xff] %vm551_vm7, %v954_v18  ;;  %990 = vst.msk [vmem:[#allocation2 + $0xe8] sm:$0xff] %vm551_vm7, %v956_v19  ;;  %1713 = vmatmul.mubr.f32.gmra.mxu1 %v1118_v11  ;;  %v1678_v37 = vpop.f32.mrf.mxu0 }
 0x16f   : > { %v1228_v48 = vadd.f32 %v1678_v37, %v2487_v55 }
 0x170   : > { %v1222_v31 = vpop.f32.mrf.mxu0 }
 0x171   : > { %v1051_v20 = vpop.permute.xlu0 %1050  ;;  %v766_v21 = vpop.permute.xlu1 %765  ;;  %v1223_v40 = vadd.f32 %v2487_v55, %v1222_v31  ;;  %v1374_v35 = vmax.f32 %v1228_v48, 0.0 }
 0x172   : > { %1086 = vst.msk [vmem:[#allocation2 + $0xe0] sm:$0xff] %vm651_vm8, %v1051_v20 }
 0x173   : > { %799 = vst.msk [vmem:[#allocation2 + $0xf1] sm:$0xff] %vm356_vm5, %v766_v21  ;;  %v1373_v44 = vmax.f32 %v1223_v40, 0.0  ;;  %v1444_v0 = vmul.f32 %v1374_v35, %v1374_v35 }
 0x175   : > { %v1053_v22 = vpop.permute.xlu0 %1052  ;;  %v768_v49 = vpop.permute.xlu1 %767  ;;  %v1443_v53 = vmul.f32 %v1373_v44, %v1373_v44 }
 0x176   : > { %1087 = vst.msk [vmem:[#allocation2 + $0xe8] sm:$0xff] %vm651_vm8, %v1053_v22 }
 0x177   : > { %800 = vst.msk [vmem:[#allocation2 + $0xf9] sm:$0x7f] %vm372_vm9, %v768_v49 }
 0x179   : > { %v862_v23 = vpop.permute.xlu0 %861  ;;  %v864_v24 = vpop.permute.xlu1 %863  ;;  %v1119_v51 = vld [vmem:[#allocation2 + $0xe0] sm:$0xff] }
 0x17a   : > { %895 = vst.msk [vmem:[#allocation2 + $0xf0] sm:$0xff] %vm454_vm6, %v862_v23  ;;  %896 = vst.msk [vmem:[#allocation2 + $0xf8] sm:$0xff] %vm454_vm6, %v864_v24  ;;  %1715 = vmatprep.mubr.f32.mxu1 %v1119_v51 }
 0x17b   : > { %993 = vst.msk [vmem:[#allocation2 + $0xff] sm:$0x1] %vm569_vm10, %v1774_v3 }
 0x17d   : > { %v958_v25 = vpop.permute.xlu0 %957  ;;  %v1120_v26 = vld [vmem:[#allocation2 + $0xe8] sm:$0xff] }
 0x17e   : > { %991 = vst.msk [vmem:[#allocation2 + $0xf0] sm:$0xff] %vm551_vm7, %v958_v25  ;;  %v960_v27 = vpop.permute.xlu1 %959  ;;  %1716 = vmatmul.mubr.f32.gmra.mxu1 %v1120_v26  ;;  %v1681_v39 = vpop.f32.mrf.mxu0 }
 0x17f   : > { %992 = vst.msk [vmem:[#allocation2 + $0xf8] sm:$0x7f] %vm567_vm11, %v960_v27  ;;  %v1238_v60 = vadd.f32 %v1681_v39, %v2487_v55 }
 0x180   : > { %1090 = vst.msk [vmem:[#allocation2 + $0xfe] sm:$0x3] %vm669_vm12, %v1774_v3  ;;  %v1213_v3 = vadd.f32 %v2487_v55, %v1212_v36  ;;  %v1232_v41 = vpop.f32.mrf.mxu0 }
 0x181   : > { %v1055_v28 = vpop.permute.xlu0 %1054  ;;  %v1233_v50 = vadd.f32 %v2487_v55, %v1232_v41  ;;  %v1376_v6 = vmax.f32 %v1238_v60, 0.0 }
 0x182   : > { %1088 = vst.msk [vmem:[#allocation2 + $0xf0] sm:$0xff] %vm651_vm8, %v1055_v28  ;;  %v1057_v29 = vpop.permute.xlu1 %1056  ;;  %v1371_v32 = vmax.f32 %v1213_v3, 0.0 }
 0x183   : > { %1089 = vst.msk [vmem:[#allocation2 + $0xf8] sm:$0x3f] %vm667_vm13, %v1057_v29  ;;  %v1375_v58 = vmax.f32 %v1233_v50, 0.0  ;;  %v1446_v45 = vmul.f32 %v1376_v6, %v1376_v6 }
 0x184   : > { %v1441_v47 = vmul.f32 %v1371_v32, %v1371_v32  ;;  %v1403_v61 = vadd.f32 %v1372_v42, %v1371_v32 }
 0x185   : > { %v1445_v2 = vmul.f32 %v1375_v58, %v1375_v58 }
 0x186   : > { %v1473_v63 = vadd.f32 %v1442_v52, %v1441_v47  ;;  %v1404_v56 = vadd.f32 %v1403_v61, %v1373_v44 }
 0x188   : > { %v1474_v59 = vadd.f32 %v1473_v63, %v1443_v53  ;;  %v1405_v1 = vadd.f32 %v1404_v56, %v1374_v35 }
 0x189   : > { %v1121_v30 = vld [vmem:[#allocation2 + $0xf0] sm:$0xff] }
 0x18a   : > { %1718 = vmatprep.mubr.f32.mxu1 %v1121_v30  ;;  %v1122_v33 = vld [vmem:[#allocation2 + $0xf8] sm:$0xff]  ;;  %v1406_v5 = vadd.f32 %v1405_v1, %v1375_v58  ;;  %v1475_v7 = vadd.f32 %v1474_v59, %v1444_v0 }
 0x18b   : > { %1719 = vmatmul.mubr.f32.gmra.mxu1 %v1122_v33 }
 0x18c   : > { %v1476_v43 = vadd.f32 %v1475_v7, %v1445_v2  ;;  %v1407_v13 = vadd.f32 %v1406_v5, %v1376_v6 }
 0x18e   : > { %v1684_v46 = vpop.f32.mrf.mxu0  ;;  %v1477_v18 = vadd.f32 %v1476_v43, %v1446_v45 }
 0x18f   : > { %v1248_v10 = vadd.f32 %v1684_v46, %v2487_v55 }
 0x190   : > { %v1242_v54 = vpop.f32.mrf.mxu0 }
 0x191   : > { %v1243_v62 = vadd.f32 %v2487_v55, %v1242_v54  ;;  %v1378_v16 = vmax.f32 %v1248_v10, 0.0 }
 0x193   : > { %v1377_v8 = vmax.f32 %v1243_v62, 0.0  ;;  %v1448_v49 = vmul.f32 %v1378_v16, %v1378_v16 }
 0x195   : > { %v1447_v14 = vmul.f32 %v1377_v8, %v1377_v8  ;;  %v1408_v17 = vadd.f32 %v1407_v13, %v1377_v8 }
 0x197   : > { %v1478_v20 = vadd.f32 %v1477_v18, %v1447_v14  ;;  %v1409_v23 = vadd.f32 %v1408_v17, %v1378_v16 }
 0x199   : > { %v1479_v27 = vadd.f32 %v1478_v20, %v1448_v49 }
 0x19e   : > { %v1687_v38 = vpop.f32.mrf.mxu0 }
 0x19f   : > { %v1258_v21 = vadd.f32 %v1687_v38, %v2487_v55 }
 0x1a0   : > { %v1252_v4 = vpop.f32.mrf.mxu0 }
 0x1a1   : > { %v1253_v12 = vadd.f32 %v2487_v55, %v1252_v4  ;;  %v1380_v25 = vmax.f32 %v1258_v21, 0.0 }
 0x1a3   : > { %v1379_v19 = vmax.f32 %v1253_v12, 0.0  ;;  %v1450_v36 = vmul.f32 %v1380_v25, %v1380_v25 }
 0x1a5   : > { %v1449_v24 = vmul.f32 %v1379_v19, %v1379_v19  ;;  %v1410_v26 = vadd.f32 %v1409_v23, %v1379_v19 }
 0x1a7   : > { %v1480_v30 = vadd.f32 %v1479_v27, %v1449_v24  ;;  %v1411_v37 = vadd.f32 %v1410_v26, %v1380_v25 }
 0x1a9   : > { %v1481_v40 = vadd.f32 %v1480_v30, %v1450_v36 }
 0x1ae   : > { %v1690_v9 = vpop.f32.mrf.mxu0 }
 0x1af   : > { %v1268_v33 = vadd.f32 %v1690_v9, %v2487_v55 }
 0x1b0   : > { %v1262_v15 = vpop.f32.mrf.mxu0 }
 0x1b1   : > { %v1263_v22 = vadd.f32 %v2487_v55, %v1262_v15  ;;  %v1382_v39 = vmax.f32 %v1268_v33, 0.0 }
 0x1b3   : > { %v1381_v28 = vmax.f32 %v1263_v22, 0.0  ;;  %v1452_v47 = vmul.f32 %v1382_v39, %v1382_v39 }
 0x1b5   : > { %v1451_v31 = vmul.f32 %v1381_v28, %v1381_v28  ;;  %v1412_v57 = vadd.f32 %v1411_v37, %v1381_v28 }
 0x1b7   : > { %v1482_v42 = vadd.f32 %v1481_v40, %v1451_v31  ;;  %v1413_v48 = vadd.f32 %v1412_v57, %v1382_v39 }
 0x1b9   : > { %v1483_v54 = vadd.f32 %v1482_v42, %v1452_v47 }
 0x1be   : > { %v1693_v11 = vpop.f32.mrf.mxu0 }
 0x1bf   : > { %v1278_v44 = vadd.f32 %v1693_v11, %v2487_v55 }
 0x1c0   : > { %v1272_v51 = vpop.f32.mrf.mxu0 }
 0x1c1   : > { %v1273_v34 = vadd.f32 %v2487_v55, %v1272_v51  ;;  %v1384_v61 = vmax.f32 %v1278_v44, 0.0 }
 0x1c3   : > { %v1383_v32 = vmax.f32 %v1273_v34, 0.0  ;;  %v1454_v59 = vmul.f32 %v1384_v61, %v1384_v61 }
 0x1c5   : > { %v1453_v50 = vmul.f32 %v1383_v32, %v1383_v32  ;;  %v1414_v53 = vadd.f32 %v1413_v48, %v1383_v32 }
 0x1c7   : > { %v1484_v56 = vadd.f32 %v1483_v54, %v1453_v50  ;;  %v1415_v60 = vadd.f32 %v1414_v53, %v1384_v61 }
 0x1c9   : > { %v1485_v4 = vadd.f32 %v1484_v56, %v1454_v59 }
 0x1cb   : > { %v1696_v29 = vpop.f32.mrf.mxu0 }
 0x1cc   : > { %v1288_v58 = vadd.f32 %v1696_v29, %v2487_v55 }
 0x1cd   : > { %v1282_v3 = vpop.f32.mrf.mxu0 }
 0x1ce   : > { %v1283_v46 = vadd.f32 %v2487_v55, %v1282_v3  ;;  %v1386_v1 = vmax.f32 %v1288_v58, 0.0 }
 0x1d0   : > { %v1385_v63 = vmax.f32 %v1283_v46, 0.0  ;;  %v1456_v43 = vmul.f32 %v1386_v1, %v1386_v1 }
 0x1d2   : > { %v1455_v62 = vmul.f32 %v1385_v63, %v1385_v63  ;;  %v1416_v2 = vadd.f32 %v1415_v60, %v1385_v63 }
 0x1d4   : > { %v1486_v7 = vadd.f32 %v1485_v4, %v1455_v62  ;;  %v1417_v10 = vadd.f32 %v1416_v2, %v1386_v1 }
 0x1d6   : > { %v1487_v15 = vadd.f32 %v1486_v7, %v1456_v43 }
 0x1de   : > { %v1699_v41 = vpop.f32.mrf.mxu1 }
 0x1df   : > { %v1298_v8 = vadd.f32 %v1699_v41, %v2487_v55 }
 0x1e0   : > { %v1292_v52 = vpop.f32.mrf.mxu1 }
 0x1e1   : > { %v1293_v38 = vadd.f32 %v2487_v55, %v1292_v52  ;;  %v1388_v13 = vmax.f32 %v1298_v8, 0.0 }
 0x1e3   : > { %v1387_v6 = vmax.f32 %v1293_v38, 0.0  ;;  %v1458_v20 = vmul.f32 %v1388_v13, %v1388_v13 }
 0x1e5   : > { %v1457_v12 = vmul.f32 %v1387_v6, %v1387_v6  ;;  %v1418_v14 = vadd.f32 %v1417_v10, %v1387_v6 }
 0x1e7   : > { %v1488_v18 = vadd.f32 %v1487_v15, %v1457_v12  ;;  %v1419_v21 = vadd.f32 %v1418_v14, %v1388_v13 }
 0x1e9   : > { %v1489_v51 = vadd.f32 %v1488_v18, %v1458_v20 }
 0x1ee   : > { %v1702_v35 = vpop.f32.mrf.mxu1 }
 0x1ef   : > { %v1308_v19 = vadd.f32 %v1702_v35, %v2487_v55 }
 0x1f0   : > { %v1302_v0 = vpop.f32.mrf.mxu1 }
 0x1f1   : > { %v1303_v9 = vadd.f32 %v2487_v55, %v1302_v0  ;;  %v1390_v23 = vmax.f32 %v1308_v19, 0.0 }
 0x1f3   : > { %v1389_v16 = vmax.f32 %v1303_v9, 0.0  ;;  %v1460_v30 = vmul.f32 %v1390_v23, %v1390_v23 }
 0x1f5   : > { %v1459_v22 = vmul.f32 %v1389_v16, %v1389_v16  ;;  %v1420_v24 = vadd.f32 %v1419_v21, %v1389_v16 }
 0x1f7   : > { %v1490_v27 = vadd.f32 %v1489_v51, %v1459_v22  ;;  %v1421_v33 = vadd.f32 %v1420_v24, %v1390_v23 }
 0x1f9   : > { %v1491_v3 = vadd.f32 %v1490_v27, %v1460_v30 }
 0x1fe   : > { %v1705_v5 = vpop.f32.mrf.mxu1 }
 0x1ff   : > { %v1318_v28 = vadd.f32 %v1705_v5, %v2487_v55 }
 0x200   : > { %v1312_v45 = vpop.f32.mrf.mxu1 }
 0x201   : > { %v1313_v11 = vadd.f32 %v2487_v55, %v1312_v45  ;;  %v1392_v37 = vmax.f32 %v1318_v28, 0.0 }
 0x203   : > { %v1391_v25 = vmax.f32 %v1313_v11, 0.0  ;;  %v1462_v42 = vmul.f32 %v1392_v37, %v1392_v37 }
 0x205   : > { %v1461_v34 = vmul.f32 %v1391_v25, %v1391_v25  ;;  %v1422_v31 = vadd.f32 %v1421_v33, %v1391_v25 }
 0x207   : > { %v1492_v40 = vadd.f32 %v1491_v3, %v1461_v34  ;;  %v1423_v44 = vadd.f32 %v1422_v31, %v1392_v37 }
 0x209   : > { %v1493_v52 = vadd.f32 %v1492_v40, %v1462_v42 }
 0x20e   : > { %v1708_v17 = vpop.f32.mrf.mxu1 }
 0x20f   : > { %v1328_v32 = vadd.f32 %v1708_v17, %v2487_v55 }
 0x210   : > { %v1322_v49 = vpop.f32.mrf.mxu1 }
 0x211   : > { %v1323_v29 = vadd.f32 %v2487_v55, %v1322_v49  ;;  %v1394_v48 = vmax.f32 %v1328_v32, 0.0 }
 0x213   : > { %v1393_v39 = vmax.f32 %v1323_v29, 0.0  ;;  %v1464_v35 = vmul.f32 %v1394_v48, %v1394_v48 }
 0x215   : > { %v1463_v46 = vmul.f32 %v1393_v39, %v1393_v39  ;;  %v1424_v50 = vadd.f32 %v1423_v44, %v1393_v39 }
 0x217   : > { %v1494_v53 = vadd.f32 %v1493_v52, %v1463_v46  ;;  %v1425_v56 = vadd.f32 %v1424_v50, %v1394_v48 }
 0x219   : > { %v1495_v62 = vadd.f32 %v1494_v53, %v1464_v35 }
 0x21e   : > { %v1711_v26 = vpop.f32.mrf.mxu1 }
 0x21f   : > { %v1338_v54 = vadd.f32 %v1711_v26, %v2487_v55 }
 0x220   : > { %v1332_v36 = vpop.f32.mrf.mxu1 }
 0x221   : > { %v1333_v41 = vadd.f32 %v2487_v55, %v1332_v36  ;;  %v1396_v59 = vmax.f32 %v1338_v54, 0.0 }
 0x223   : > { %v1395_v61 = vmax.f32 %v1333_v41, 0.0  ;;  %v1466_v5 = vmul.f32 %v1396_v59, %v1396_v59 }
 0x225   : > { %v1465_v58 = vmul.f32 %v1395_v61, %v1395_v61  ;;  %v1426_v60 = vadd.f32 %v1425_v56, %v1395_v61 }
 0x227   : > { %v1496_v2 = vadd.f32 %v1495_v62, %v1465_v58  ;;  %v1427_v7 = vadd.f32 %v1426_v60, %v1396_v59 }
 0x229   : > { %v1497_v10 = vadd.f32 %v1496_v2, %v1466_v5 }
 0x22e   : > { %v1714_v57 = vpop.f32.mrf.mxu1 }
 0x22f   : > { %v1348_v4 = vadd.f32 %v1714_v57, %v2487_v55 }
 0x230   : > { %v1342_v47 = vpop.f32.mrf.mxu1 }
 0x231   : > { %v1343_v63 = vadd.f32 %v2487_v55, %v1342_v47  ;;  %v1398_v9 = vmax.f32 %v1348_v4, 0.0 }
 0x233   : > { %v1397_v0 = vmax.f32 %v1343_v63, 0.0  ;;  %v1468_v14 = vmul.f32 %v1398_v9, %v1398_v9 }
 0x235   : > { %v1467_v8 = vmul.f32 %v1397_v0, %v1397_v0  ;;  %v1428_v43 = vadd.f32 %v1427_v7, %v1397_v0 }
 0x237   : > { %v1498_v45 = vadd.f32 %v1497_v10, %v1467_v8  ;;  %v1429_v15 = vadd.f32 %v1428_v43, %v1398_v9 }
 0x239   : > { %v1499_v11 = vadd.f32 %v1498_v45, %v1468_v14 }
 0x23e   : > { %v1717_v38 = vpop.f32.mrf.mxu1 }
 0x23f   : > { %v1358_v13 = vadd.f32 %v1717_v38, %v2487_v55 }
 0x240   : > { %v1352_v1 = vpop.f32.mrf.mxu1 }
 0x241   : > { %v1353_v6 = vadd.f32 %v2487_v55, %v1352_v1  ;;  %v1400_v18 = vmax.f32 %v1358_v13, 0.0 }
 0x243   : > { %v1399_v12 = vmax.f32 %v1353_v6, 0.0  ;;  %v1470_v23 = vmul.f32 %v1400_v18, %v1400_v18 }
 0x245   : > { %v1469_v16 = vmul.f32 %v1399_v12, %v1399_v12  ;;  %v1430_v19 = vadd.f32 %v1429_v15, %v1399_v12 }
 0x247   : > { %v1500_v22 = vadd.f32 %v1499_v11, %v1469_v16  ;;  %v1431_v25 = vadd.f32 %v1430_v19, %v1400_v18 }
 0x249   : > { %v1501_v28 = vadd.f32 %v1500_v22, %v1470_v23 }
 0x24b   : > { %v1720_v17 = vpop.f32.mrf.mxu1 }
 0x24c   : > { %v1368_v20 = vadd.f32 %v1720_v17, %v2487_v55 }
 0x24d   : > { %v1362_v21 = vpop.f32.mrf.mxu1 }
 0x24e   : > { %v1363_v49 = vadd.f32 %v2487_v55, %v1362_v21  ;;  %v1402_v24 = vmax.f32 %v1368_v20, 0.0 }
 0x250   : > { %v1401_v51 = vmax.f32 %v1363_v49, 0.0  ;;  %v1472_v29 = vmul.f32 %v1402_v24, %v1402_v24 }
 0x252   : > { %v1432_v26 = vadd.f32 %v1431_v25, %v1401_v51  ;;  %v1471_v27 = vmul.f32 %v1401_v51, %v1401_v51 }
 0x254   : > { %v1433_v30 = vadd.f32 %v1432_v26, %v1402_v24  ;;  %v1502_v33 = vadd.f32 %v1501_v28, %v1471_v27 }
 0x256   : > { %v1434_v34 = vrot.slane %v1433_v30, 4  ;;  %v1503_v36 = vadd.f32 %v1502_v33, %v1472_v29 }
 0x258   : > { %v1435_v37 = vadd.f32 %v1434_v34, %v1433_v30  ;;  %v1504_v31 = vrot.slane %v1503_v36, 4 }
 0x25a   : > { %v1436_v3 = vrot.slane %v1435_v37, 2  ;;  %v1505_v39 = vadd.f32 %v1504_v31, %v1503_v36 }
 0x25c   : > { %v1437_v55 = vadd.f32 %v1436_v3, %v1435_v37  ;;  %v1506_v57 = vrot.slane %v1505_v39, 2 }
 0x25e   : > { %v1438_v40 = vrot.slane %v1437_v55, 1  ;;  %v1507_v32 = vadd.f32 %v1506_v57, %v1505_v39 }
 0x260   : > { %v1439_v41 = vadd.f32 %v1438_v40, %v1437_v55  ;;  %v1508_v42 = vrot.slane %v1507_v32, 1 }
 0x262   : > { %1440 = vst [vmem:[%s201_s13] sm:$0x1] %v1439_v41  ;;  %v1509_v44 = vadd.f32 %v1508_v42, %v1507_v32 }
 0x264   : > { %1510 = vst [vmem:[%s204_s18] sm:$0x1] %v1509_v44 }
 0x265 PF: > { %s15_s15 = sadd.s32 1, %s1772_s15  }
 0x266   : > { %p12_p5 = scmp.ge.s32.totalorder %s15_s15, 4  }
 0x268   :  { %14 = sbr.rel (!%p12_p5) target bundleno = 1 (0x1), region = 74 }

</bundles_post_ra>
